<compile_context>
chip_gen: v7x
topology: tpu7x:2x2x1
jax: 0.10.0
libtpu: 0.0.40
codegen_flags: <defaults>
</compile_context>

<pallas_src>
import functools

import jax
import jax.numpy as jnp
from jax.experimental import pallas as pl
from jax.experimental.pallas import tpu as pltpu


def _round_up(x, m):
    return (x + m - 1) // m * m


# ---------------------------------------------------------------------------
# Pallas kernel: out = relu?( x @ w + b ),  bf16 operands, f32 MXU accumulate
# ---------------------------------------------------------------------------
def _matmul_bias_kernel(x_ref, w_ref, b_ref, o_ref, *, apply_relu):
    acc = jnp.dot(x_ref[...], w_ref[...], preferred_element_type=jnp.float32)
    acc = acc + b_ref[...]                 # f32 epilogue
    if apply_relu:
        acc = jnp.maximum(acc, 0.0)
    o_ref[...] = acc.astype(o_ref.dtype)


def matmul_bias(x, w, b, *, relu, out_dtype, tile_m=512):
    """x: (M, K) bf16, w: (K, N) bf16, b: (N,) f32 -> (M, N) out_dtype.

    Tiled over M (grid axis marked "parallel"); K and N are never padded —
    full-dim blocks are legal on TPU and avoid writing padded lanes to HBM.
    tile_m=512 keeps per-step VMEM well under v7x's 64 MiB even with
    double-buffering (bump it on v5e/v6e if layers get big).
    """
    M, K = x.shape
    Kw, N = w.shape
    assert K == Kw, (K, Kw)
    b2 = b.reshape(1, N).astype(jnp.float32)

    if M <= tile_m:
        tm, Mp = M, M
        xp = x
    else:
        tm = tile_m
        Mp = _round_up(M, tm)
        xp = x if Mp == M else jnp.pad(x, ((0, Mp - M), (0, 0)))
    grid_m = Mp // tm

    out = pl.pallas_call(
        functools.partial(_matmul_bias_kernel, apply_relu=relu),
        out_shape=jax.ShapeDtypeStruct((Mp, N), out_dtype),
        grid=(grid_m,),
        in_specs=[
            pl.BlockSpec((tm, K), lambda i: (i, 0)),   # activation tile (pipelined)
            pl.BlockSpec((K, N), lambda i: (0, 0)),    # weights stay resident
            pl.BlockSpec((1, N), lambda i: (0, 0)),    # bias stays resident
        ],
        out_specs=pl.BlockSpec((tm, N), lambda i: (i, 0)),
        compiler_params=pltpu.CompilerParams(
            dimension_semantics=("parallel",)),
    )(xp, w, b2)
    return out if Mp == M else out[:M]


# ---------------------------------------------------------------------------
# Conv-as-matmul glue (im2col) — plain JAX strided slices, kept in bf16.
# ---------------------------------------------------------------------------
def _im2col(x_nhwc, k, s):
    """(B,H,W,C) -> (B*OH*OW, k*k*C) patches, feature order (kh, kw, c)."""
    B, H, W, C = x_nhwc.shape
    OH = (H - k) // s + 1
    OW = (W - k) // s + 1
    cols = []
    for kh in range(k):
        for kw in range(k):
            cols.append(x_nhwc[:, kh:kh + OH * s:s, kw:kw + OW * s:s, :])
    patches = jnp.concatenate(cols, axis=-1)              # (B, OH, OW, k*k*C)
    return patches.reshape(B * OH * OW, k * k * C), OH, OW


def conv2d_pallas(x_nhwc, w_mat, b, *, k, stride, relu=True):
    """Valid-padding conv; w_mat pre-laid-out as (k*k*Cin, Cout). Output NHWC."""
    B = x_nhwc.shape[0]
    patches, OH, OW = _im2col(x_nhwc, k, stride)
    out = matmul_bias(patches, w_mat, b, relu=relu, out_dtype=jnp.bfloat16)
    return out.reshape(B, OH, OW, -1)


# ---------------------------------------------------------------------------
# Parameters: raw (PyTorch layout, f32) + one-time kernel-ready preparation
# ---------------------------------------------------------------------------
def init_params(key, in_planes, action_space=1, planes=32):
    ks = jax.random.split(key, 8)

    def conv_w(k, cout, cin, ksz):
        fan_in = cin * ksz * ksz
        return jax.random.normal(k, (cout, cin, ksz, ksz), jnp.float32) * (fan_in ** -0.5)

    return {
        "w1": conv_w(ks[0], planes, in_planes, 8),
        "b1": jax.random.normal(ks[1], (planes,), jnp.float32) * 0.01,
        "w2": conv_w(ks[2], 64, planes, 4),
        "b2": jax.random.normal(ks[3], (64,), jnp.float32) * 0.01,
        "w3": conv_w(ks[4], 64, 64, 3),
        "b3": jax.random.normal(ks[5], (64,), jnp.float32) * 0.01,
        "wo": jax.random.normal(ks[6], (action_space, 4096), jnp.float32) * (4096 ** -0.5),
        "bo": jax.random.normal(ks[7], (action_space,), jnp.float32) * 0.01,
    }


def prepare_params(p):
    """One-time static weight prep (hoisted out of the forward path)."""
    def conv_mat(w_oihw, scale=1.0):
        co, ci, kh, kw = w_oihw.shape
        # OIHW -> (kh, kw, ci, co) -> (kh*kw*ci, co), matching _im2col order.
        w = jnp.transpose(w_oihw, (2, 3, 1, 0)).reshape(kh * kw * ci, co)
        return (w * scale).astype(jnp.bfloat16)

    # Final Linear: PyTorch flatten order is NCHW (c,h,w); permute its columns
    # to NHWC (h,w,c) so we can flatten the conv3 output directly.
    a = p["wo"].shape[0]
    wo = p["wo"].reshape(a, 64, 8, 8).transpose(0, 2, 3, 1).reshape(a, 4096)
    return {
        "w1": conv_mat(p["w1"], 1.0 / 255.0),          # fold x/255 into conv1
        "b1": p["b1"].astype(jnp.float32),
        "w2": conv_mat(p["w2"]), "b2": p["b2"].astype(jnp.float32),
        "w3": conv_mat(p["w3"]), "b3": p["b3"].astype(jnp.float32),
        "wo": wo.T.astype(jnp.bfloat16),               # (4096, action_space)
        "bo": p["bo"].astype(jnp.float32),
    }


# ---------------------------------------------------------------------------
# CNN forward (Pallas) and pure-JAX reference
# ---------------------------------------------------------------------------
def cnn_forward(x_nchw, pp):
    """x_nchw: (B, C, 92, 92) float32 in [0, 255] -> (B, action_space) f32."""
    x = jnp.transpose(x_nchw, (0, 2, 3, 1)).astype(jnp.bfloat16)   # NCHW -> NHWC once
    h = conv2d_pallas(x, pp["w1"], pp["b1"], k=8, stride=4)        # (B,22,22,32)
    h = conv2d_pallas(h, pp["w2"], pp["b2"], k=4, stride=2)        # (B,10,10,64)
    h = conv2d_pallas(h, pp["w3"], pp["b3"], k=3, stride=1)        # (B, 8, 8,64)
    flat = h.reshape(h.shape[0], -1)        # NHWC flatten; wo columns pre-permuted
    return matmul_bias(flat, pp["wo"], pp["bo"], relu=False, out_dtype=jnp.float32)


def cnn_forward_ref(x_nchw, params):
    x = x_nchw / 255.0
    dn = ("NCHW", "OIHW", "NCHW")

    def conv(x, w, b, s):
        y = jax.lax.conv_general_dilated(x, w, (s, s), "VALID", dimension_numbers=dn)
        return jax.nn.relu(y + b[None, :, None, None])

    h = conv(x, params["w1"], params["b1"], 4)
    h = conv(h, params["w2"], params["b2"], 2)
    h = conv(h, params["w3"], params["b3"], 1)
    flat = h.reshape(h.shape[0], -1)
    return flat @ params["wo"].T + params["bo"]


if __name__ == "__main__":
    key = jax.random.PRNGKey(0)
    k_x, k_p = jax.random.split(key)

    B, in_planes, H, W = 2, 4, 92, 92     # 92x92 -> 22 -> 10 -> 8, flatten = 4096
    action_space = 1                       # value='state' -> 1 output

    x = jax.random.uniform(k_x, (B, in_planes, H, W), jnp.float32,
                           minval=0.0, maxval=255.0)
    params = init_params(k_p, in_planes, action_space)
    prepped = prepare_params(params)       # one-time, outside the forward path

    fwd = jax.jit(cnn_forward)
    out = jax.block_until_ready(fwd(x, prepped))
    assert out.shape == (B, action_space), out.shape

    ref = cnn_forward_ref(x, params)
    max_err = float(jnp.max(jnp.abs(out - ref)))
    # bf16 MXU inputs (f32 accumulate) -> slightly looser tolerance than pure f32.
    assert jnp.allclose(out, ref, rtol=5e-2, atol=5e-2), max_err

    print("KERNEL_OK")
</pallas_src>

<mosaic_0001>
module attributes {stable_mosaic.version = 11 : i64} {
  func.func @_matmul_bias_kernel(%arg0: i32, %arg1: memref<512x256xbf16, #tpu.memory_space<vmem>>, %arg2: memref<256x32xbf16, #tpu.memory_space<vmem>>, %arg3: memref<1x32xf32, #tpu.memory_space<vmem>>, %arg4: memref<512x32xbf16, #tpu.memory_space<vmem>>) attributes {dimension_semantics = [#tpu.dimension_semantics<parallel>], iteration_bounds = array<i64: 2>, scalar_prefetch = 0 : i64, scratch_operands = 0 : i64, tpu.core_type = #tpu.core_type<tc>, window_params = [{transform_indices = @transform_0, window_bounds = array<i64: 512, 256>}, {pipeline_mode = #tpu.pipeline_mode<synchronous>, transform_indices = @transform_1, window_bounds = array<i64: 256, 32>}, {pipeline_mode = #tpu.pipeline_mode<synchronous>, transform_indices = @transform_2, window_bounds = array<i64: 1, 32>}, {transform_indices = @transform_3, window_bounds = array<i64: 512, 32>}]} {
    %c0 = arith.constant 0 : index
    %c0_0 = arith.constant 0 : index
    %0 = vector.load %arg1[%c0, %c0_0] : memref<512x256xbf16, #tpu.memory_space<vmem>>, vector<512x256xbf16>
    %c0_1 = arith.constant 0 : index
    %c0_2 = arith.constant 0 : index
    %1 = vector.load %arg2[%c0_1, %c0_2] : memref<256x32xbf16, #tpu.memory_space<vmem>>, vector<256x32xbf16>
    %cst = arith.constant dense<0.000000e+00> : vector<512x32xf32>
    %2 = tpu.matmul %0, %1, %cst {dimension_numbers = #tpu.dot_dimension_numbers<[1], [0], [0], [1], [0, 0, 1, 1], [], []>} : vector<512x256xbf16>, vector<256x32xbf16>, vector<512x32xf32> -> vector<512x32xf32>
    %c0_3 = arith.constant 0 : index
    %c0_4 = arith.constant 0 : index
    %3 = vector.load %arg3[%c0_3, %c0_4] : memref<1x32xf32, #tpu.memory_space<vmem>>, vector<1x32xf32>
    %4 = vector.broadcast %3 : vector<1x32xf32> to vector<512x32xf32>
    %5 = arith.addf %2, %4 : vector<512x32xf32>
    %cst_5 = arith.constant 0.000000e+00 : f32
    %6 = vector.broadcast %cst_5 : f32 to vector<512x32xf32>
    %7 = arith.maximumf %5, %6 : vector<512x32xf32>
    %8 = arith.truncf %7 : vector<512x32xf32> to vector<512x32xbf16>
    %c0_6 = arith.constant 0 : index
    %c0_7 = arith.constant 0 : index
    %9 = vector.load %arg4[%c0_6, %c0_7] : memref<512x32xbf16, #tpu.memory_space<vmem>>, vector<512x32xbf16>
    tpu.vector_store %arg4[%c0_6, %c0_7], %8 {strides = array<i32>} : memref<512x32xbf16, #tpu.memory_space<vmem>>, vector<512x32xbf16>,
    return
  }
  func.func @transform_0(%arg0: i32) -> (i32, i32) {
    %c0_i32 = arith.constant 0 : i32
    %c0_i32_0 = arith.constant 0 : i32
    return %arg0, %c0_i32 : i32, i32
  }
  func.func @transform_1(%arg0: i32) -> (i32, i32) {
    %c0_i32 = arith.constant 0 : i32
    %c0_i32_0 = arith.constant 0 : i32
    %c0_i32_1 = arith.constant 0 : i32
    return %c0_i32, %c0_i32_0 : i32, i32
  }
  func.func @transform_2(%arg0: i32) -> (i32, i32) {
    %c0_i32 = arith.constant 0 : i32
    %c0_i32_0 = arith.constant 0 : i32
    %c0_i32_1 = arith.constant 0 : i32
    return %c0_i32, %c0_i32_0 : i32, i32
  }
  func.func @transform_3(%arg0: i32) -> (i32, i32) {
    %c0_i32 = arith.constant 0 : i32
    %c0_i32_0 = arith.constant 0 : i32
    return %arg0, %c0_i32 : i32, i32
  }
}

module attributes {stable_mosaic.version = 11 : i64} {
  func.func @_matmul_bias_kernel(%arg0: i32, %arg1: memref<200x512xbf16, #tpu.memory_space<vmem>>, %arg2: memref<512x64xbf16, #tpu.memory_space<vmem>>, %arg3: memref<1x64xf32, #tpu.memory_space<vmem>>, %arg4: memref<200x64xbf16, #tpu.memory_space<vmem>>) attributes {dimension_semantics = [#tpu.dimension_semantics<parallel>], iteration_bounds = array<i64: 1>, scalar_prefetch = 0 : i64, scratch_operands = 0 : i64, tpu.core_type = #tpu.core_type<tc>, window_params = [{transform_indices = @transform_0, window_bounds = array<i64: 200, 512>}, {pipeline_mode = #tpu.pipeline_mode<synchronous>, transform_indices = @transform_1, window_bounds = array<i64: 512, 64>}, {pipeline_mode = #tpu.pipeline_mode<synchronous>, transform_indices = @transform_2, window_bounds = array<i64: 1, 64>}, {transform_indices = @transform_3, window_bounds = array<i64: 200, 64>}]} {
    %c0 = arith.constant 0 : index
    %c0_0 = arith.constant 0 : index
    %0 = vector.load %arg1[%c0, %c0_0] : memref<200x512xbf16, #tpu.memory_space<vmem>>, vector<200x512xbf16>
    %c0_1 = arith.constant 0 : index
    %c0_2 = arith.constant 0 : index
    %1 = vector.load %arg2[%c0_1, %c0_2] : memref<512x64xbf16, #tpu.memory_space<vmem>>, vector<512x64xbf16>
    %cst = arith.constant dense<0.000000e+00> : vector<200x64xf32>
    %2 = tpu.matmul %0, %1, %cst {dimension_numbers = #tpu.dot_dimension_numbers<[1], [0], [0], [1], [0, 0, 1, 1], [], []>} : vector<200x512xbf16>, vector<512x64xbf16>, vector<200x64xf32> -> vector<200x64xf32>
    %c0_3 = arith.constant 0 : index
    %c0_4 = arith.constant 0 : index
    %3 = vector.load %arg3[%c0_3, %c0_4] : memref<1x64xf32, #tpu.memory_space<vmem>>, vector<1x64xf32>
    %4 = vector.broadcast %3 : vector<1x64xf32> to vector<200x64xf32>
    %5 = arith.addf %2, %4 : vector<200x64xf32>
    %cst_5 = arith.constant 0.000000e+00 : f32
    %6 = vector.broadcast %cst_5 : f32 to vector<200x64xf32>
    %7 = arith.maximumf %5, %6 : vector<200x64xf32>
    %8 = arith.truncf %7 : vector<200x64xf32> to vector<200x64xbf16>
    %c0_6 = arith.constant 0 : index
    %c0_7 = arith.constant 0 : index
    %9 = vector.load %arg4[%c0_6, %c0_7] : memref<200x64xbf16, #tpu.memory_space<vmem>>, vector<200x64xbf16>
    tpu.vector_store %arg4[%c0_6, %c0_7], %8 {strides = array<i32>} : memref<200x64xbf16, #tpu.memory_space<vmem>>, vector<200x64xbf16>,
    return
  }
  func.func @transform_0(%arg0: i32) -> (i32, i32) {
    %c0_i32 = arith.constant 0 : i32
    %c0_i32_0 = arith.constant 0 : i32
    return %arg0, %c0_i32 : i32, i32
  }
  func.func @transform_1(%arg0: i32) -> (i32, i32) {
    %c0_i32 = arith.constant 0 : i32
    %c0_i32_0 = arith.constant 0 : i32
    %c0_i32_1 = arith.constant 0 : i32
    return %c0_i32, %c0_i32_0 : i32, i32
  }
  func.func @transform_2(%arg0: i32) -> (i32, i32) {
    %c0_i32 = arith.constant 0 : i32
    %c0_i32_0 = arith.constant 0 : i32
    %c0_i32_1 = arith.constant 0 : i32
    return %c0_i32, %c0_i32_0 : i32, i32
  }
  func.func @transform_3(%arg0: i32) -> (i32, i32) {
    %c0_i32 = arith.constant 0 : i32
    %c0_i32_0 = arith.constant 0 : i32
    return %arg0, %c0_i32 : i32, i32
  }
}

module attributes {stable_mosaic.version = 11 : i64} {
  func.func @_matmul_bias_kernel(%arg0: i32, %arg1: memref<128x576xbf16, #tpu.memory_space<vmem>>, %arg2: memref<576x64xbf16, #tpu.memory_space<vmem>>, %arg3: memref<1x64xf32, #tpu.memory_space<vmem>>, %arg4: memref<128x64xbf16, #tpu.memory_space<vmem>>) attributes {dimension_semantics = [#tpu.dimension_semantics<parallel>], iteration_bounds = array<i64: 1>, scalar_prefetch = 0 : i64, scratch_operands = 0 : i64, tpu.core_type = #tpu.core_type<tc>, window_params = [{transform_indices = @transform_0, window_bounds = array<i64: 128, 576>}, {pipeline_mode = #tpu.pipeline_mode<synchronous>, transform_indices = @transform_1, window_bounds = array<i64: 576, 64>}, {pipeline_mode = #tpu.pipeline_mode<synchronous>, transform_indices = @transform_2, window_bounds = array<i64: 1, 64>}, {transform_indices = @transform_3, window_bounds = array<i64: 128, 64>}]} {
    %c0 = arith.constant 0 : index
    %c0_0 = arith.constant 0 : index
    %0 = vector.load %arg1[%c0, %c0_0] : memref<128x576xbf16, #tpu.memory_space<vmem>>, vector<128x576xbf16>
    %c0_1 = arith.constant 0 : index
    %c0_2 = arith.constant 0 : index
    %1 = vector.load %arg2[%c0_1, %c0_2] : memref<576x64xbf16, #tpu.memory_space<vmem>>, vector<576x64xbf16>
    %cst = arith.constant dense<0.000000e+00> : vector<128x64xf32>
    %2 = tpu.matmul %0, %1, %cst {dimension_numbers = #tpu.dot_dimension_numbers<[1], [0], [0], [1], [0, 0, 1, 1], [], []>} : vector<128x576xbf16>, vector<576x64xbf16>, vector<128x64xf32> -> vector<128x64xf32>
    %c0_3 = arith.constant 0 : index
    %c0_4 = arith.constant 0 : index
    %3 = vector.load %arg3[%c0_3, %c0_4] : memref<1x64xf32, #tpu.memory_space<vmem>>, vector<1x64xf32>
    %4 = vector.broadcast %3 : vector<1x64xf32> to vector<128x64xf32>
    %5 = arith.addf %2, %4 : vector<128x64xf32>
    %cst_5 = arith.constant 0.000000e+00 : f32
    %6 = vector.broadcast %cst_5 : f32 to vector<128x64xf32>
    %7 = arith.maximumf %5, %6 : vector<128x64xf32>
    %8 = arith.truncf %7 : vector<128x64xf32> to vector<128x64xbf16>
    %c0_6 = arith.constant 0 : index
    %c0_7 = arith.constant 0 : index
    %9 = vector.load %arg4[%c0_6, %c0_7] : memref<128x64xbf16, #tpu.memory_space<vmem>>, vector<128x64xbf16>
    tpu.vector_store %arg4[%c0_6, %c0_7], %8 {strides = array<i32>} : memref<128x64xbf16, #tpu.memory_space<vmem>>, vector<128x64xbf16>,
    return
  }
  func.func @transform_0(%arg0: i32) -> (i32, i32) {
    %c0_i32 = arith.constant 0 : i32
    %c0_i32_0 = arith.constant 0 : i32
    return %arg0, %c0_i32 : i32, i32
  }
  func.func @transform_1(%arg0: i32) -> (i32, i32) {
    %c0_i32 = arith.constant 0 : i32
    %c0_i32_0 = arith.constant 0 : i32
    %c0_i32_1 = arith.constant 0 : i32
    return %c0_i32, %c0_i32_0 : i32, i32
  }
  func.func @transform_2(%arg0: i32) -> (i32, i32) {
    %c0_i32 = arith.constant 0 : i32
    %c0_i32_0 = arith.constant 0 : i32
    %c0_i32_1 = arith.constant 0 : i32
    return %c0_i32, %c0_i32_0 : i32, i32
  }
  func.func @transform_3(%arg0: i32) -> (i32, i32) {
    %c0_i32 = arith.constant 0 : i32
    %c0_i32_0 = arith.constant 0 : i32
    return %arg0, %c0_i32 : i32, i32
  }
}

module attributes {stable_mosaic.version = 11 : i64} {
  func.func @_matmul_bias_kernel(%arg0: i32, %arg1: memref<2x4096xbf16, #tpu.memory_space<vmem>>, %arg2: memref<4096x1xbf16, #tpu.memory_space<vmem>>, %arg3: memref<1x1xf32, #tpu.memory_space<vmem>>, %arg4: memref<2x1xf32, #tpu.memory_space<vmem>>) attributes {dimension_semantics = [#tpu.dimension_semantics<parallel>], iteration_bounds = array<i64: 1>, scalar_prefetch = 0 : i64, scratch_operands = 0 : i64, tpu.core_type = #tpu.core_type<tc>, window_params = [{transform_indices = @transform_0, window_bounds = array<i64: 2, 4096>}, {pipeline_mode = #tpu.pipeline_mode<synchronous>, transform_indices = @transform_1, window_bounds = array<i64: 4096, 1>}, {pipeline_mode = #tpu.pipeline_mode<synchronous>, transform_indices = @transform_2, window_bounds = array<i64: 1, 1>}, {transform_indices = @transform_3, window_bounds = array<i64: 2, 1>}]} {
    %c0 = arith.constant 0 : index
    %c0_0 = arith.constant 0 : index
    %0 = vector.load %arg1[%c0, %c0_0] : memref<2x4096xbf16, #tpu.memory_space<vmem>>, vector<2x4096xbf16>
    %c0_1 = arith.constant 0 : index
    %c0_2 = arith.constant 0 : index
    %1 = vector.load %arg2[%c0_1, %c0_2] : memref<4096x1xbf16, #tpu.memory_space<vmem>>, vector<4096x1xbf16>
    %cst = arith.constant dense<0.000000e+00> : vector<2x1xf32>
    %2 = tpu.matmul %0, %1, %cst {dimension_numbers = #tpu.dot_dimension_numbers<[1], [0], [0], [1], [0, 0, 1, 1], [], []>} : vector<2x4096xbf16>, vector<4096x1xbf16>, vector<2x1xf32> -> vector<2x1xf32>
    %c0_3 = arith.constant 0 : index
    %c0_4 = arith.constant 0 : index
    %3 = vector.load %arg3[%c0_3, %c0_4] : memref<1x1xf32, #tpu.memory_space<vmem>>, vector<1x1xf32>
    %4 = vector.broadcast %3 : vector<1x1xf32> to vector<2x1xf32>
    %5 = arith.addf %2, %4 : vector<2x1xf32>
    %c0_5 = arith.constant 0 : index
    %c0_6 = arith.constant 0 : index
    %6 = vector.load %arg4[%c0_5, %c0_6] : memref<2x1xf32, #tpu.memory_space<vmem>>, vector<2x1xf32>
    tpu.vector_store %arg4[%c0_5, %c0_6], %5 {strides = array<i32>} : memref<2x1xf32, #tpu.memory_space<vmem>>, vector<2x1xf32>,
    return
  }
  func.func @transform_0(%arg0: i32) -> (i32, i32) {
    %c0_i32 = arith.constant 0 : i32
    %c0_i32_0 = arith.constant 0 : i32
    return %arg0, %c0_i32 : i32, i32
  }
  func.func @transform_1(%arg0: i32) -> (i32, i32) {
    %c0_i32 = arith.constant 0 : i32
    %c0_i32_0 = arith.constant 0 : i32
    %c0_i32_1 = arith.constant 0 : i32
    return %c0_i32, %c0_i32_0 : i32, i32
  }
  func.func @transform_2(%arg0: i32) -> (i32, i32) {
    %c0_i32 = arith.constant 0 : i32
    %c0_i32_0 = arith.constant 0 : i32
    %c0_i32_1 = arith.constant 0 : i32
    return %c0_i32, %c0_i32_0 : i32, i32
  }
  func.func @transform_3(%arg0: i32) -> (i32, i32) {
    %c0_i32 = arith.constant 0 : i32
    %c0_i32_0 = arith.constant 0 : i32
    return %arg0, %c0_i32 : i32, i32
  }
}

</mosaic_0001>

<bundles_post_ra>
// kernel: cnn_forward.4
= control target key start
LH: loop header
LB: loop body
LE: loop exit
PB: predicated region body
PF: predicated region fallthrough
CT: control target
= control target key end

     0   :  { %s1831_s12 = smov 0   ;;  %s2197_s0 = inlined_call_operand.vmem [shape: bf16[1024,256], index: 0, kind: input, shape index: {}]   ;;  %s2198_s1 = inlined_call_operand.vmem [shape: bf16[256,32], index: 1, kind: input, shape index: {}]   ;;  %s2199_s2 = inlined_call_operand.vmem [shape: f32[1,32], index: 2, kind: input, shape index: {}]   ;;  %s2200_s3 = inlined_call_operand.vmem [shape: bf16[1024,32], index: 3, kind: output, shape index: {}]  }
   0x1 LB: > { %s1427_s13 = sadd.s32 4294967295, %s1808_s12   ;;  %p1431_p0 = scmp.ge.s32.totalorder %s1808_s12, 1  ;;  %s1808_s12 = sphi %s1831_s12, %s13_s12  }
   0x2   : > { %p139_p1 = scmp.lt.s32.totalorder %s1808_s12, 3 }
   0x4   : > { %p140_p2 = pnand %p1431_p0, %p139_p1 }
   0x5   : > { %v1690_v0 = vld [vmem:[%s2198_s1] sm:$0xff] (!%p140_p2)   ;;  %v1810_v1 = vmov (!%p140_p2), 0   ;;  %s1432_s16 = sshll.u32 (!%p140_p2), %s1427_s13, 6  ;;  %v1691_v2 = vld [vmem:[%s2198_s1 + $0x8] sm:$0xff] (!%p140_p2)   ;;  %v1692_v3 = vld [vmem:[%s2198_s1 + $0x10] sm:$0xff] (!%p140_p2)   ;;  %vm1306_vm0 = vcmask (!%p140_p2), 257024  }
   0x6   : > { %143 = sbr.rel (%p140_p2) target bundleno = 411 (0x19b), region = 32  ;;  %697 = vmatprep.subr.bf16.mxu0 (!%p140_p2), %v1810_v1  ;;  %1649 = vmatprep.subr.bf16.mxu1 (!%p140_p2), %v1810_v1  ;;  %p165_p3 = scmp.lt.s32.totalorder (!%p140_p2), %s1432_s16, 127  ;;  %v1693_v4 = vld [vmem:[%s2198_s1 + $0x18] sm:$0xff] (!%p140_p2)   ;;  %v1694_v5 = vld [vmem:[%s2198_s1 + $0x20] sm:$0xff] (!%p140_p2)   ;;  %v1695_v7 = vld [vmem:[%s2198_s1 + $0x28] sm:$0xff] (!%p140_p2)  }
   0x7   : > { %698 = vmatpush1.bf16.msra.mxu0 (!%p140_p2), %v1690_v0  ;;  %1665 = vmatpush1.bf16.msra.mxu1 (!%p140_p2), %v1690_v0  ;;  %v1696_v9 = vld [vmem:[%s2198_s1 + $0x30] sm:$0xff] (!%p140_p2)   ;;  %v1697_v10 = vld [vmem:[%s2198_s1 + $0x38] sm:$0xff] (!%p140_p2)   ;;  %v1698_v11 = vld [vmem:[%s2198_s1 + $0x40] sm:$0xff] (!%p140_p2)  }
   0x8   : > { %699 = vmatprep.subr.bf16.mxu0 (!%p140_p2), %v1810_v1  ;;  %1650 = vmatprep.subr.bf16.mxu1 (!%p140_p2), %v1810_v1  ;;  %v1699_v12 = vld [vmem:[%s2198_s1 + $0x48] sm:$0xff] (!%p140_p2)   ;;  %v1700_v13 = vld [vmem:[%s2198_s1 + $0x50] sm:$0xff] (!%p140_p2)   ;;  %v1701_v14 = vld [vmem:[%s2198_s1 + $0x58] sm:$0xff] (!%p140_p2)  }
   0x9   : > { %v1702_v15 = vld [vmem:[%s2198_s1 + $0x60] sm:$0xff] (!%p140_p2)   ;;  %v1703_v16 = vld [vmem:[%s2198_s1 + $0x68] sm:$0xff] (!%p140_p2)   ;;  %v1704_v17 = vld [vmem:[%s2198_s1 + $0x70] sm:$0xff] (!%p140_p2)  }
   0xa   : > { %v1705_v18 = vld [vmem:[%s2198_s1 + $0x78] sm:$0xff] (!%p140_p2)  }
   0xb   : > { %700 = vmatpush1.bf16.msra.mxu0 (!%p140_p2), %v1691_v2  ;;  %1666 = vmatpush1.bf16.msra.mxu1 (!%p140_p2), %v1691_v2 }
   0xc   : > { %701 = vmatprep.subr.bf16.mxu0 (!%p140_p2), %v1810_v1  ;;  %1651 = vmatprep.subr.bf16.mxu1 (!%p140_p2), %v1810_v1 }
   0xd   : > { %s2202_s16 = smov (!%p165_p3, %s1432_s16), 127 }
   0xe   : > { %s1584_s23 = sshll.u32 %s2202_s16, 3  ;;  %s1436_s29 = sshll.u32 %s2202_s16, 2 }
   0xf   : > { %702 = vmatpush1.bf16.msra.mxu0 %v1692_v3  ;;  %1667 = vmatpush1.bf16.msra.mxu1 %v1692_v3  ;;  %s1868_s28 = scalar_lea.vmem %s2197_s0, %s1584_s23  ;;  %s2004_s16 = scalar_lea.vmem %s2200_s3, %s1436_s29 }
  0x10   : > { %703 = vmatprep.subr.bf16.mxu0 %v1810_v1  ;;  %1652 = vmatprep.subr.bf16.mxu1 %v1810_v1  ;;  %v1708_v6 = vld [vmem:[%s1868_s28 + $0x4] ss:$8 sps:$4 sm:$0xff]   ;;  %v1706_v19 = vld [vmem:[%s1868_s28] ss:$8 sps:$4 sm:$0xff]   ;;  %v1712_v21 = vld [vmem:[%s1868_s28 + $0x14] ss:$8 sps:$4 sm:$0xff]  }
  0x11   : > { %v1711_v8 = vld [vmem:[%s1868_s28 + $0x104] ss:$8 sps:$4 sm:$0xff]   ;;  %729 = vmatprep.mubr.bf16.mxu0 %v1708_v6  ;;  %v1709_v20 = vld [vmem:[%s1868_s28 + $0x100] ss:$8 sps:$4 sm:$0xff]   ;;  %v1714_v22 = vld [vmem:[%s1868_s28 + $0x114] ss:$8 sps:$4 sm:$0xff]  }
  0x12   : > { %857 = vmatprep.mubr.bf16.mxu1 %v1711_v8  ;;  %v1716_v23 = vld [vmem:[%s1868_s28 + $0x10] ss:$8 sps:$4 sm:$0xff]   ;;  %v1718_v25 = vld [vmem:[%s1868_s28 + $0x24] ss:$8 sps:$4 sm:$0xff]   ;;  %v1722_v27 = vld [vmem:[%s1868_s28 + $0x20] ss:$8 sps:$4 sm:$0xff]  }
  0x13   : > { %704 = vmatpush1.bf16.msra.mxu0 %v1693_v4  ;;  %1668 = vmatpush1.bf16.msra.mxu1 %v1693_v4  ;;  %v1717_v24 = vld [vmem:[%s1868_s28 + $0x110] ss:$8 sps:$4 sm:$0xff]   ;;  %v1720_v26 = vld [vmem:[%s1868_s28 + $0x124] ss:$8 sps:$4 sm:$0xff]   ;;  %v1723_v28 = vld [vmem:[%s1868_s28 + $0x120] ss:$8 sps:$4 sm:$0xff]  }
  0x14   : > { %705 = vmatprep.subr.bf16.mxu0 %v1810_v1  ;;  %1653 = vmatprep.subr.bf16.mxu1 %v1810_v1  ;;  %v1724_v29 = vld [vmem:[%s1868_s28 + $0x34] ss:$8 sps:$4 sm:$0xff]   ;;  %v1728_v31 = vld [vmem:[%s1868_s28 + $0x30] ss:$8 sps:$4 sm:$0xff]   ;;  %v1730_v33 = vld [vmem:[%s1868_s28 + $0x44] ss:$8 sps:$4 sm:$0xff]  }
  0x15   : > { %v1726_v30 = vld [vmem:[%s1868_s28 + $0x134] ss:$8 sps:$4 sm:$0xff]   ;;  %v1729_v32 = vld [vmem:[%s1868_s28 + $0x130] ss:$8 sps:$4 sm:$0xff]   ;;  %v1732_v34 = vld [vmem:[%s1868_s28 + $0x144] ss:$8 sps:$4 sm:$0xff]  }
  0x16   : > { %v1734_v35 = vld [vmem:[%s1868_s28 + $0x40] ss:$8 sps:$4 sm:$0xff]   ;;  %v1736_v37 = vld [vmem:[%s1868_s28 + $0x54] ss:$8 sps:$4 sm:$0xff]   ;;  %v1740_v39 = vld [vmem:[%s1868_s28 + $0x50] ss:$8 sps:$4 sm:$0xff]  }
  0x17   : > { %706 = vmatpush1.bf16.msra.mxu0 %v1694_v5  ;;  %1669 = vmatpush1.bf16.msra.mxu1 %v1694_v5  ;;  %v1735_v36 = vld [vmem:[%s1868_s28 + $0x140] ss:$8 sps:$4 sm:$0xff]   ;;  %v1738_v38 = vld [vmem:[%s1868_s28 + $0x154] ss:$8 sps:$4 sm:$0xff]   ;;  %v1741_v40 = vld [vmem:[%s1868_s28 + $0x150] ss:$8 sps:$4 sm:$0xff]  }
  0x18   : > { %707 = vmatprep.subr.bf16.mxu0 %v1810_v1  ;;  %1654 = vmatprep.subr.bf16.mxu1 %v1810_v1  ;;  %v1742_v41 = vld [vmem:[%s1868_s28 + $0x64] ss:$8 sps:$4 sm:$0xff]   ;;  %v1746_v43 = vld [vmem:[%s1868_s28 + $0x60] ss:$8 sps:$4 sm:$0xff]   ;;  %v1748_v45 = vld [vmem:[%s1868_s28 + $0x74] ss:$8 sps:$4 sm:$0xff]  }
  0x19   : > { %v1744_v42 = vld [vmem:[%s1868_s28 + $0x164] ss:$8 sps:$4 sm:$0xff]   ;;  %v1747_v44 = vld [vmem:[%s1868_s28 + $0x160] ss:$8 sps:$4 sm:$0xff]   ;;  %v1750_v46 = vld [vmem:[%s1868_s28 + $0x174] ss:$8 sps:$4 sm:$0xff]  }
  0x1a   : > { %v1752_v47 = vld [vmem:[%s1868_s28 + $0x70] ss:$8 sps:$4 sm:$0xff]   ;;  %v1754_v49 = vld [vmem:[%s1868_s28 + $0x84] ss:$8 sps:$4 sm:$0xff]   ;;  %v1758_v51 = vld [vmem:[%s1868_s28 + $0x80] ss:$8 sps:$4 sm:$0xff]  }
  0x1b   : > { %708 = vmatpush1.bf16.msra.mxu0 %v1695_v7  ;;  %1670 = vmatpush1.bf16.msra.mxu1 %v1695_v7  ;;  %v1753_v48 = vld [vmem:[%s1868_s28 + $0x170] ss:$8 sps:$4 sm:$0xff]   ;;  %v1756_v50 = vld [vmem:[%s1868_s28 + $0x184] ss:$8 sps:$4 sm:$0xff]   ;;  %v1759_v52 = vld [vmem:[%s1868_s28 + $0x180] ss:$8 sps:$4 sm:$0xff]  }
  0x1c   : > { %709 = vmatprep.subr.bf16.mxu0 %v1810_v1  ;;  %1655 = vmatprep.subr.bf16.mxu1 %v1810_v1  ;;  %v1760_v53 = vld [vmem:[%s1868_s28 + $0x94] ss:$8 sps:$4 sm:$0xff]   ;;  %v1764_v55 = vld [vmem:[%s1868_s28 + $0x90] ss:$8 sps:$4 sm:$0xff]   ;;  %v1766_v57 = vld [vmem:[%s1868_s28 + $0xa4] ss:$8 sps:$4 sm:$0xff]  }
  0x1d   : > { %v1762_v54 = vld [vmem:[%s1868_s28 + $0x194] ss:$8 sps:$4 sm:$0xff]   ;;  %v1765_v56 = vld [vmem:[%s1868_s28 + $0x190] ss:$8 sps:$4 sm:$0xff]   ;;  %v1768_v58 = vld [vmem:[%s1868_s28 + $0x1a4] ss:$8 sps:$4 sm:$0xff]  }
  0x1e   : > { %v1770_v59 = vld [vmem:[%s1868_s28 + $0xa0] ss:$8 sps:$4 sm:$0xff]   ;;  %v1772_v61 = vld [vmem:[%s1868_s28 + $0xb4] ss:$8 sps:$4 sm:$0xff]   ;;  %v1776_v63 = vld [vmem:[%s1868_s28 + $0xb0] ss:$8 sps:$4 sm:$0xff]  }
  0x1f   : > { %710 = vmatpush1.bf16.msra.mxu0 %v1696_v9  ;;  %1671 = vmatpush1.bf16.msra.mxu1 %v1696_v9  ;;  %v1771_v60 = vld [vmem:[%s1868_s28 + $0x1a0] ss:$8 sps:$4 sm:$0xff]   ;;  %v1774_v62 = vld [vmem:[%s1868_s28 + $0x1b4] ss:$8 sps:$4 sm:$0xff]   ;;  %v1777_v0 = vld [vmem:[%s1868_s28 + $0x1b0] ss:$8 sps:$4 sm:$0xff]  }
  0x20   : > { %711 = vmatprep.subr.bf16.mxu0 %v1810_v1  ;;  %1656 = vmatprep.subr.bf16.mxu1 %v1810_v1  ;;  %v1780_v2 = vld [vmem:[%s1868_s28 + $0x1c4] ss:$8 sps:$4 sm:$0xff]   ;;  %v1782_v3 = vld [vmem:[%s1868_s28 + $0xc0] ss:$8 sps:$4 sm:$0xff]   ;;  %v1784_v5 = vld [vmem:[%s1868_s28 + $0xd4] ss:$8 sps:$4 sm:$0xff]  }
  0x21   : > { %v1783_v4 = vld [vmem:[%s1868_s28 + $0x1c0] ss:$8 sps:$4 sm:$0xff]   ;;  %v1786_v6 = vld [vmem:[%s1868_s28 + $0x1d4] ss:$8 sps:$4 sm:$0xff]   ;;  %v1788_v7 = vld [vmem:[%s1868_s28 + $0xd0] ss:$8 sps:$4 sm:$0xff]  }
  0x22   : > { %v1789_v8 = vld [vmem:[%s1868_s28 + $0x1d0] ss:$8 sps:$4 sm:$0xff]   ;;  %v1790_v9 = vld [vmem:[%s1868_s28 + $0xe4] ss:$8 sps:$4 sm:$0xff]  }
  0x23   : > { %712 = vmatpush1.bf16.msra.mxu0 %v1697_v10  ;;  %1672 = vmatpush1.bf16.msra.mxu1 %v1697_v10  ;;  %v1792_v10 = vld [vmem:[%s1868_s28 + $0x1e4] ss:$8 sps:$4 sm:$0xff]  }
  0x24   : > { %713 = vmatprep.subr.bf16.mxu0 %v1810_v1  ;;  %1657 = vmatprep.subr.bf16.mxu1 %v1810_v1 }
  0x27   : > { %714 = vmatpush1.bf16.msra.mxu0 %v1698_v11  ;;  %1673 = vmatpush1.bf16.msra.mxu1 %v1698_v11  ;;  %v1794_v11 = vld [vmem:[%s1868_s28 + $0xe0] ss:$8 sps:$4 sm:$0xff]  }
  0x28   : > { %715 = vmatprep.subr.bf16.mxu0 %v1810_v1  ;;  %1658 = vmatprep.subr.bf16.mxu1 %v1810_v1 }
  0x2b   : > { %716 = vmatpush1.bf16.msra.mxu0 %v1699_v12  ;;  %1674 = vmatpush1.bf16.msra.mxu1 %v1699_v12  ;;  %v1795_v12 = vld [vmem:[%s1868_s28 + $0x1e0] ss:$8 sps:$4 sm:$0xff]  }
  0x2c   : > { %717 = vmatprep.subr.bf16.mxu0 %v1810_v1  ;;  %1659 = vmatprep.subr.bf16.mxu1 %v1810_v1 }
  0x2f   : > { %718 = vmatpush1.bf16.msra.mxu0 %v1700_v13  ;;  %1675 = vmatpush1.bf16.msra.mxu1 %v1700_v13  ;;  %v1796_v13 = vld [vmem:[%s1868_s28 + $0xf4] ss:$8 sps:$4 sm:$0xff]  }
  0x30   : > { %719 = vmatprep.subr.bf16.mxu0 %v1810_v1  ;;  %1660 = vmatprep.subr.bf16.mxu1 %v1810_v1 }
  0x33   : > { %720 = vmatpush1.bf16.msra.mxu0 %v1701_v14  ;;  %1676 = vmatpush1.bf16.msra.mxu1 %v1701_v14  ;;  %v1798_v14 = vld [vmem:[%s1868_s28 + $0x1f4] ss:$8 sps:$4 sm:$0xff]  }
  0x34   : > { %721 = vmatprep.subr.bf16.mxu0 %v1810_v1  ;;  %1661 = vmatprep.subr.bf16.mxu1 %v1810_v1 }
  0x37   : > { %722 = vmatpush1.bf16.msra.mxu0 %v1702_v15  ;;  %1677 = vmatpush1.bf16.msra.mxu1 %v1702_v15  ;;  %v1800_v15 = vld [vmem:[%s1868_s28 + $0xf0] ss:$8 sps:$4 sm:$0xff]  }
  0x38   : > { %723 = vmatprep.subr.bf16.mxu0 %v1810_v1  ;;  %1662 = vmatprep.subr.bf16.mxu1 %v1810_v1 }
  0x3b   : > { %724 = vmatpush1.bf16.msra.mxu0 %v1703_v16  ;;  %1678 = vmatpush1.bf16.msra.mxu1 %v1703_v16  ;;  %v1801_v16 = vld [vmem:[%s1868_s28 + $0x1f0] ss:$8 sps:$4 sm:$0xff]  }
  0x3c   : > { %725 = vmatprep.subr.bf16.mxu0 %v1810_v1  ;;  %1663 = vmatprep.subr.bf16.mxu1 %v1810_v1 }
  0x3f   : > { %726 = vmatpush1.bf16.msra.mxu0 %v1704_v17  ;;  %1679 = vmatpush1.bf16.msra.mxu1 %v1704_v17  ;;  %v1994_v17 = vld [vmem:[%s2199_s2] ss:$0 sm:$0xff] }
  0x40   : > { %727 = vmatprep.subr.bf16.mxu0 %v1810_v1  ;;  %1664 = vmatprep.subr.bf16.mxu1 %v1810_v1  ;;  %v1778_v1 = vld [vmem:[%s1868_s28 + $0xc4] ss:$8 sps:$4 sm:$0xff]  }
  0x43   : > { %728 = vmatpush1.bf16.msra.mxu0 %v1705_v18  ;;  %1680 = vmatpush1.bf16.msra.mxu1 %v1705_v18 }
  0x46   : > { %730 = vmatmul.mubr.bf16.vlgmr.msra.gmra.mrb[0].mxu0 %v1706_v19  ;;  %858 = vmatmul.mubr.bf16.vlgmr.msra.gmra.mrb[0].mxu1 %v1709_v20 }
  0x47   : > { %737 = vmatprep.mubr.bf16.mxu0 %v1712_v21  ;;  %865 = vmatprep.mubr.bf16.mxu1 %v1714_v22 }
  0x4e   : > { %738 = vmatmul.mubr.bf16.gmra.mrb[4].mxu0 %v1716_v23  ;;  %866 = vmatmul.mubr.bf16.gmra.mrb[4].mxu1 %v1717_v24 }
  0x4f   : > { %745 = vmatprep.mubr.bf16.mxu0 %v1718_v25  ;;  %873 = vmatprep.mubr.bf16.mxu1 %v1720_v26 }
  0x56   : > { %746 = vmatmul.mubr.bf16.gmra.mrb[8].mxu0 %v1722_v27  ;;  %874 = vmatmul.mubr.bf16.gmra.mrb[8].mxu1 %v1723_v28 }
  0x57   : > { %753 = vmatprep.mubr.bf16.mxu0 %v1724_v29  ;;  %881 = vmatprep.mubr.bf16.mxu1 %v1726_v30 }
  0x5e   : > { %754 = vmatmul.mubr.bf16.gmra.mrb[12].mxu0 %v1728_v31  ;;  %882 = vmatmul.mubr.bf16.gmra.mrb[12].mxu1 %v1729_v32 }
  0x5f   : > { %761 = vmatprep.mubr.bf16.mxu0 %v1730_v33  ;;  %889 = vmatprep.mubr.bf16.mxu1 %v1732_v34 }
  0x66   : > { %762 = vmatmul.mubr.bf16.gmra.mrb[16].mxu0 %v1734_v35  ;;  %890 = vmatmul.mubr.bf16.gmra.mrb[16].mxu1 %v1735_v36 }
  0x67   : > { %769 = vmatprep.mubr.bf16.mxu0 %v1736_v37  ;;  %897 = vmatprep.mubr.bf16.mxu1 %v1738_v38 }
  0x6e   : > { %770 = vmatmul.mubr.bf16.gmra.mrb[20].mxu0 %v1740_v39  ;;  %898 = vmatmul.mubr.bf16.gmra.mrb[20].mxu1 %v1741_v40 }
  0x6f   : > { %777 = vmatprep.mubr.bf16.mxu0 %v1742_v41  ;;  %905 = vmatprep.mubr.bf16.mxu1 %v1744_v42 }
  0x76   : > { %778 = vmatmul.mubr.bf16.gmra.mrb[24].mxu0 %v1746_v43  ;;  %906 = vmatmul.mubr.bf16.gmra.mrb[24].mxu1 %v1747_v44 }
  0x77   : > { %785 = vmatprep.mubr.bf16.mxu0 %v1748_v45  ;;  %913 = vmatprep.mubr.bf16.mxu1 %v1750_v46 }
  0x7e   : > { %786 = vmatmul.mubr.bf16.gmra.mrb[28].mxu0 %v1752_v47  ;;  %914 = vmatmul.mubr.bf16.gmra.mrb[28].mxu1 %v1753_v48 }
  0x7f   : > { %793 = vmatprep.mubr.bf16.mxu0 %v1754_v49  ;;  %921 = vmatprep.mubr.bf16.mxu1 %v1756_v50 }
  0x86   : > { %794 = vmatmul.mubr.bf16.gmra.mrb[32].mxu0 %v1758_v51  ;;  %922 = vmatmul.mubr.bf16.gmra.mrb[32].mxu1 %v1759_v52 }
  0x87   : > { %801 = vmatprep.mubr.bf16.mxu0 %v1760_v53  ;;  %929 = vmatprep.mubr.bf16.mxu1 %v1762_v54 }
  0x8e   : > { %802 = vmatmul.mubr.bf16.gmra.mrb[36].mxu0 %v1764_v55  ;;  %930 = vmatmul.mubr.bf16.gmra.mrb[36].mxu1 %v1765_v56 }
  0x8f   : > { %809 = vmatprep.mubr.bf16.mxu0 %v1766_v57  ;;  %937 = vmatprep.mubr.bf16.mxu1 %v1768_v58 }
  0x96   : > { %810 = vmatmul.mubr.bf16.gmra.mrb[40].mxu0 %v1770_v59  ;;  %938 = vmatmul.mubr.bf16.gmra.mrb[40].mxu1 %v1771_v60 }
  0x97   : > { %817 = vmatprep.mubr.bf16.mxu0 %v1772_v61  ;;  %945 = vmatprep.mubr.bf16.mxu1 %v1774_v62 }
  0x9e   : > { %818 = vmatmul.mubr.bf16.gmra.mrb[44].mxu0 %v1776_v63  ;;  %946 = vmatmul.mubr.bf16.gmra.mrb[44].mxu1 %v1777_v0 }
  0x9f   : > { %825 = vmatprep.mubr.bf16.mxu0 %v1778_v1  ;;  %953 = vmatprep.mubr.bf16.mxu1 %v1780_v2 }
  0xa6   : > { %826 = vmatmul.mubr.bf16.gmra.mrb[48].mxu0 %v1782_v3  ;;  %954 = vmatmul.mubr.bf16.gmra.mrb[48].mxu1 %v1783_v4 }
  0xa7   : > { %833 = vmatprep.mubr.bf16.mxu0 %v1784_v5  ;;  %961 = vmatprep.mubr.bf16.mxu1 %v1786_v6 }
  0xae   : > { %834 = vmatmul.mubr.bf16.gmra.mrb[52].mxu0 %v1788_v7  ;;  %962 = vmatmul.mubr.bf16.gmra.mrb[52].mxu1 %v1789_v8 }
  0xaf   : > { %841 = vmatprep.mubr.bf16.mxu0 %v1790_v9  ;;  %969 = vmatprep.mubr.bf16.mxu1 %v1792_v10 }
  0xb6   : > { %842 = vmatmul.mubr.bf16.gmra.mrb[56].mxu0 %v1794_v11  ;;  %970 = vmatmul.mubr.bf16.gmra.mrb[56].mxu1 %v1795_v12 }
  0xb7   : > { %849 = vmatprep.mubr.bf16.mxu0 %v1796_v13  ;;  %977 = vmatprep.mubr.bf16.mxu1 %v1798_v14 }
  0xbe   : > { %850 = vmatmul.mubr.bf16.gmra.mrb[60].mxu0 %v1800_v15  ;;  %978 = vmatmul.mubr.bf16.gmra.mrb[60].mxu1 %v1801_v16 }
 0x119   : > { %v731_v18 = vpop.f32.mrb[0].mxu0  ;;  %v859_v19 = vpop.f32.mrb[0].mxu1 }
 0x11a   : > { %v732_v20 = vadd.f32 %v1994_v17, %v731_v18  ;;  %v860_v21 = vadd.f32 %v1994_v17, %v859_v19  ;;  %v733_v22 = vpop.f32.mrb[1].mxu0  ;;  %v861_v23 = vpop.f32.mrb[1].mxu1 }
 0x11b   : > { %v734_v24 = vpop.f32.mrb[2].mxu0  ;;  %v862_v25 = vpop.f32.mrb[2].mxu1 }
 0x11c   : > { %v986_v26 = vmax.f32 %v732_v20, 0.0  ;;  %v1018_v27 = vmax.f32 %v860_v21, 0.0  ;;  %v735_v28 = vadd.f32 %v1994_v17, %v734_v24  ;;  %v863_v29 = vadd.f32 %v1994_v17, %v862_v25  ;;  %v736_v30 = vpop.f32.mrb[3].mxu0  ;;  %v864_v31 = vpop.f32.mrb[3].mxu1 }
 0x11e   : > { %v1585_v32 = vpack.c.bf16 %v986_v26, %v986_v26  ;;  %v1617_v33 = vpack.c.bf16 %v1018_v27, %v1018_v27  ;;  %v987_v34 = vmax.f32 %v735_v28, 0.0  ;;  %v1019_v35 = vmax.f32 %v863_v29, 0.0 }
 0x120   : > { %1307 = vst.msk [vmem:[%s2004_s16] sm:$0xf] %vm1306_vm0, %v1585_v32  ;;  %1339 = vst.msk [vmem:[%s2004_s16 + $0x80] sm:$0xf] %vm1306_vm0, %v1617_v33  ;;  %v1586_v36 = vpack.c.bf16 %v987_v34, %v987_v34  ;;  %v1618_v37 = vpack.c.bf16 %v1019_v35, %v1019_v35 }
 0x121   : > { %v739_v38 = vpop.f32.mrb[4].mxu0  ;;  %v867_v39 = vpop.f32.mrb[4].mxu1 }
 0x122   : > { %1308 = vst.msk [vmem:[%s2004_s16 + $0x4] sm:$0xf] %vm1306_vm0, %v1586_v36  ;;  %1340 = vst.msk [vmem:[%s2004_s16 + $0x84] sm:$0xf] %vm1306_vm0, %v1618_v37  ;;  %v740_v40 = vadd.f32 %v1994_v17, %v739_v38  ;;  %v868_v41 = vadd.f32 %v1994_v17, %v867_v39  ;;  %v741_v42 = vpop.f32.mrb[5].mxu0  ;;  %v869_v43 = vpop.f32.mrb[5].mxu1 }
 0x123   : > { %v742_v44 = vpop.f32.mrb[6].mxu0  ;;  %v870_v45 = vpop.f32.mrb[6].mxu1 }
 0x124   : > { %v988_v46 = vmax.f32 %v740_v40, 0.0  ;;  %v1020_v47 = vmax.f32 %v868_v41, 0.0  ;;  %v743_v48 = vadd.f32 %v1994_v17, %v742_v44  ;;  %v871_v49 = vadd.f32 %v1994_v17, %v870_v45  ;;  %v744_v50 = vpop.f32.mrb[7].mxu0  ;;  %v872_v51 = vpop.f32.mrb[7].mxu1 }
 0x126   : > { %v1587_v52 = vpack.c.bf16 %v988_v46, %v988_v46  ;;  %v1619_v53 = vpack.c.bf16 %v1020_v47, %v1020_v47  ;;  %v989_v54 = vmax.f32 %v743_v48, 0.0  ;;  %v1021_v55 = vmax.f32 %v871_v49, 0.0 }
 0x128   : > { %1309 = vst.msk [vmem:[%s2004_s16 + $0x8] sm:$0xf] %vm1306_vm0, %v1587_v52  ;;  %1341 = vst.msk [vmem:[%s2004_s16 + $0x88] sm:$0xf] %vm1306_vm0, %v1619_v53  ;;  %v1588_v56 = vpack.c.bf16 %v989_v54, %v989_v54  ;;  %v1620_v57 = vpack.c.bf16 %v1021_v55, %v1021_v55 }
 0x129   : > { %v747_v58 = vpop.f32.mrb[8].mxu0  ;;  %v875_v59 = vpop.f32.mrb[8].mxu1 }
 0x12a   : > { %1310 = vst.msk [vmem:[%s2004_s16 + $0xc] sm:$0xf] %vm1306_vm0, %v1588_v56  ;;  %1342 = vst.msk [vmem:[%s2004_s16 + $0x8c] sm:$0xf] %vm1306_vm0, %v1620_v57  ;;  %v748_v60 = vadd.f32 %v1994_v17, %v747_v58  ;;  %v876_v61 = vadd.f32 %v1994_v17, %v875_v59  ;;  %v749_v62 = vpop.f32.mrb[9].mxu0  ;;  %v877_v63 = vpop.f32.mrb[9].mxu1 }
 0x12b   : > { %v750_v0 = vpop.f32.mrb[10].mxu0  ;;  %v878_v1 = vpop.f32.mrb[10].mxu1 }
 0x12c   : > { %v990_v2 = vmax.f32 %v748_v60, 0.0  ;;  %v1022_v3 = vmax.f32 %v876_v61, 0.0  ;;  %v751_v4 = vadd.f32 %v1994_v17, %v750_v0  ;;  %v879_v5 = vadd.f32 %v1994_v17, %v878_v1  ;;  %v752_v6 = vpop.f32.mrb[11].mxu0  ;;  %v880_v7 = vpop.f32.mrb[11].mxu1 }
 0x12e   : > { %v1589_v8 = vpack.c.bf16 %v990_v2, %v990_v2  ;;  %v1621_v9 = vpack.c.bf16 %v1022_v3, %v1022_v3  ;;  %v991_v10 = vmax.f32 %v751_v4, 0.0  ;;  %v1023_v11 = vmax.f32 %v879_v5, 0.0 }
 0x130   : > { %1311 = vst.msk [vmem:[%s2004_s16 + $0x10] sm:$0xf] %vm1306_vm0, %v1589_v8  ;;  %1343 = vst.msk [vmem:[%s2004_s16 + $0x90] sm:$0xf] %vm1306_vm0, %v1621_v9  ;;  %v1590_v12 = vpack.c.bf16 %v991_v10, %v991_v10  ;;  %v1622_v13 = vpack.c.bf16 %v1023_v11, %v1023_v11 }
 0x131   : > { %v755_v14 = vpop.f32.mrb[12].mxu0  ;;  %v883_v15 = vpop.f32.mrb[12].mxu1 }
 0x132   : > { %1312 = vst.msk [vmem:[%s2004_s16 + $0x14] sm:$0xf] %vm1306_vm0, %v1590_v12  ;;  %1344 = vst.msk [vmem:[%s2004_s16 + $0x94] sm:$0xf] %vm1306_vm0, %v1622_v13  ;;  %v756_v16 = vadd.f32 %v1994_v17, %v755_v14  ;;  %v884_v18 = vadd.f32 %v1994_v17, %v883_v15  ;;  %v757_v19 = vpop.f32.mrb[13].mxu0  ;;  %v885_v20 = vpop.f32.mrb[13].mxu1 }
 0x133   : > { %v758_v21 = vpop.f32.mrb[14].mxu0  ;;  %v886_v22 = vpop.f32.mrb[14].mxu1 }
 0x134   : > { %v992_v23 = vmax.f32 %v756_v16, 0.0  ;;  %v1024_v24 = vmax.f32 %v884_v18, 0.0  ;;  %v759_v25 = vadd.f32 %v1994_v17, %v758_v21  ;;  %v887_v26 = vadd.f32 %v1994_v17, %v886_v22  ;;  %v760_v27 = vpop.f32.mrb[15].mxu0  ;;  %v888_v28 = vpop.f32.mrb[15].mxu1 }
 0x136   : > { %v1591_v29 = vpack.c.bf16 %v992_v23, %v992_v23  ;;  %v1623_v30 = vpack.c.bf16 %v1024_v24, %v1024_v24  ;;  %v993_v31 = vmax.f32 %v759_v25, 0.0  ;;  %v1025_v32 = vmax.f32 %v887_v26, 0.0 }
 0x138   : > { %1313 = vst.msk [vmem:[%s2004_s16 + $0x18] sm:$0xf] %vm1306_vm0, %v1591_v29  ;;  %1345 = vst.msk [vmem:[%s2004_s16 + $0x98] sm:$0xf] %vm1306_vm0, %v1623_v30  ;;  %v1592_v33 = vpack.c.bf16 %v993_v31, %v993_v31  ;;  %v1624_v34 = vpack.c.bf16 %v1025_v32, %v1025_v32 }
 0x139   : > { %v763_v35 = vpop.f32.mrb[16].mxu0  ;;  %v891_v36 = vpop.f32.mrb[16].mxu1 }
 0x13a   : > { %1314 = vst.msk [vmem:[%s2004_s16 + $0x1c] sm:$0xf] %vm1306_vm0, %v1592_v33  ;;  %1346 = vst.msk [vmem:[%s2004_s16 + $0x9c] sm:$0xf] %vm1306_vm0, %v1624_v34  ;;  %v764_v37 = vadd.f32 %v1994_v17, %v763_v35  ;;  %v892_v38 = vadd.f32 %v1994_v17, %v891_v36  ;;  %v765_v39 = vpop.f32.mrb[17].mxu0  ;;  %v893_v40 = vpop.f32.mrb[17].mxu1 }
 0x13b   : > { %v766_v41 = vpop.f32.mrb[18].mxu0  ;;  %v894_v42 = vpop.f32.mrb[18].mxu1 }
 0x13c   : > { %v994_v43 = vmax.f32 %v764_v37, 0.0  ;;  %v1026_v44 = vmax.f32 %v892_v38, 0.0  ;;  %v767_v45 = vadd.f32 %v1994_v17, %v766_v41  ;;  %v895_v46 = vadd.f32 %v1994_v17, %v894_v42  ;;  %v768_v47 = vpop.f32.mrb[19].mxu0  ;;  %v896_v48 = vpop.f32.mrb[19].mxu1 }
 0x13e   : > { %v1593_v49 = vpack.c.bf16 %v994_v43, %v994_v43  ;;  %v1625_v50 = vpack.c.bf16 %v1026_v44, %v1026_v44  ;;  %v995_v51 = vmax.f32 %v767_v45, 0.0  ;;  %v1027_v52 = vmax.f32 %v895_v46, 0.0 }
 0x140   : > { %1315 = vst.msk [vmem:[%s2004_s16 + $0x20] sm:$0xf] %vm1306_vm0, %v1593_v49  ;;  %1347 = vst.msk [vmem:[%s2004_s16 + $0xa0] sm:$0xf] %vm1306_vm0, %v1625_v50  ;;  %v1594_v53 = vpack.c.bf16 %v995_v51, %v995_v51  ;;  %v1626_v54 = vpack.c.bf16 %v1027_v52, %v1027_v52 }
 0x141   : > { %v771_v55 = vpop.f32.mrb[20].mxu0  ;;  %v899_v56 = vpop.f32.mrb[20].mxu1 }
 0x142   : > { %1316 = vst.msk [vmem:[%s2004_s16 + $0x24] sm:$0xf] %vm1306_vm0, %v1594_v53  ;;  %1348 = vst.msk [vmem:[%s2004_s16 + $0xa4] sm:$0xf] %vm1306_vm0, %v1626_v54  ;;  %v772_v57 = vadd.f32 %v1994_v17, %v771_v55  ;;  %v900_v58 = vadd.f32 %v1994_v17, %v899_v56  ;;  %v773_v59 = vpop.f32.mrb[21].mxu0  ;;  %v901_v60 = vpop.f32.mrb[21].mxu1 }
 0x143   : > { %v774_v61 = vpop.f32.mrb[22].mxu0  ;;  %v902_v62 = vpop.f32.mrb[22].mxu1 }
 0x144   : > { %v996_v63 = vmax.f32 %v772_v57, 0.0  ;;  %v1028_v0 = vmax.f32 %v900_v58, 0.0  ;;  %v775_v1 = vadd.f32 %v1994_v17, %v774_v61  ;;  %v903_v2 = vadd.f32 %v1994_v17, %v902_v62  ;;  %v776_v3 = vpop.f32.mrb[23].mxu0  ;;  %v904_v4 = vpop.f32.mrb[23].mxu1 }
 0x146   : > { %v1595_v5 = vpack.c.bf16 %v996_v63, %v996_v63  ;;  %v1627_v6 = vpack.c.bf16 %v1028_v0, %v1028_v0  ;;  %v997_v7 = vmax.f32 %v775_v1, 0.0  ;;  %v1029_v8 = vmax.f32 %v903_v2, 0.0 }
 0x148   : > { %1317 = vst.msk [vmem:[%s2004_s16 + $0x28] sm:$0xf] %vm1306_vm0, %v1595_v5  ;;  %1349 = vst.msk [vmem:[%s2004_s16 + $0xa8] sm:$0xf] %vm1306_vm0, %v1627_v6  ;;  %v1596_v9 = vpack.c.bf16 %v997_v7, %v997_v7  ;;  %v1628_v10 = vpack.c.bf16 %v1029_v8, %v1029_v8 }
 0x149   : > { %v779_v11 = vpop.f32.mrb[24].mxu0  ;;  %v907_v12 = vpop.f32.mrb[24].mxu1 }
 0x14a   : > { %1318 = vst.msk [vmem:[%s2004_s16 + $0x2c] sm:$0xf] %vm1306_vm0, %v1596_v9  ;;  %1350 = vst.msk [vmem:[%s2004_s16 + $0xac] sm:$0xf] %vm1306_vm0, %v1628_v10  ;;  %v780_v13 = vadd.f32 %v1994_v17, %v779_v11  ;;  %v908_v14 = vadd.f32 %v1994_v17, %v907_v12  ;;  %v781_v15 = vpop.f32.mrb[25].mxu0  ;;  %v909_v16 = vpop.f32.mrb[25].mxu1 }
 0x14b   : > { %v782_v18 = vpop.f32.mrb[26].mxu0  ;;  %v910_v19 = vpop.f32.mrb[26].mxu1 }
 0x14c   : > { %v998_v20 = vmax.f32 %v780_v13, 0.0  ;;  %v1030_v21 = vmax.f32 %v908_v14, 0.0  ;;  %v783_v22 = vadd.f32 %v1994_v17, %v782_v18  ;;  %v911_v23 = vadd.f32 %v1994_v17, %v910_v19  ;;  %v784_v24 = vpop.f32.mrb[27].mxu0  ;;  %v912_v25 = vpop.f32.mrb[27].mxu1 }
 0x14e   : > { %v1597_v26 = vpack.c.bf16 %v998_v20, %v998_v20  ;;  %v1629_v27 = vpack.c.bf16 %v1030_v21, %v1030_v21  ;;  %v999_v28 = vmax.f32 %v783_v22, 0.0  ;;  %v1031_v29 = vmax.f32 %v911_v23, 0.0 }
 0x150   : > { %1319 = vst.msk [vmem:[%s2004_s16 + $0x30] sm:$0xf] %vm1306_vm0, %v1597_v26  ;;  %1351 = vst.msk [vmem:[%s2004_s16 + $0xb0] sm:$0xf] %vm1306_vm0, %v1629_v27  ;;  %v1598_v30 = vpack.c.bf16 %v999_v28, %v999_v28  ;;  %v1630_v31 = vpack.c.bf16 %v1031_v29, %v1031_v29 }
 0x151   : > { %v787_v32 = vpop.f32.mrb[28].mxu0  ;;  %v915_v33 = vpop.f32.mrb[28].mxu1 }
 0x152   : > { %1320 = vst.msk [vmem:[%s2004_s16 + $0x34] sm:$0xf] %vm1306_vm0, %v1598_v30  ;;  %1352 = vst.msk [vmem:[%s2004_s16 + $0xb4] sm:$0xf] %vm1306_vm0, %v1630_v31  ;;  %v788_v34 = vadd.f32 %v1994_v17, %v787_v32  ;;  %v916_v35 = vadd.f32 %v1994_v17, %v915_v33  ;;  %v789_v36 = vpop.f32.mrb[29].mxu0  ;;  %v917_v37 = vpop.f32.mrb[29].mxu1 }
 0x153   : > { %v790_v38 = vpop.f32.mrb[30].mxu0  ;;  %v918_v39 = vpop.f32.mrb[30].mxu1 }
 0x154   : > { %v1000_v40 = vmax.f32 %v788_v34, 0.0  ;;  %v1032_v41 = vmax.f32 %v916_v35, 0.0  ;;  %v791_v42 = vadd.f32 %v1994_v17, %v790_v38  ;;  %v919_v43 = vadd.f32 %v1994_v17, %v918_v39  ;;  %v792_v44 = vpop.f32.mrb[31].mxu0  ;;  %v920_v45 = vpop.f32.mrb[31].mxu1 }
 0x156   : > { %v1599_v46 = vpack.c.bf16 %v1000_v40, %v1000_v40  ;;  %v1631_v47 = vpack.c.bf16 %v1032_v41, %v1032_v41  ;;  %v1001_v48 = vmax.f32 %v791_v42, 0.0  ;;  %v1033_v49 = vmax.f32 %v919_v43, 0.0 }
 0x158   : > { %1321 = vst.msk [vmem:[%s2004_s16 + $0x38] sm:$0xf] %vm1306_vm0, %v1599_v46  ;;  %1353 = vst.msk [vmem:[%s2004_s16 + $0xb8] sm:$0xf] %vm1306_vm0, %v1631_v47  ;;  %v1600_v50 = vpack.c.bf16 %v1001_v48, %v1001_v48  ;;  %v1632_v51 = vpack.c.bf16 %v1033_v49, %v1033_v49 }
 0x159   : > { %v795_v52 = vpop.f32.mrb[32].mxu0  ;;  %v923_v53 = vpop.f32.mrb[32].mxu1 }
 0x15a   : > { %1322 = vst.msk [vmem:[%s2004_s16 + $0x3c] sm:$0xf] %vm1306_vm0, %v1600_v50  ;;  %1354 = vst.msk [vmem:[%s2004_s16 + $0xbc] sm:$0xf] %vm1306_vm0, %v1632_v51  ;;  %v796_v54 = vadd.f32 %v1994_v17, %v795_v52  ;;  %v924_v55 = vadd.f32 %v1994_v17, %v923_v53  ;;  %v797_v56 = vpop.f32.mrb[33].mxu0  ;;  %v925_v57 = vpop.f32.mrb[33].mxu1 }
 0x15b   : > { %v798_v58 = vpop.f32.mrb[34].mxu0  ;;  %v926_v59 = vpop.f32.mrb[34].mxu1 }
 0x15c   : > { %v1002_v60 = vmax.f32 %v796_v54, 0.0  ;;  %v1034_v61 = vmax.f32 %v924_v55, 0.0  ;;  %v799_v62 = vadd.f32 %v1994_v17, %v798_v58  ;;  %v927_v63 = vadd.f32 %v1994_v17, %v926_v59  ;;  %v800_v0 = vpop.f32.mrb[35].mxu0  ;;  %v928_v1 = vpop.f32.mrb[35].mxu1 }
 0x15e   : > { %v1601_v2 = vpack.c.bf16 %v1002_v60, %v1002_v60  ;;  %v1633_v3 = vpack.c.bf16 %v1034_v61, %v1034_v61  ;;  %v1003_v4 = vmax.f32 %v799_v62, 0.0  ;;  %v1035_v5 = vmax.f32 %v927_v63, 0.0 }
 0x160   : > { %1323 = vst.msk [vmem:[%s2004_s16 + $0x40] sm:$0xf] %vm1306_vm0, %v1601_v2  ;;  %1355 = vst.msk [vmem:[%s2004_s16 + $0xc0] sm:$0xf] %vm1306_vm0, %v1633_v3  ;;  %v1602_v6 = vpack.c.bf16 %v1003_v4, %v1003_v4  ;;  %v1634_v7 = vpack.c.bf16 %v1035_v5, %v1035_v5 }
 0x161   : > { %v803_v8 = vpop.f32.mrb[36].mxu0  ;;  %v931_v9 = vpop.f32.mrb[36].mxu1 }
 0x162   : > { %1324 = vst.msk [vmem:[%s2004_s16 + $0x44] sm:$0xf] %vm1306_vm0, %v1602_v6  ;;  %1356 = vst.msk [vmem:[%s2004_s16 + $0xc4] sm:$0xf] %vm1306_vm0, %v1634_v7  ;;  %v804_v10 = vadd.f32 %v1994_v17, %v803_v8  ;;  %v932_v11 = vadd.f32 %v1994_v17, %v931_v9  ;;  %v805_v12 = vpop.f32.mrb[37].mxu0  ;;  %v933_v13 = vpop.f32.mrb[37].mxu1 }
 0x163   : > { %v806_v14 = vpop.f32.mrb[38].mxu0  ;;  %v934_v15 = vpop.f32.mrb[38].mxu1 }
 0x164   : > { %v1004_v16 = vmax.f32 %v804_v10, 0.0  ;;  %v1036_v18 = vmax.f32 %v932_v11, 0.0  ;;  %v807_v19 = vadd.f32 %v1994_v17, %v806_v14  ;;  %v935_v20 = vadd.f32 %v1994_v17, %v934_v15  ;;  %v808_v21 = vpop.f32.mrb[39].mxu0  ;;  %v936_v22 = vpop.f32.mrb[39].mxu1 }
 0x166   : > { %v1603_v23 = vpack.c.bf16 %v1004_v16, %v1004_v16  ;;  %v1635_v24 = vpack.c.bf16 %v1036_v18, %v1036_v18  ;;  %v1005_v25 = vmax.f32 %v807_v19, 0.0  ;;  %v1037_v26 = vmax.f32 %v935_v20, 0.0 }
 0x168   : > { %1325 = vst.msk [vmem:[%s2004_s16 + $0x48] sm:$0xf] %vm1306_vm0, %v1603_v23  ;;  %1357 = vst.msk [vmem:[%s2004_s16 + $0xc8] sm:$0xf] %vm1306_vm0, %v1635_v24  ;;  %v1604_v27 = vpack.c.bf16 %v1005_v25, %v1005_v25  ;;  %v1636_v28 = vpack.c.bf16 %v1037_v26, %v1037_v26 }
 0x169   : > { %v811_v29 = vpop.f32.mrb[40].mxu0  ;;  %v939_v30 = vpop.f32.mrb[40].mxu1 }
 0x16a   : > { %1326 = vst.msk [vmem:[%s2004_s16 + $0x4c] sm:$0xf] %vm1306_vm0, %v1604_v27  ;;  %1358 = vst.msk [vmem:[%s2004_s16 + $0xcc] sm:$0xf] %vm1306_vm0, %v1636_v28  ;;  %v812_v31 = vadd.f32 %v1994_v17, %v811_v29  ;;  %v940_v32 = vadd.f32 %v1994_v17, %v939_v30  ;;  %v813_v33 = vpop.f32.mrb[41].mxu0  ;;  %v941_v34 = vpop.f32.mrb[41].mxu1 }
 0x16b   : > { %v814_v35 = vpop.f32.mrb[42].mxu0  ;;  %v942_v36 = vpop.f32.mrb[42].mxu1 }
 0x16c   : > { %v1006_v37 = vmax.f32 %v812_v31, 0.0  ;;  %v1038_v38 = vmax.f32 %v940_v32, 0.0  ;;  %v815_v39 = vadd.f32 %v1994_v17, %v814_v35  ;;  %v943_v40 = vadd.f32 %v1994_v17, %v942_v36  ;;  %v816_v41 = vpop.f32.mrb[43].mxu0  ;;  %v944_v42 = vpop.f32.mrb[43].mxu1 }
 0x16e   : > { %v1605_v43 = vpack.c.bf16 %v1006_v37, %v1006_v37  ;;  %v1637_v44 = vpack.c.bf16 %v1038_v38, %v1038_v38  ;;  %v1007_v45 = vmax.f32 %v815_v39, 0.0  ;;  %v1039_v46 = vmax.f32 %v943_v40, 0.0 }
 0x170   : > { %1327 = vst.msk [vmem:[%s2004_s16 + $0x50] sm:$0xf] %vm1306_vm0, %v1605_v43  ;;  %1359 = vst.msk [vmem:[%s2004_s16 + $0xd0] sm:$0xf] %vm1306_vm0, %v1637_v44  ;;  %v1606_v47 = vpack.c.bf16 %v1007_v45, %v1007_v45  ;;  %v1638_v48 = vpack.c.bf16 %v1039_v46, %v1039_v46 }
 0x171   : > { %v819_v49 = vpop.f32.mrb[44].mxu0  ;;  %v947_v50 = vpop.f32.mrb[44].mxu1 }
 0x172   : > { %1328 = vst.msk [vmem:[%s2004_s16 + $0x54] sm:$0xf] %vm1306_vm0, %v1606_v47  ;;  %1360 = vst.msk [vmem:[%s2004_s16 + $0xd4] sm:$0xf] %vm1306_vm0, %v1638_v48  ;;  %v820_v51 = vadd.f32 %v1994_v17, %v819_v49  ;;  %v948_v52 = vadd.f32 %v1994_v17, %v947_v50  ;;  %v821_v53 = vpop.f32.mrb[45].mxu0  ;;  %v949_v54 = vpop.f32.mrb[45].mxu1 }
 0x173   : > { %v822_v55 = vpop.f32.mrb[46].mxu0  ;;  %v950_v56 = vpop.f32.mrb[46].mxu1 }
 0x174   : > { %v1008_v57 = vmax.f32 %v820_v51, 0.0  ;;  %v1040_v58 = vmax.f32 %v948_v52, 0.0  ;;  %v823_v59 = vadd.f32 %v1994_v17, %v822_v55  ;;  %v951_v60 = vadd.f32 %v1994_v17, %v950_v56  ;;  %v824_v61 = vpop.f32.mrb[47].mxu0  ;;  %v952_v62 = vpop.f32.mrb[47].mxu1 }
 0x176   : > { %v1607_v63 = vpack.c.bf16 %v1008_v57, %v1008_v57  ;;  %v1639_v0 = vpack.c.bf16 %v1040_v58, %v1040_v58  ;;  %v1009_v1 = vmax.f32 %v823_v59, 0.0  ;;  %v1041_v2 = vmax.f32 %v951_v60, 0.0 }
 0x178   : > { %1329 = vst.msk [vmem:[%s2004_s16 + $0x58] sm:$0xf] %vm1306_vm0, %v1607_v63  ;;  %1361 = vst.msk [vmem:[%s2004_s16 + $0xd8] sm:$0xf] %vm1306_vm0, %v1639_v0  ;;  %v1608_v3 = vpack.c.bf16 %v1009_v1, %v1009_v1  ;;  %v1640_v4 = vpack.c.bf16 %v1041_v2, %v1041_v2 }
 0x179   : > { %v827_v5 = vpop.f32.mrb[48].mxu0  ;;  %v955_v6 = vpop.f32.mrb[48].mxu1 }
 0x17a   : > { %1330 = vst.msk [vmem:[%s2004_s16 + $0x5c] sm:$0xf] %vm1306_vm0, %v1608_v3  ;;  %1362 = vst.msk [vmem:[%s2004_s16 + $0xdc] sm:$0xf] %vm1306_vm0, %v1640_v4  ;;  %v828_v7 = vadd.f32 %v1994_v17, %v827_v5  ;;  %v956_v8 = vadd.f32 %v1994_v17, %v955_v6  ;;  %v829_v9 = vpop.f32.mrb[49].mxu0  ;;  %v957_v10 = vpop.f32.mrb[49].mxu1 }
 0x17b   : > { %v830_v11 = vpop.f32.mrb[50].mxu0  ;;  %v958_v12 = vpop.f32.mrb[50].mxu1 }
 0x17c   : > { %v1010_v13 = vmax.f32 %v828_v7, 0.0  ;;  %v1042_v14 = vmax.f32 %v956_v8, 0.0  ;;  %v831_v15 = vadd.f32 %v1994_v17, %v830_v11  ;;  %v959_v16 = vadd.f32 %v1994_v17, %v958_v12  ;;  %v832_v18 = vpop.f32.mrb[51].mxu0  ;;  %v960_v19 = vpop.f32.mrb[51].mxu1 }
 0x17e   : > { %v1609_v20 = vpack.c.bf16 %v1010_v13, %v1010_v13  ;;  %v1641_v21 = vpack.c.bf16 %v1042_v14, %v1042_v14  ;;  %v1011_v22 = vmax.f32 %v831_v15, 0.0  ;;  %v1043_v23 = vmax.f32 %v959_v16, 0.0 }
 0x180   : > { %1331 = vst.msk [vmem:[%s2004_s16 + $0x60] sm:$0xf] %vm1306_vm0, %v1609_v20  ;;  %1363 = vst.msk [vmem:[%s2004_s16 + $0xe0] sm:$0xf] %vm1306_vm0, %v1641_v21  ;;  %v1610_v24 = vpack.c.bf16 %v1011_v22, %v1011_v22  ;;  %v1642_v25 = vpack.c.bf16 %v1043_v23, %v1043_v23 }
 0x181   : > { %v835_v26 = vpop.f32.mrb[52].mxu0  ;;  %v963_v27 = vpop.f32.mrb[52].mxu1 }
 0x182   : > { %1332 = vst.msk [vmem:[%s2004_s16 + $0x64] sm:$0xf] %vm1306_vm0, %v1610_v24  ;;  %1364 = vst.msk [vmem:[%s2004_s16 + $0xe4] sm:$0xf] %vm1306_vm0, %v1642_v25  ;;  %v836_v28 = vadd.f32 %v1994_v17, %v835_v26  ;;  %v964_v29 = vadd.f32 %v1994_v17, %v963_v27  ;;  %v837_v30 = vpop.f32.mrb[53].mxu0  ;;  %v965_v31 = vpop.f32.mrb[53].mxu1 }
 0x183   : > { %v838_v32 = vpop.f32.mrb[54].mxu0  ;;  %v966_v33 = vpop.f32.mrb[54].mxu1 }
 0x184   : > { %v1012_v34 = vmax.f32 %v836_v28, 0.0  ;;  %v1044_v35 = vmax.f32 %v964_v29, 0.0  ;;  %v839_v36 = vadd.f32 %v1994_v17, %v838_v32  ;;  %v967_v37 = vadd.f32 %v1994_v17, %v966_v33  ;;  %v840_v38 = vpop.f32.mrb[55].mxu0  ;;  %v968_v39 = vpop.f32.mrb[55].mxu1 }
 0x186   : > { %v1611_v40 = vpack.c.bf16 %v1012_v34, %v1012_v34  ;;  %v1643_v41 = vpack.c.bf16 %v1044_v35, %v1044_v35  ;;  %v1013_v42 = vmax.f32 %v839_v36, 0.0  ;;  %v1045_v43 = vmax.f32 %v967_v37, 0.0 }
 0x188   : > { %1333 = vst.msk [vmem:[%s2004_s16 + $0x68] sm:$0xf] %vm1306_vm0, %v1611_v40  ;;  %1365 = vst.msk [vmem:[%s2004_s16 + $0xe8] sm:$0xf] %vm1306_vm0, %v1643_v41  ;;  %v1612_v44 = vpack.c.bf16 %v1013_v42, %v1013_v42  ;;  %v1644_v45 = vpack.c.bf16 %v1045_v43, %v1045_v43 }
 0x189   : > { %v843_v46 = vpop.f32.mrb[56].mxu0  ;;  %v971_v47 = vpop.f32.mrb[56].mxu1 }
 0x18a   : > { %1334 = vst.msk [vmem:[%s2004_s16 + $0x6c] sm:$0xf] %vm1306_vm0, %v1612_v44  ;;  %1366 = vst.msk [vmem:[%s2004_s16 + $0xec] sm:$0xf] %vm1306_vm0, %v1644_v45  ;;  %v844_v48 = vadd.f32 %v1994_v17, %v843_v46  ;;  %v972_v49 = vadd.f32 %v1994_v17, %v971_v47  ;;  %v845_v50 = vpop.f32.mrb[57].mxu0  ;;  %v973_v51 = vpop.f32.mrb[57].mxu1 }
 0x18b   : > { %v846_v52 = vpop.f32.mrb[58].mxu0  ;;  %v974_v53 = vpop.f32.mrb[58].mxu1 }
 0x18c   : > { %v1014_v54 = vmax.f32 %v844_v48, 0.0  ;;  %v1046_v55 = vmax.f32 %v972_v49, 0.0  ;;  %v847_v56 = vadd.f32 %v1994_v17, %v846_v52  ;;  %v975_v57 = vadd.f32 %v1994_v17, %v974_v53  ;;  %v848_v58 = vpop.f32.mrb[59].mxu0  ;;  %v976_v59 = vpop.f32.mrb[59].mxu1 }
 0x18e   : > { %v1613_v60 = vpack.c.bf16 %v1014_v54, %v1014_v54  ;;  %v1645_v61 = vpack.c.bf16 %v1046_v55, %v1046_v55  ;;  %v1015_v62 = vmax.f32 %v847_v56, 0.0  ;;  %v1047_v63 = vmax.f32 %v975_v57, 0.0 }
 0x190   : > { %1335 = vst.msk [vmem:[%s2004_s16 + $0x70] sm:$0xf] %vm1306_vm0, %v1613_v60  ;;  %1367 = vst.msk [vmem:[%s2004_s16 + $0xf0] sm:$0xf] %vm1306_vm0, %v1645_v61  ;;  %v1614_v0 = vpack.c.bf16 %v1015_v62, %v1015_v62  ;;  %v1646_v1 = vpack.c.bf16 %v1047_v63, %v1047_v63 }
 0x191   : > { %v851_v2 = vpop.f32.mrb[60].mxu0  ;;  %v979_v3 = vpop.f32.mrb[60].mxu1 }
 0x192   : > { %1336 = vst.msk [vmem:[%s2004_s16 + $0x74] sm:$0xf] %vm1306_vm0, %v1614_v0  ;;  %1368 = vst.msk [vmem:[%s2004_s16 + $0xf4] sm:$0xf] %vm1306_vm0, %v1646_v1  ;;  %v852_v4 = vadd.f32 %v1994_v17, %v851_v2  ;;  %v980_v5 = vadd.f32 %v1994_v17, %v979_v3  ;;  %v853_v6 = vpop.f32.mrb[61].mxu0  ;;  %v981_v7 = vpop.f32.mrb[61].mxu1 }
 0x193   : > { %v854_v8 = vpop.f32.mrb[62].mxu0  ;;  %v982_v9 = vpop.f32.mrb[62].mxu1 }
 0x194   : > { %v1016_v10 = vmax.f32 %v852_v4, 0.0  ;;  %v1048_v11 = vmax.f32 %v980_v5, 0.0  ;;  %v855_v12 = vadd.f32 %v1994_v17, %v854_v8  ;;  %v983_v13 = vadd.f32 %v1994_v17, %v982_v9  ;;  %v856_v14 = vpop.f32.mrb[63].mxu0  ;;  %v984_v15 = vpop.f32.mrb[63].mxu1 }
 0x196   : > { %v1615_v16 = vpack.c.bf16 %v1016_v10, %v1016_v10  ;;  %v1647_v18 = vpack.c.bf16 %v1048_v11, %v1048_v11  ;;  %v1017_v19 = vmax.f32 %v855_v12, 0.0  ;;  %v1049_v20 = vmax.f32 %v983_v13, 0.0 }
 0x198   : > { %1337 = vst.msk [vmem:[%s2004_s16 + $0x78] sm:$0xf] %vm1306_vm0, %v1615_v16  ;;  %1369 = vst.msk [vmem:[%s2004_s16 + $0xf8] sm:$0xf] %vm1306_vm0, %v1647_v18  ;;  %v1616_v21 = vpack.c.bf16 %v1017_v19, %v1017_v19  ;;  %v1648_v22 = vpack.c.bf16 %v1049_v20, %v1049_v20 }
 0x19a   : > { %1338 = vst.msk [vmem:[%s2004_s16 + $0x7c] sm:$0xf] %vm1306_vm0, %v1616_v21  ;;  %1370 = vst.msk [vmem:[%s2004_s16 + $0xfc] sm:$0xf] %vm1306_vm0, %v1648_v22 }
 0x19b PF: > { %s13_s12 = sadd.s32 1, %s1808_s12  }
 0x19c   : > { %p10_p4 = scmp.ge.s32.totalorder %s13_s12, 4  }
 0x19e   :  { %12 = sbr.rel (!%p10_p4) target bundleno = 1 (0x1), region = 62 }

// kernel: cnn_forward.5
= control target key start
LH: loop header
LB: loop body
LE: loop exit
PB: predicated region body
PF: predicated region fallthrough
CT: control target
= control target key end

     0   :  { %vm980_vm0 = vcmask 519168   ;;  %s1837_s1 = inlined_call_operand.vmem [shape: bf16[512,64], index: 1, kind: input, shape index: {}]   ;;  %s1838_s0 = inlined_call_operand.vmem [shape: bf16[200,512], index: 0, kind: input, shape index: {}]   ;;  %s1839_s2 = inlined_call_operand.vmem [shape: f32[1,64], index: 2, kind: input, shape index: {}]   ;;  %s1840_s3 = inlined_call_operand.vmem [shape: bf16[200,64], index: 3, kind: output, shape index: {}]  }
   0x1   :  { %v1333_v0 = vld [vmem:[%s1837_s1 + $0x40] sm:$0xff]   ;;  %v1337_v4 = vld [vmem:[%s1837_s1 + $0x48] sm:$0xff]   ;;  %v1341_v8 = vld [vmem:[%s1837_s1 + $0x50] sm:$0xff]  }
   0x2   :  { %v1334_v1 = vld [vmem:[%s1837_s1 + $0xc0] sm:$0xff]   ;;  %1145 = vmatprep.subr.bf16.mxu0 %v1333_v0  ;;  %v1338_v5 = vld [vmem:[%s1837_s1 + $0xc8] sm:$0xff]   ;;  %v1342_v9 = vld [vmem:[%s1837_s1 + $0xd0] sm:$0xff]  }
   0x3   :  { %v1335_v2 = vld [vmem:[%s1837_s1] sm:$0xff]   ;;  %1239 = vmatprep.subr.bf16.mxu1 %v1334_v1  ;;  %v1339_v6 = vld [vmem:[%s1837_s1 + $0x8] sm:$0xff]   ;;  %v1343_v10 = vld [vmem:[%s1837_s1 + $0x10] sm:$0xff]  }
   0x4   :  { %v1336_v3 = vld [vmem:[%s1837_s1 + $0x80] sm:$0xff]   ;;  %1146 = vmatpush3.bf16.msra.mxu0 %v1335_v2  ;;  %v1340_v7 = vld [vmem:[%s1837_s1 + $0x88] sm:$0xff]   ;;  %v1344_v11 = vld [vmem:[%s1837_s1 + $0x90] sm:$0xff]  }
   0x5   :  { %1240 = vmatpush3.bf16.msra.mxu1 %v1336_v3  ;;  %1147 = vmatprep.subr.bf16.mxu0 %v1337_v4  ;;  %v1345_v12 = vld [vmem:[%s1837_s1 + $0x58] sm:$0xff]   ;;  %v1349_v16 = vld [vmem:[%s1837_s1 + $0x60] sm:$0xff]   ;;  %v1353_v20 = vld [vmem:[%s1837_s1 + $0x68] sm:$0xff]  }
   0x6   :  { %1241 = vmatprep.subr.bf16.mxu1 %v1338_v5  ;;  %v1346_v13 = vld [vmem:[%s1837_s1 + $0xd8] sm:$0xff]   ;;  %v1350_v17 = vld [vmem:[%s1837_s1 + $0xe0] sm:$0xff]   ;;  %v1354_v21 = vld [vmem:[%s1837_s1 + $0xe8] sm:$0xff]  }
   0x7   :  { %v1347_v14 = vld [vmem:[%s1837_s1 + $0x18] sm:$0xff]   ;;  %v1351_v18 = vld [vmem:[%s1837_s1 + $0x20] sm:$0xff]   ;;  %v1355_v22 = vld [vmem:[%s1837_s1 + $0x28] sm:$0xff]  }
   0x8   :  { %1148 = vmatpush3.bf16.msra.mxu0 %v1339_v6  ;;  %v1348_v15 = vld [vmem:[%s1837_s1 + $0x98] sm:$0xff]   ;;  %v1352_v19 = vld [vmem:[%s1837_s1 + $0xa0] sm:$0xff]   ;;  %v1356_v23 = vld [vmem:[%s1837_s1 + $0xa8] sm:$0xff]  }
   0x9   :  { %1242 = vmatpush3.bf16.msra.mxu1 %v1340_v7  ;;  %1149 = vmatprep.subr.bf16.mxu0 %v1341_v8  ;;  %v1357_v24 = vld [vmem:[%s1837_s1 + $0x70] sm:$0xff]   ;;  %v1361_v28 = vld [vmem:[%s1837_s1 + $0x78] sm:$0xff]  }
   0xa   :  { %1243 = vmatprep.subr.bf16.mxu1 %v1342_v9  ;;  %v1358_v25 = vld [vmem:[%s1837_s1 + $0xf0] sm:$0xff]   ;;  %v1362_v29 = vld [vmem:[%s1837_s1 + $0xf8] sm:$0xff]  }
   0xb   :  { %v1359_v26 = vld [vmem:[%s1837_s1 + $0x30] sm:$0xff]   ;;  %v1363_v30 = vld [vmem:[%s1837_s1 + $0x38] sm:$0xff]  }
   0xc   :  { %1150 = vmatpush3.bf16.msra.mxu0 %v1343_v10  ;;  %v1360_v27 = vld [vmem:[%s1837_s1 + $0xb0] sm:$0xff]   ;;  %v1364_v31 = vld [vmem:[%s1837_s1 + $0xb8] sm:$0xff]  }
   0xd   :  { %1244 = vmatpush3.bf16.msra.mxu1 %v1344_v11  ;;  %1151 = vmatprep.subr.bf16.mxu0 %v1345_v12  ;;  %v1365_v32 = vld [vmem:[%s1838_s0] ss:$16 sps:$4 sm:$0xff]   ;;  %v1367_v33 = vld [vmem:[%s1838_s0 + $0x4] ss:$16 sps:$4 sm:$0xff]   ;;  %v1368_v34 = vld [vmem:[%s1838_s0 + $0x8] ss:$16 sps:$4 sm:$0xff]  }
   0xe   :  { %1245 = vmatprep.subr.bf16.mxu1 %v1346_v13  ;;  %v1370_v35 = vld [vmem:[%s1838_s0 + $0xc] ss:$16 sps:$4 sm:$0xff]   ;;  %614 = vmatprep.mubr.bf16.mxu0 %v1367_v33  ;;  %v1371_v36 = vld [vmem:[%s1838_s0 + $0x24] ss:$16 sps:$4 sm:$0xff]   ;;  %v1375_v38 = vld [vmem:[%s1838_s0 + $0x20] ss:$16 sps:$4 sm:$0xff]  }
   0xf   :  { %750 = vmatprep.mubr.bf16.mxu1 %v1370_v35  ;;  %v1373_v37 = vld [vmem:[%s1838_s0 + $0x2c] ss:$16 sps:$4 sm:$0xff]   ;;  %v1376_v39 = vld [vmem:[%s1838_s0 + $0x28] ss:$16 sps:$4 sm:$0xff]   ;;  %v1377_v40 = vld [vmem:[%s1838_s0 + $0x44] ss:$16 sps:$4 sm:$0xff]  }
  0x10   :  { %1152 = vmatpush3.bf16.msra.mxu0 %v1347_v14  ;;  %v1379_v41 = vld [vmem:[%s1838_s0 + $0x4c] ss:$16 sps:$4 sm:$0xff]   ;;  %v1381_v42 = vld [vmem:[%s1838_s0 + $0x40] ss:$16 sps:$4 sm:$0xff]   ;;  %v1382_v43 = vld [vmem:[%s1838_s0 + $0x48] ss:$16 sps:$4 sm:$0xff]  }
  0x11   :  { %1246 = vmatpush3.bf16.msra.mxu1 %v1348_v15  ;;  %1153 = vmatprep.subr.bf16.mxu0 %v1349_v16  ;;  %v1383_v44 = vld [vmem:[%s1838_s0 + $0x64] ss:$16 sps:$4 sm:$0xff]   ;;  %v1385_v45 = vld [vmem:[%s1838_s0 + $0x6c] ss:$16 sps:$4 sm:$0xff]   ;;  %v1387_v46 = vld [vmem:[%s1838_s0 + $0x60] ss:$16 sps:$4 sm:$0xff]  }
  0x12   :  { %1247 = vmatprep.subr.bf16.mxu1 %v1350_v17  ;;  %v1388_v47 = vld [vmem:[%s1838_s0 + $0x68] ss:$16 sps:$4 sm:$0xff]   ;;  %v1389_v48 = vld [vmem:[%s1838_s0 + $0x84] ss:$16 sps:$4 sm:$0xff]   ;;  %v1391_v49 = vld [vmem:[%s1838_s0 + $0x8c] ss:$16 sps:$4 sm:$0xff]  }
  0x13   :  { %v1393_v50 = vld [vmem:[%s1838_s0 + $0x80] ss:$16 sps:$4 sm:$0xff]   ;;  %v1394_v51 = vld [vmem:[%s1838_s0 + $0x88] ss:$16 sps:$4 sm:$0xff]   ;;  %v1395_v52 = vld [vmem:[%s1838_s0 + $0xa4] ss:$16 sps:$4 sm:$0xff]  }
  0x14   :  { %1154 = vmatpush3.bf16.msra.mxu0 %v1351_v18  ;;  %v1397_v53 = vld [vmem:[%s1838_s0 + $0xac] ss:$16 sps:$4 sm:$0xff]   ;;  %v1399_v54 = vld [vmem:[%s1838_s0 + $0xa0] ss:$16 sps:$4 sm:$0xff]   ;;  %v1400_v55 = vld [vmem:[%s1838_s0 + $0xa8] ss:$16 sps:$4 sm:$0xff]  }
  0x15   :  { %1248 = vmatpush3.bf16.msra.mxu1 %v1352_v19  ;;  %1155 = vmatprep.subr.bf16.mxu0 %v1353_v20  ;;  %v1401_v56 = vld [vmem:[%s1838_s0 + $0xc4] ss:$16 sps:$4 sm:$0xff]   ;;  %v1403_v57 = vld [vmem:[%s1838_s0 + $0xcc] ss:$16 sps:$4 sm:$0xff]   ;;  %v1405_v58 = vld [vmem:[%s1838_s0 + $0xc0] ss:$16 sps:$4 sm:$0xff]  }
  0x16   :  { %1249 = vmatprep.subr.bf16.mxu1 %v1354_v21  ;;  %v1406_v59 = vld [vmem:[%s1838_s0 + $0xc8] ss:$16 sps:$4 sm:$0xff]   ;;  %v1407_v60 = vld [vmem:[%s1838_s0 + $0xe4] ss:$16 sps:$4 sm:$0xff]   ;;  %v1409_v61 = vld [vmem:[%s1838_s0 + $0xec] ss:$16 sps:$4 sm:$0xff]  }
  0x17   :  { %v1411_v62 = vld [vmem:[%s1838_s0 + $0xe0] ss:$16 sps:$4 sm:$0xff]   ;;  %v1412_v63 = vld [vmem:[%s1838_s0 + $0xe8] ss:$16 sps:$4 sm:$0xff]   ;;  %v1413_v0 = vld [vmem:[%s1838_s0 + $0x104] ss:$16 sps:$4 sm:$0xff]  }
  0x18   :  { %1156 = vmatpush3.bf16.msra.mxu0 %v1355_v22  ;;  %v1415_v1 = vld [vmem:[%s1838_s0 + $0x10c] ss:$16 sps:$4 sm:$0xff]   ;;  %v1417_v2 = vld [vmem:[%s1838_s0 + $0x100] ss:$16 sps:$4 sm:$0xff]   ;;  %v1418_v3 = vld [vmem:[%s1838_s0 + $0x108] ss:$16 sps:$4 sm:$0xff]  }
  0x19   :  { %1250 = vmatpush3.bf16.msra.mxu1 %v1356_v23  ;;  %1157 = vmatprep.subr.bf16.mxu0 %v1357_v24  ;;  %v1419_v4 = vld [vmem:[%s1838_s0 + $0x124] ss:$16 sps:$4 sm:$0xff]   ;;  %v1421_v5 = vld [vmem:[%s1838_s0 + $0x12c] ss:$16 sps:$4 sm:$0xff]   ;;  %v1423_v6 = vld [vmem:[%s1838_s0 + $0x120] ss:$16 sps:$4 sm:$0xff]  }
  0x1a   :  { %1251 = vmatprep.subr.bf16.mxu1 %v1358_v25  ;;  %v1424_v7 = vld [vmem:[%s1838_s0 + $0x128] ss:$16 sps:$4 sm:$0xff]   ;;  %v1425_v8 = vld [vmem:[%s1838_s0 + $0x144] ss:$16 sps:$4 sm:$0xff]   ;;  %v1427_v9 = vld [vmem:[%s1838_s0 + $0x14c] ss:$16 sps:$4 sm:$0xff]  }
  0x1b   :  { %v1429_v10 = vld [vmem:[%s1838_s0 + $0x140] ss:$16 sps:$4 sm:$0xff]   ;;  %v1430_v11 = vld [vmem:[%s1838_s0 + $0x148] ss:$16 sps:$4 sm:$0xff]   ;;  %v1431_v12 = vld [vmem:[%s1838_s0 + $0x164] ss:$16 sps:$4 sm:$0xff]  }
  0x1c   :  { %1158 = vmatpush3.bf16.msra.mxu0 %v1359_v26  ;;  %v1433_v13 = vld [vmem:[%s1838_s0 + $0x16c] ss:$16 sps:$4 sm:$0xff]   ;;  %v63_v14 = vld [vmem:[%s1838_s0 + $0x180] sm:$0xff]  ;;  %v1436_v17 = vld [vmem:[%s1838_s0 + $0x168] ss:$16 sps:$4 sm:$0xff]  }
  0x1d   :  { %1252 = vmatpush3.bf16.msra.mxu1 %v1360_v27  ;;  %1159 = vmatprep.subr.bf16.mxu0 %v1361_v28  ;;  %v64_v15 = vld [vmem:[%s1838_s0 + $0x188] sm:$0xff]  ;;  %v1435_v16 = vld [vmem:[%s1838_s0 + $0x160] ss:$16 sps:$4 sm:$0xff]   ;;  %v1060_v18 = vcombine.high %v63_v14, %v63_v14  ;;  %v1059_v20 = vcombine.low %v63_v14, %v63_v14 }
  0x1e   :  { %1253 = vmatprep.subr.bf16.mxu1 %v1362_v29  ;;  %v1062_v19 = vcombine.high %v64_v15, %v64_v15  ;;  %v1061_v21 = vcombine.low %v64_v15, %v64_v15  ;;  %v1710_v24 = vld [vmem:[%s1839_s2] ss:$0 sm:$0xff] }
  0x20   :  { %1160 = vmatpush3.bf16.msra.mxu0 %v1363_v30 }
  0x21   :  { %1254 = vmatpush3.bf16.msra.mxu1 %v1364_v31 }
  0x23   :  { %615 = vmatmul.mubr.bf16.vlgmr.msra.gmra.mrb[0].mxu0 %v1365_v32 }
  0x24   :  { %751 = vmatmul.mubr.bf16.vlgmr.msra.gmra.mrb[0].mxu1 %v1368_v34  ;;  %622 = vmatprep.mubr.bf16.mxu0 %v1371_v36 }
  0x25   :  { %758 = vmatprep.mubr.bf16.mxu1 %v1373_v37 }
  0x2b   :  { %623 = vmatmul.mubr.bf16.gmra.mrb[4].mxu0 %v1375_v38 }
  0x2c   :  { %759 = vmatmul.mubr.bf16.gmra.mrb[4].mxu1 %v1376_v39  ;;  %630 = vmatprep.mubr.bf16.mxu0 %v1377_v40 }
  0x2d   :  { %766 = vmatprep.mubr.bf16.mxu1 %v1379_v41 }
  0x33   :  { %631 = vmatmul.mubr.bf16.gmra.mrb[8].mxu0 %v1381_v42 }
  0x34   :  { %767 = vmatmul.mubr.bf16.gmra.mrb[8].mxu1 %v1382_v43  ;;  %638 = vmatprep.mubr.bf16.mxu0 %v1383_v44 }
  0x35   :  { %774 = vmatprep.mubr.bf16.mxu1 %v1385_v45 }
  0x3b   :  { %639 = vmatmul.mubr.bf16.gmra.mrb[12].mxu0 %v1387_v46 }
  0x3c   :  { %775 = vmatmul.mubr.bf16.gmra.mrb[12].mxu1 %v1388_v47  ;;  %646 = vmatprep.mubr.bf16.mxu0 %v1389_v48 }
  0x3d   :  { %782 = vmatprep.mubr.bf16.mxu1 %v1391_v49 }
  0x43   :  { %647 = vmatmul.mubr.bf16.gmra.mrb[16].mxu0 %v1393_v50 }
  0x44   :  { %783 = vmatmul.mubr.bf16.gmra.mrb[16].mxu1 %v1394_v51  ;;  %654 = vmatprep.mubr.bf16.mxu0 %v1395_v52 }
  0x45   :  { %790 = vmatprep.mubr.bf16.mxu1 %v1397_v53 }
  0x4b   :  { %655 = vmatmul.mubr.bf16.gmra.mrb[20].mxu0 %v1399_v54 }
  0x4c   :  { %791 = vmatmul.mubr.bf16.gmra.mrb[20].mxu1 %v1400_v55  ;;  %662 = vmatprep.mubr.bf16.mxu0 %v1401_v56 }
  0x4d   :  { %798 = vmatprep.mubr.bf16.mxu1 %v1403_v57 }
  0x53   :  { %663 = vmatmul.mubr.bf16.gmra.mrb[24].mxu0 %v1405_v58 }
  0x54   :  { %799 = vmatmul.mubr.bf16.gmra.mrb[24].mxu1 %v1406_v59  ;;  %670 = vmatprep.mubr.bf16.mxu0 %v1407_v60 }
  0x55   :  { %806 = vmatprep.mubr.bf16.mxu1 %v1409_v61 }
  0x5b   :  { %671 = vmatmul.mubr.bf16.gmra.mrb[28].mxu0 %v1411_v62 }
  0x5c   :  { %807 = vmatmul.mubr.bf16.gmra.mrb[28].mxu1 %v1412_v63  ;;  %678 = vmatprep.mubr.bf16.mxu0 %v1413_v0 }
  0x5d   :  { %814 = vmatprep.mubr.bf16.mxu1 %v1415_v1 }
  0x63   :  { %679 = vmatmul.mubr.bf16.gmra.mrb[32].mxu0 %v1417_v2 }
  0x64   :  { %815 = vmatmul.mubr.bf16.gmra.mrb[32].mxu1 %v1418_v3  ;;  %686 = vmatprep.mubr.bf16.mxu0 %v1419_v4 }
  0x65   :  { %822 = vmatprep.mubr.bf16.mxu1 %v1421_v5 }
  0x6b   :  { %687 = vmatmul.mubr.bf16.gmra.mrb[36].mxu0 %v1423_v6 }
  0x6c   :  { %823 = vmatmul.mubr.bf16.gmra.mrb[36].mxu1 %v1424_v7  ;;  %694 = vmatprep.mubr.bf16.mxu0 %v1425_v8 }
  0x6d   :  { %830 = vmatprep.mubr.bf16.mxu1 %v1427_v9 }
  0x73   :  { %695 = vmatmul.mubr.bf16.gmra.mrb[40].mxu0 %v1429_v10 }
  0x74   :  { %831 = vmatmul.mubr.bf16.gmra.mrb[40].mxu1 %v1430_v11  ;;  %702 = vmatprep.mubr.bf16.mxu0 %v1431_v12 }
  0x75   :  { %838 = vmatprep.mubr.bf16.mxu1 %v1433_v13 }
  0x7b   :  { %703 = vmatmul.mubr.bf16.gmra.mrb[44].mxu0 %v1435_v16 }
  0x7c   :  { %839 = vmatmul.mubr.bf16.gmra.mrb[44].mxu1 %v1436_v17  ;;  %710 = vmatprep.mubr.bf16.mxu0 %v1060_v18 }
  0x7d   :  { %846 = vmatprep.mubr.bf16.mxu1 %v1062_v19 }
  0x83   :  { %711 = vmatmul.mubr.bf16.gmra.mrb[48].mxu0 %v1059_v20 }
  0x84   :  { %847 = vmatmul.mubr.bf16.gmra.mrb[48].mxu1 %v1061_v21 }
  0xf6   :  { %v1161_v22 = vpop.f32.mrb[0].mxu0 }
  0xf7   :  { %v1255_v23 = vpop.f32.mrb[0].mxu1  ;;  %v1162_v25 = vpop.f32.mrb[1].mxu0 }
  0xf8   :  { %v1163_v26 = vadd.f32 %v1162_v25, %v1161_v22  ;;  %v1256_v27 = vpop.f32.mrb[1].mxu1  ;;  %v1164_v28 = vpop.f32.mrb[2].mxu0 }
  0xf9   :  { %v1257_v29 = vadd.f32 %v1256_v27, %v1255_v23  ;;  %v1258_v30 = vpop.f32.mrb[2].mxu1  ;;  %v1165_v31 = vpop.f32.mrb[3].mxu0 }
  0xfa   :  { %v617_v32 = vadd.f32 %v1163_v26, %v1710_v24  ;;  %v1166_v33 = vadd.f32 %v1165_v31, %v1164_v28  ;;  %v1259_v34 = vpop.f32.mrb[3].mxu1 }
  0xfb   :  { %v1260_v35 = vadd.f32 %v1259_v34, %v1258_v30 }
  0xfc   :  { %v753_v36 = vadd.f32 %v1257_v29, %v617_v32  ;;  %v620_v37 = vadd.f32 %v1166_v33, %v1710_v24 }
  0xfe   :  { %v854_v38 = vmax.f32 %v753_v36, 0.0  ;;  %v756_v39 = vadd.f32 %v1260_v35, %v620_v37  ;;  %v1167_v40 = vpop.f32.mrb[4].mxu0 }
  0xff   :  { %v1261_v41 = vpop.f32.mrb[4].mxu1  ;;  %v1168_v42 = vpop.f32.mrb[5].mxu0 }
 0x100   :  { %v1120_v43 = vpack.c.bf16 %v854_v38, %v854_v38  ;;  %v855_v44 = vmax.f32 %v756_v39, 0.0  ;;  %v1169_v45 = vadd.f32 %v1168_v42, %v1167_v40  ;;  %v1262_v46 = vpop.f32.mrb[5].mxu1  ;;  %v1170_v47 = vpop.f32.mrb[6].mxu0 }
 0x101   :  { %v1263_v48 = vadd.f32 %v1262_v46, %v1261_v41  ;;  %v1264_v49 = vpop.f32.mrb[6].mxu1  ;;  %v1171_v50 = vpop.f32.mrb[7].mxu0 }
 0x102   :  { %981 = vst.msk [vmem:[%s1840_s3] sm:$0xf] %vm980_vm0, %v1120_v43  ;;  %v1121_v51 = vpack.c.bf16 %v855_v44, %v855_v44  ;;  %v625_v52 = vadd.f32 %v1169_v45, %v1710_v24  ;;  %v1172_v53 = vadd.f32 %v1171_v50, %v1170_v47  ;;  %v1265_v54 = vpop.f32.mrb[7].mxu1 }
 0x103   :  { %v1266_v55 = vadd.f32 %v1265_v54, %v1264_v49 }
 0x104   :  { %982 = vst.msk [vmem:[%s1840_s3 + $0x4] sm:$0xf] %vm980_vm0, %v1121_v51  ;;  %v761_v56 = vadd.f32 %v1263_v48, %v625_v52  ;;  %v628_v57 = vadd.f32 %v1172_v53, %v1710_v24 }
 0x106   :  { %v856_v58 = vmax.f32 %v761_v56, 0.0  ;;  %v764_v59 = vadd.f32 %v1266_v55, %v628_v57  ;;  %v1173_v60 = vpop.f32.mrb[8].mxu0 }
 0x107   :  { %v1267_v61 = vpop.f32.mrb[8].mxu1  ;;  %v1174_v62 = vpop.f32.mrb[9].mxu0 }
 0x108   :  { %v1122_v63 = vpack.c.bf16 %v856_v58, %v856_v58  ;;  %v857_v0 = vmax.f32 %v764_v59, 0.0  ;;  %v1175_v1 = vadd.f32 %v1174_v62, %v1173_v60  ;;  %v1268_v2 = vpop.f32.mrb[9].mxu1  ;;  %v1176_v3 = vpop.f32.mrb[10].mxu0 }
 0x109   :  { %v1269_v4 = vadd.f32 %v1268_v2, %v1267_v61  ;;  %v1270_v5 = vpop.f32.mrb[10].mxu1  ;;  %v1177_v6 = vpop.f32.mrb[11].mxu0 }
 0x10a   :  { %983 = vst.msk [vmem:[%s1840_s3 + $0x8] sm:$0xf] %vm980_vm0, %v1122_v63  ;;  %v1123_v7 = vpack.c.bf16 %v857_v0, %v857_v0  ;;  %v633_v8 = vadd.f32 %v1175_v1, %v1710_v24  ;;  %v1178_v9 = vadd.f32 %v1177_v6, %v1176_v3  ;;  %v1271_v10 = vpop.f32.mrb[11].mxu1 }
 0x10b   :  { %v1272_v11 = vadd.f32 %v1271_v10, %v1270_v5 }
 0x10c   :  { %984 = vst.msk [vmem:[%s1840_s3 + $0xc] sm:$0xf] %vm980_vm0, %v1123_v7  ;;  %v769_v12 = vadd.f32 %v1269_v4, %v633_v8  ;;  %v636_v13 = vadd.f32 %v1178_v9, %v1710_v24 }
 0x10e   :  { %v858_v14 = vmax.f32 %v769_v12, 0.0  ;;  %v772_v15 = vadd.f32 %v1272_v11, %v636_v13  ;;  %v1179_v16 = vpop.f32.mrb[12].mxu0 }
 0x10f   :  { %v1273_v17 = vpop.f32.mrb[12].mxu1  ;;  %v1180_v18 = vpop.f32.mrb[13].mxu0 }
 0x110   :  { %v1124_v19 = vpack.c.bf16 %v858_v14, %v858_v14  ;;  %v859_v20 = vmax.f32 %v772_v15, 0.0  ;;  %v1181_v21 = vadd.f32 %v1180_v18, %v1179_v16  ;;  %v1274_v22 = vpop.f32.mrb[13].mxu1  ;;  %v1182_v23 = vpop.f32.mrb[14].mxu0 }
 0x111   :  { %v1275_v25 = vadd.f32 %v1274_v22, %v1273_v17  ;;  %v1276_v26 = vpop.f32.mrb[14].mxu1  ;;  %v1183_v27 = vpop.f32.mrb[15].mxu0 }
 0x112   :  { %985 = vst.msk [vmem:[%s1840_s3 + $0x10] sm:$0xf] %vm980_vm0, %v1124_v19  ;;  %v1125_v28 = vpack.c.bf16 %v859_v20, %v859_v20  ;;  %v641_v29 = vadd.f32 %v1181_v21, %v1710_v24  ;;  %v1184_v30 = vadd.f32 %v1183_v27, %v1182_v23  ;;  %v1277_v31 = vpop.f32.mrb[15].mxu1 }
 0x113   :  { %v1278_v32 = vadd.f32 %v1277_v31, %v1276_v26 }
 0x114   :  { %986 = vst.msk [vmem:[%s1840_s3 + $0x14] sm:$0xf] %vm980_vm0, %v1125_v28  ;;  %v777_v33 = vadd.f32 %v1275_v25, %v641_v29  ;;  %v644_v34 = vadd.f32 %v1184_v30, %v1710_v24 }
 0x116   :  { %v860_v35 = vmax.f32 %v777_v33, 0.0  ;;  %v780_v36 = vadd.f32 %v1278_v32, %v644_v34  ;;  %v1185_v37 = vpop.f32.mrb[16].mxu0 }
 0x117   :  { %v1279_v38 = vpop.f32.mrb[16].mxu1  ;;  %v1186_v39 = vpop.f32.mrb[17].mxu0 }
 0x118   :  { %v1126_v40 = vpack.c.bf16 %v860_v35, %v860_v35  ;;  %v861_v41 = vmax.f32 %v780_v36, 0.0  ;;  %v1187_v42 = vadd.f32 %v1186_v39, %v1185_v37  ;;  %v1280_v43 = vpop.f32.mrb[17].mxu1  ;;  %v1188_v44 = vpop.f32.mrb[18].mxu0 }
 0x119   :  { %v1281_v45 = vadd.f32 %v1280_v43, %v1279_v38  ;;  %v1282_v46 = vpop.f32.mrb[18].mxu1  ;;  %v1189_v47 = vpop.f32.mrb[19].mxu0 }
 0x11a   :  { %987 = vst.msk [vmem:[%s1840_s3 + $0x18] sm:$0xf] %vm980_vm0, %v1126_v40  ;;  %v1127_v48 = vpack.c.bf16 %v861_v41, %v861_v41  ;;  %v649_v49 = vadd.f32 %v1187_v42, %v1710_v24  ;;  %v1190_v50 = vadd.f32 %v1189_v47, %v1188_v44  ;;  %v1283_v51 = vpop.f32.mrb[19].mxu1 }
 0x11b   :  { %v1284_v52 = vadd.f32 %v1283_v51, %v1282_v46 }
 0x11c   :  { %988 = vst.msk [vmem:[%s1840_s3 + $0x1c] sm:$0xf] %vm980_vm0, %v1127_v48  ;;  %v785_v53 = vadd.f32 %v1281_v45, %v649_v49  ;;  %v652_v54 = vadd.f32 %v1190_v50, %v1710_v24 }
 0x11e   :  { %v862_v55 = vmax.f32 %v785_v53, 0.0  ;;  %v788_v56 = vadd.f32 %v1284_v52, %v652_v54  ;;  %v1191_v57 = vpop.f32.mrb[20].mxu0 }
 0x11f   :  { %v1285_v58 = vpop.f32.mrb[20].mxu1  ;;  %v1192_v59 = vpop.f32.mrb[21].mxu0 }
 0x120   :  { %v1128_v60 = vpack.c.bf16 %v862_v55, %v862_v55  ;;  %v863_v61 = vmax.f32 %v788_v56, 0.0  ;;  %v1193_v62 = vadd.f32 %v1192_v59, %v1191_v57  ;;  %v1286_v63 = vpop.f32.mrb[21].mxu1  ;;  %v1194_v0 = vpop.f32.mrb[22].mxu0 }
 0x121   :  { %v1287_v1 = vadd.f32 %v1286_v63, %v1285_v58  ;;  %v1288_v2 = vpop.f32.mrb[22].mxu1  ;;  %v1195_v3 = vpop.f32.mrb[23].mxu0 }
 0x122   :  { %989 = vst.msk [vmem:[%s1840_s3 + $0x20] sm:$0xf] %vm980_vm0, %v1128_v60  ;;  %v1129_v4 = vpack.c.bf16 %v863_v61, %v863_v61  ;;  %v657_v5 = vadd.f32 %v1193_v62, %v1710_v24  ;;  %v1196_v6 = vadd.f32 %v1195_v3, %v1194_v0  ;;  %v1289_v7 = vpop.f32.mrb[23].mxu1 }
 0x123   :  { %v1290_v8 = vadd.f32 %v1289_v7, %v1288_v2 }
 0x124   :  { %990 = vst.msk [vmem:[%s1840_s3 + $0x24] sm:$0xf] %vm980_vm0, %v1129_v4  ;;  %v793_v9 = vadd.f32 %v1287_v1, %v657_v5  ;;  %v660_v10 = vadd.f32 %v1196_v6, %v1710_v24 }
 0x126   :  { %v864_v11 = vmax.f32 %v793_v9, 0.0  ;;  %v796_v12 = vadd.f32 %v1290_v8, %v660_v10  ;;  %v1197_v13 = vpop.f32.mrb[24].mxu0 }
 0x127   :  { %v1291_v14 = vpop.f32.mrb[24].mxu1  ;;  %v1198_v15 = vpop.f32.mrb[25].mxu0 }
 0x128   :  { %v1130_v16 = vpack.c.bf16 %v864_v11, %v864_v11  ;;  %v865_v17 = vmax.f32 %v796_v12, 0.0  ;;  %v1199_v18 = vadd.f32 %v1198_v15, %v1197_v13  ;;  %v1292_v19 = vpop.f32.mrb[25].mxu1  ;;  %v1200_v20 = vpop.f32.mrb[26].mxu0 }
 0x129   :  { %v1293_v21 = vadd.f32 %v1292_v19, %v1291_v14  ;;  %v1294_v22 = vpop.f32.mrb[26].mxu1  ;;  %v1201_v23 = vpop.f32.mrb[27].mxu0 }
 0x12a   :  { %991 = vst.msk [vmem:[%s1840_s3 + $0x28] sm:$0xf] %vm980_vm0, %v1130_v16  ;;  %v1131_v25 = vpack.c.bf16 %v865_v17, %v865_v17  ;;  %v665_v26 = vadd.f32 %v1199_v18, %v1710_v24  ;;  %v1202_v27 = vadd.f32 %v1201_v23, %v1200_v20  ;;  %v1295_v28 = vpop.f32.mrb[27].mxu1 }
 0x12b   :  { %v1296_v29 = vadd.f32 %v1295_v28, %v1294_v22 }
 0x12c   :  { %992 = vst.msk [vmem:[%s1840_s3 + $0x2c] sm:$0xf] %vm980_vm0, %v1131_v25  ;;  %v801_v30 = vadd.f32 %v1293_v21, %v665_v26  ;;  %v668_v31 = vadd.f32 %v1202_v27, %v1710_v24 }
 0x12e   :  { %v866_v32 = vmax.f32 %v801_v30, 0.0  ;;  %v804_v33 = vadd.f32 %v1296_v29, %v668_v31  ;;  %v1203_v34 = vpop.f32.mrb[28].mxu0 }
 0x12f   :  { %v1297_v35 = vpop.f32.mrb[28].mxu1  ;;  %v1204_v36 = vpop.f32.mrb[29].mxu0 }
 0x130   :  { %v1132_v37 = vpack.c.bf16 %v866_v32, %v866_v32  ;;  %v867_v38 = vmax.f32 %v804_v33, 0.0  ;;  %v1205_v39 = vadd.f32 %v1204_v36, %v1203_v34  ;;  %v1298_v40 = vpop.f32.mrb[29].mxu1  ;;  %v1206_v41 = vpop.f32.mrb[30].mxu0 }
 0x131   :  { %v1299_v42 = vadd.f32 %v1298_v40, %v1297_v35  ;;  %v1300_v43 = vpop.f32.mrb[30].mxu1  ;;  %v1207_v44 = vpop.f32.mrb[31].mxu0 }
 0x132   :  { %993 = vst.msk [vmem:[%s1840_s3 + $0x30] sm:$0xf] %vm980_vm0, %v1132_v37  ;;  %v1133_v45 = vpack.c.bf16 %v867_v38, %v867_v38  ;;  %v673_v46 = vadd.f32 %v1205_v39, %v1710_v24  ;;  %v1208_v47 = vadd.f32 %v1207_v44, %v1206_v41  ;;  %v1301_v48 = vpop.f32.mrb[31].mxu1 }
 0x133   :  { %v1302_v49 = vadd.f32 %v1301_v48, %v1300_v43 }
 0x134   :  { %994 = vst.msk [vmem:[%s1840_s3 + $0x34] sm:$0xf] %vm980_vm0, %v1133_v45  ;;  %v809_v50 = vadd.f32 %v1299_v42, %v673_v46  ;;  %v676_v51 = vadd.f32 %v1208_v47, %v1710_v24 }
 0x136   :  { %v868_v52 = vmax.f32 %v809_v50, 0.0  ;;  %v812_v53 = vadd.f32 %v1302_v49, %v676_v51  ;;  %v1209_v54 = vpop.f32.mrb[32].mxu0 }
 0x137   :  { %v1303_v55 = vpop.f32.mrb[32].mxu1  ;;  %v1210_v56 = vpop.f32.mrb[33].mxu0 }
 0x138   :  { %v1134_v57 = vpack.c.bf16 %v868_v52, %v868_v52  ;;  %v869_v58 = vmax.f32 %v812_v53, 0.0  ;;  %v1211_v59 = vadd.f32 %v1210_v56, %v1209_v54  ;;  %v1304_v60 = vpop.f32.mrb[33].mxu1  ;;  %v1212_v61 = vpop.f32.mrb[34].mxu0 }
 0x139   :  { %v1305_v62 = vadd.f32 %v1304_v60, %v1303_v55  ;;  %v1306_v63 = vpop.f32.mrb[34].mxu1  ;;  %v1213_v0 = vpop.f32.mrb[35].mxu0 }
 0x13a   :  { %995 = vst.msk [vmem:[%s1840_s3 + $0x38] sm:$0xf] %vm980_vm0, %v1134_v57  ;;  %v1135_v1 = vpack.c.bf16 %v869_v58, %v869_v58  ;;  %v681_v2 = vadd.f32 %v1211_v59, %v1710_v24  ;;  %v1214_v3 = vadd.f32 %v1213_v0, %v1212_v61  ;;  %v1307_v4 = vpop.f32.mrb[35].mxu1 }
 0x13b   :  { %v1308_v5 = vadd.f32 %v1307_v4, %v1306_v63 }
 0x13c   :  { %996 = vst.msk [vmem:[%s1840_s3 + $0x3c] sm:$0xf] %vm980_vm0, %v1135_v1  ;;  %v817_v6 = vadd.f32 %v1305_v62, %v681_v2  ;;  %v684_v7 = vadd.f32 %v1214_v3, %v1710_v24 }
 0x13e   :  { %v870_v8 = vmax.f32 %v817_v6, 0.0  ;;  %v820_v9 = vadd.f32 %v1308_v5, %v684_v7  ;;  %v1215_v10 = vpop.f32.mrb[36].mxu0 }
 0x13f   :  { %v1309_v11 = vpop.f32.mrb[36].mxu1  ;;  %v1216_v12 = vpop.f32.mrb[37].mxu0 }
 0x140   :  { %v1136_v13 = vpack.c.bf16 %v870_v8, %v870_v8  ;;  %v871_v14 = vmax.f32 %v820_v9, 0.0  ;;  %v1217_v15 = vadd.f32 %v1216_v12, %v1215_v10  ;;  %v1310_v16 = vpop.f32.mrb[37].mxu1  ;;  %v1218_v17 = vpop.f32.mrb[38].mxu0 }
 0x141   :  { %v1311_v18 = vadd.f32 %v1310_v16, %v1309_v11  ;;  %v1312_v19 = vpop.f32.mrb[38].mxu1  ;;  %v1219_v20 = vpop.f32.mrb[39].mxu0 }
 0x142   :  { %997 = vst.msk [vmem:[%s1840_s3 + $0x40] sm:$0xf] %vm980_vm0, %v1136_v13  ;;  %v1137_v21 = vpack.c.bf16 %v871_v14, %v871_v14  ;;  %v689_v22 = vadd.f32 %v1217_v15, %v1710_v24  ;;  %v1220_v23 = vadd.f32 %v1219_v20, %v1218_v17  ;;  %v1313_v25 = vpop.f32.mrb[39].mxu1 }
 0x143   :  { %v1314_v26 = vadd.f32 %v1313_v25, %v1312_v19 }
 0x144   :  { %998 = vst.msk [vmem:[%s1840_s3 + $0x44] sm:$0xf] %vm980_vm0, %v1137_v21  ;;  %v825_v27 = vadd.f32 %v1311_v18, %v689_v22  ;;  %v692_v28 = vadd.f32 %v1220_v23, %v1710_v24 }
 0x146   :  { %v872_v29 = vmax.f32 %v825_v27, 0.0  ;;  %v828_v30 = vadd.f32 %v1314_v26, %v692_v28  ;;  %v1221_v31 = vpop.f32.mrb[40].mxu0 }
 0x147   :  { %v1315_v32 = vpop.f32.mrb[40].mxu1  ;;  %v1222_v33 = vpop.f32.mrb[41].mxu0 }
 0x148   :  { %v1138_v34 = vpack.c.bf16 %v872_v29, %v872_v29  ;;  %v873_v35 = vmax.f32 %v828_v30, 0.0  ;;  %v1223_v36 = vadd.f32 %v1222_v33, %v1221_v31  ;;  %v1316_v37 = vpop.f32.mrb[41].mxu1  ;;  %v1224_v38 = vpop.f32.mrb[42].mxu0 }
 0x149   :  { %v1317_v39 = vadd.f32 %v1316_v37, %v1315_v32  ;;  %v1318_v40 = vpop.f32.mrb[42].mxu1  ;;  %v1225_v41 = vpop.f32.mrb[43].mxu0 }
 0x14a   :  { %999 = vst.msk [vmem:[%s1840_s3 + $0x48] sm:$0xf] %vm980_vm0, %v1138_v34  ;;  %v1139_v42 = vpack.c.bf16 %v873_v35, %v873_v35  ;;  %v697_v43 = vadd.f32 %v1223_v36, %v1710_v24  ;;  %v1226_v44 = vadd.f32 %v1225_v41, %v1224_v38  ;;  %v1319_v45 = vpop.f32.mrb[43].mxu1 }
 0x14b   :  { %v1320_v46 = vadd.f32 %v1319_v45, %v1318_v40 }
 0x14c   :  { %1000 = vst.msk [vmem:[%s1840_s3 + $0x4c] sm:$0xf] %vm980_vm0, %v1139_v42  ;;  %v833_v47 = vadd.f32 %v1317_v39, %v697_v43  ;;  %v700_v48 = vadd.f32 %v1226_v44, %v1710_v24 }
 0x14e   :  { %v874_v49 = vmax.f32 %v833_v47, 0.0  ;;  %v836_v50 = vadd.f32 %v1320_v46, %v700_v48  ;;  %v1227_v51 = vpop.f32.mrb[44].mxu0 }
 0x14f   :  { %v1321_v52 = vpop.f32.mrb[44].mxu1  ;;  %v1228_v53 = vpop.f32.mrb[45].mxu0 }
 0x150   :  { %v1140_v54 = vpack.c.bf16 %v874_v49, %v874_v49  ;;  %v875_v55 = vmax.f32 %v836_v50, 0.0  ;;  %v1229_v56 = vadd.f32 %v1228_v53, %v1227_v51  ;;  %v1322_v57 = vpop.f32.mrb[45].mxu1  ;;  %v1230_v58 = vpop.f32.mrb[46].mxu0 }
 0x151   :  { %v1323_v59 = vadd.f32 %v1322_v57, %v1321_v52  ;;  %v1324_v60 = vpop.f32.mrb[46].mxu1  ;;  %v1231_v61 = vpop.f32.mrb[47].mxu0 }
 0x152   :  { %1001 = vst.msk [vmem:[%s1840_s3 + $0x50] sm:$0xf] %vm980_vm0, %v1140_v54  ;;  %v1141_v62 = vpack.c.bf16 %v875_v55, %v875_v55  ;;  %v705_v63 = vadd.f32 %v1229_v56, %v1710_v24  ;;  %v1232_v0 = vadd.f32 %v1231_v61, %v1230_v58  ;;  %v1325_v1 = vpop.f32.mrb[47].mxu1 }
 0x153   :  { %v1326_v2 = vadd.f32 %v1325_v1, %v1324_v60 }
 0x154   :  { %1002 = vst.msk [vmem:[%s1840_s3 + $0x54] sm:$0xf] %vm980_vm0, %v1141_v62  ;;  %v841_v3 = vadd.f32 %v1323_v59, %v705_v63  ;;  %v708_v4 = vadd.f32 %v1232_v0, %v1710_v24 }
 0x156   :  { %v876_v5 = vmax.f32 %v841_v3, 0.0  ;;  %v844_v6 = vadd.f32 %v1326_v2, %v708_v4  ;;  %v1233_v7 = vpop.f32.mrb[48].mxu0 }
 0x157   :  { %v1327_v8 = vpop.f32.mrb[48].mxu1  ;;  %v1234_v9 = vpop.f32.mrb[49].mxu0 }
 0x158   :  { %v1142_v10 = vpack.c.bf16 %v876_v5, %v876_v5  ;;  %v877_v11 = vmax.f32 %v844_v6, 0.0  ;;  %v1235_v12 = vadd.f32 %v1234_v9, %v1233_v7  ;;  %v1328_v13 = vpop.f32.mrb[49].mxu1  ;;  %v1236_v14 = vpop.f32.mrb[50].mxu0 }
 0x159   :  { %v1329_v15 = vadd.f32 %v1328_v13, %v1327_v8  ;;  %v1330_v16 = vpop.f32.mrb[50].mxu1  ;;  %v1237_v17 = vpop.f32.mrb[51].mxu0 }
 0x15a   :  { %1003 = vst.msk [vmem:[%s1840_s3 + $0x58] sm:$0xf] %vm980_vm0, %v1142_v10  ;;  %v1143_v18 = vpack.c.bf16 %v877_v11, %v877_v11  ;;  %v713_v19 = vadd.f32 %v1235_v12, %v1710_v24  ;;  %v1331_v20 = vpop.f32.mrb[51].mxu1 }
 0x15c   :  { %1004 = vst.msk [vmem:[%s1840_s3 + $0x5c] sm:$0xf] %vm980_vm0, %v1143_v18  ;;  %v849_v21 = vadd.f32 %v1329_v15, %v713_v19 }
 0x15e   :  { %v878_v22 = vmax.f32 %v849_v21, 0.0 }
 0x160   :  { %v1144_v23 = vpack.c.bf16 %v878_v22, %v878_v22 }
 0x162   :  { %1005 = vst.msk [vmem:[%s1840_s3 + $0x60] sm:$0xf] %vm980_vm0, %v1144_v23 }

// kernel: cnn_forward.6
= control target key start
LH: loop header
LB: loop body
LE: loop exit
PB: predicated region body
PF: predicated region fallthrough
CT: control target
= control target key end

     0   :  { %vm558_vm0 = vcmask 523264   ;;  %vm954_vm1 = vcmask 519168   ;;  %s1730_s1 = inlined_call_operand.vmem [shape: bf16[576,64], index: 1, kind: input, shape index: {}]   ;;  %s1731_s0 = inlined_call_operand.vmem [shape: bf16[128,576], index: 0, kind: input, shape index: {}]   ;;  %s1732_s2 = inlined_call_operand.vmem [shape: f32[1,64], index: 2, kind: input, shape index: {}]   ;;  %s1733_s3 = inlined_call_operand.vmem [shape: bf16[128,64], index: 3, kind: output, shape index: {}]  }
   0x1   :  { %v1264_v0 = vld [vmem:[%s1730_s1 + $0x40] sm:$0xff]   ;;  %v1268_v4 = vld [vmem:[%s1730_s1 + $0x48] sm:$0xff]   ;;  %v1272_v8 = vld [vmem:[%s1730_s1 + $0x50] sm:$0xff]  }
   0x2   :  { %v1265_v1 = vld [vmem:[%s1730_s1 + $0xc0] sm:$0xff]   ;;  %1092 = vmatprep.subr.bf16.mxu0 %v1264_v0  ;;  %v1269_v5 = vld [vmem:[%s1730_s1 + $0xc8] sm:$0xff]   ;;  %v1273_v9 = vld [vmem:[%s1730_s1 + $0xd0] sm:$0xff]  }
   0x3   :  { %v1266_v2 = vld [vmem:[%s1730_s1] sm:$0xff]   ;;  %1156 = vmatprep.subr.bf16.mxu1 %v1265_v1  ;;  %v1270_v6 = vld [vmem:[%s1730_s1 + $0x8] sm:$0xff]   ;;  %v1274_v10 = vld [vmem:[%s1730_s1 + $0x10] sm:$0xff]  }
   0x4   :  { %v1267_v3 = vld [vmem:[%s1730_s1 + $0x80] sm:$0xff]   ;;  %1093 = vmatpush3.bf16.msra.mxu0 %v1266_v2  ;;  %v1271_v7 = vld [vmem:[%s1730_s1 + $0x88] sm:$0xff]   ;;  %v1275_v11 = vld [vmem:[%s1730_s1 + $0x90] sm:$0xff]  }
   0x5   :  { %1157 = vmatpush3.bf16.msra.mxu1 %v1267_v3  ;;  %1094 = vmatprep.subr.bf16.mxu0 %v1268_v4  ;;  %v1276_v12 = vld [vmem:[%s1730_s1 + $0x58] sm:$0xff]   ;;  %v1280_v16 = vld [vmem:[%s1730_s1 + $0x60] sm:$0xff]   ;;  %v1284_v20 = vld [vmem:[%s1730_s1 + $0x68] sm:$0xff]  }
   0x6   :  { %1158 = vmatprep.subr.bf16.mxu1 %v1269_v5  ;;  %v1277_v13 = vld [vmem:[%s1730_s1 + $0xd8] sm:$0xff]   ;;  %v1281_v17 = vld [vmem:[%s1730_s1 + $0xe0] sm:$0xff]   ;;  %v1285_v21 = vld [vmem:[%s1730_s1 + $0xe8] sm:$0xff]  }
   0x7   :  { %v1278_v14 = vld [vmem:[%s1730_s1 + $0x18] sm:$0xff]   ;;  %v1282_v18 = vld [vmem:[%s1730_s1 + $0x20] sm:$0xff]   ;;  %v1286_v22 = vld [vmem:[%s1730_s1 + $0x28] sm:$0xff]  }
   0x8   :  { %1095 = vmatpush3.bf16.msra.mxu0 %v1270_v6  ;;  %v1279_v15 = vld [vmem:[%s1730_s1 + $0x98] sm:$0xff]   ;;  %v1283_v19 = vld [vmem:[%s1730_s1 + $0xa0] sm:$0xff]   ;;  %v1287_v23 = vld [vmem:[%s1730_s1 + $0xa8] sm:$0xff]  }
   0x9   :  { %1159 = vmatpush3.bf16.msra.mxu1 %v1271_v7  ;;  %1096 = vmatprep.subr.bf16.mxu0 %v1272_v8  ;;  %v1288_v24 = vld [vmem:[%s1730_s1 + $0x70] sm:$0xff]   ;;  %v1292_v28 = vld [vmem:[%s1730_s1 + $0x78] sm:$0xff]   ;;  %v1301_v35 = vld [vmem:[%s1731_s0 + $0xc] ss:$20 sps:$4 sm:$0xff]  }
   0xa   :  { %1160 = vmatprep.subr.bf16.mxu1 %v1273_v9  ;;  %v1289_v25 = vld [vmem:[%s1730_s1 + $0xf0] sm:$0xff]   ;;  %v1293_v29 = vld [vmem:[%s1730_s1 + $0xf8] sm:$0xff]   ;;  %v1302_v36 = vld [vmem:[%s1730_s1 + $0x100] sm:$0xff]   ;;  %712 = vmatprep.mubr.bf16.mxu1 %v1301_v35 }
   0xb   :  { %v1290_v26 = vld [vmem:[%s1730_s1 + $0x30] sm:$0xff]   ;;  %v1294_v30 = vld [vmem:[%s1730_s1 + $0x38] sm:$0xff]   ;;  %v1303_v37 = vld [vmem:[%s1731_s0 + $0x2c] ss:$20 sps:$4 sm:$0xff]  }
   0xc   :  { %1097 = vmatpush3.bf16.msra.mxu0 %v1274_v10  ;;  %v1291_v27 = vld [vmem:[%s1730_s1 + $0xb0] sm:$0xff]   ;;  %v1295_v31 = vld [vmem:[%s1730_s1 + $0xb8] sm:$0xff]   ;;  %v1315_v42 = vld [vmem:[%s1730_s1 + $0x108] sm:$0xff]  }
   0xd   :  { %1161 = vmatpush3.bf16.msra.mxu1 %v1275_v11  ;;  %1098 = vmatprep.subr.bf16.mxu0 %v1276_v12  ;;  %v1296_v32 = vld [vmem:[%s1731_s0] ss:$20 sps:$4 sm:$0xff]   ;;  %v1298_v33 = vld [vmem:[%s1731_s0 + $0x4] ss:$20 sps:$4 sm:$0xff]   ;;  %v1299_v34 = vld [vmem:[%s1731_s0 + $0x8] ss:$20 sps:$4 sm:$0xff]  }
   0xe   :  { %1162 = vmatprep.subr.bf16.mxu1 %v1277_v13  ;;  %615 = vmatprep.mubr.bf16.mxu0 %v1298_v33  ;;  %v1305_v38 = vld [vmem:[%s1731_s0 + $0x34] ss:$20 sps:$4 sm:$0xff]   ;;  %v1308_v40 = vld [vmem:[%s1731_s0 + $0x30] ss:$20 sps:$4 sm:$0xff]   ;;  %v1314_v45 = vld [vmem:[%s1731_s0 + $0x58] ss:$20 sps:$4 sm:$0xff]  }
   0xf   :  { %v1307_v39 = vld [vmem:[%s1731_s0 + $0x28] ss:$20 sps:$4 sm:$0xff]   ;;  %v1313_v44 = vld [vmem:[%s1731_s0 + $0x50] ss:$20 sps:$4 sm:$0xff]   ;;  %v1320_v50 = vld [vmem:[%s1731_s0 + $0x78] ss:$20 sps:$4 sm:$0xff]  }
  0x10   :  { %1099 = vmatpush3.bf16.msra.mxu0 %v1278_v14  ;;  %v1309_v41 = vld [vmem:[%s1731_s0 + $0x54] ss:$20 sps:$4 sm:$0xff]   ;;  %v1311_v43 = vld [vmem:[%s1731_s0 + $0x5c] ss:$20 sps:$4 sm:$0xff]   ;;  %v1318_v48 = vld [vmem:[%s1731_s0 + $0x84] ss:$20 sps:$4 sm:$0xff]  }
  0x11   :  { %1163 = vmatpush3.bf16.msra.mxu1 %v1279_v15  ;;  %1100 = vmatprep.subr.bf16.mxu0 %v1280_v16  ;;  %v1328_v46 = vld [vmem:[%s1730_s1 + $0x110] sm:$0xff]   ;;  %v1341_v49 = vld [vmem:[%s1730_s1 + $0x118] sm:$0xff]   ;;  %v1324_v53 = vld [vmem:[%s1731_s0 + $0xac] ss:$20 sps:$4 sm:$0xff]  }
  0x12   :  { %1164 = vmatprep.subr.bf16.mxu1 %v1281_v17  ;;  %v1316_v47 = vld [vmem:[%s1731_s0 + $0x7c] ss:$20 sps:$4 sm:$0xff]   ;;  %v1321_v51 = vld [vmem:[%s1731_s0 + $0x80] ss:$20 sps:$4 sm:$0xff]   ;;  %v1322_v52 = vld [vmem:[%s1731_s0 + $0xa4] ss:$20 sps:$4 sm:$0xff]  }
  0x13   :  { %v1326_v54 = vld [vmem:[%s1731_s0 + $0xa0] ss:$20 sps:$4 sm:$0xff]   ;;  %v1327_v55 = vld [vmem:[%s1731_s0 + $0xa8] ss:$20 sps:$4 sm:$0xff]   ;;  %v1334_v59 = vld [vmem:[%s1731_s0 + $0xd0] ss:$20 sps:$4 sm:$0xff]  }
  0x14   :  { %1101 = vmatpush3.bf16.msra.mxu0 %v1282_v18  ;;  %v1329_v56 = vld [vmem:[%s1731_s0 + $0xcc] ss:$20 sps:$4 sm:$0xff]   ;;  %v1331_v57 = vld [vmem:[%s1731_s0 + $0xd4] ss:$20 sps:$4 sm:$0xff]   ;;  %v1337_v61 = vld [vmem:[%s1731_s0 + $0xfc] ss:$20 sps:$4 sm:$0xff]  }
  0x15   :  { %1165 = vmatpush3.bf16.msra.mxu1 %v1283_v19  ;;  %1102 = vmatprep.subr.bf16.mxu0 %v1284_v20  ;;  %v1333_v58 = vld [vmem:[%s1731_s0 + $0xc8] ss:$20 sps:$4 sm:$0xff]   ;;  %v1339_v62 = vld [vmem:[%s1731_s0 + $0xf0] ss:$20 sps:$4 sm:$0xff]   ;;  %v1340_v63 = vld [vmem:[%s1731_s0 + $0xf8] ss:$20 sps:$4 sm:$0xff]  }
  0x16   :  { %1166 = vmatprep.subr.bf16.mxu1 %v1285_v21  ;;  %v1335_v60 = vld [vmem:[%s1731_s0 + $0xf4] ss:$20 sps:$4 sm:$0xff]   ;;  %v1342_v0 = vld [vmem:[%s1731_s0 + $0x11c] ss:$20 sps:$4 sm:$0xff]   ;;  %v1344_v1 = vld [vmem:[%s1731_s0 + $0x124] ss:$20 sps:$4 sm:$0xff]  }
  0x17   :  { %v1346_v2 = vld [vmem:[%s1731_s0 + $0x118] ss:$20 sps:$4 sm:$0xff]   ;;  %v1347_v3 = vld [vmem:[%s1731_s0 + $0x120] ss:$20 sps:$4 sm:$0xff]   ;;  %v1348_v4 = vld [vmem:[%s1731_s0 + $0x10] ss:$20 sps:$4 sm:$0xff]  }
  0x18   :  { %1103 = vmatpush3.bf16.msra.mxu0 %v1286_v22  ;;  %v1349_v5 = vld [vmem:[%s1731_s0 + $0xb0] ss:$20 sps:$4 sm:$0xff]   ;;  %v1350_v6 = vld [vmem:[%s1731_s0 + $0x38] ss:$20 sps:$4 sm:$0xff]   ;;  %v1352_v8 = vld [vmem:[%s1731_s0 + $0x60] ss:$20 sps:$4 sm:$0xff]  }
  0x19   :  { %1167 = vmatpush3.bf16.msra.mxu1 %v1287_v23  ;;  %1104 = vmatprep.subr.bf16.mxu0 %v1288_v24  ;;  %v1351_v7 = vld [vmem:[%s1731_s0 + $0xd8] ss:$20 sps:$4 sm:$0xff]   ;;  %v1353_v9 = vld [vmem:[%s1731_s0 + $0x100] ss:$20 sps:$4 sm:$0xff]   ;;  %v1354_v10 = vld [vmem:[%s1731_s0 + $0x88] ss:$20 sps:$4 sm:$0xff]  }
  0x1a   :  { %1168 = vmatprep.subr.bf16.mxu1 %v1289_v25  ;;  %v1355_v11 = vld [vmem:[%s1731_s0 + $0x128] ss:$20 sps:$4 sm:$0xff]   ;;  %v1615_v14 = vld [vmem:[%s1732_s2] ss:$0 sm:$0xff] }
  0x1c   :  { %1105 = vmatpush3.bf16.msra.mxu0 %v1290_v26 }
  0x1d   :  { %1169 = vmatpush3.bf16.msra.mxu1 %v1291_v27  ;;  %1106 = vmatprep.subr.bf16.mxu0 %v1292_v28 }
  0x1e   :  { %1170 = vmatprep.subr.bf16.mxu1 %v1293_v29 }
  0x20   :  { %1107 = vmatpush3.bf16.msra.mxu0 %v1294_v30 }
  0x21   :  { %1171 = vmatpush3.bf16.msra.mxu1 %v1295_v31  ;;  %1232 = vmatprep.subr.bf16.mxu0 %v1302_v36 }
  0x22   :  { %1256 = vmatprep.subr.bf16.mxu1 %v1302_v36 }
  0x23   :  { %616 = vmatmul.mubr.bf16.vlgmr.msra.gmra.mrb[0].mxu0 %v1296_v32 }
  0x24   :  { %713 = vmatmul.mubr.bf16.vlgmr.msra.gmra.mrb[0].mxu1 %v1299_v34  ;;  %1233 = vmatpush3.bf16.msra.mxu0 %v1302_v36 }
  0x25   :  { %1260 = vmatpush3.bf16.msra.mxu1 %v1302_v36  ;;  %623 = vmatprep.mubr.bf16.mxu0 %v1303_v37 }
  0x26   :  { %720 = vmatprep.mubr.bf16.mxu1 %v1305_v38  ;;  %1234 = vmatprep.subr.bf16.mxu0 %v1315_v42 }
  0x27   :  { %1257 = vmatprep.subr.bf16.mxu1 %v1315_v42 }
  0x28   :  { %1235 = vmatpush3.bf16.msra.mxu0 %v1315_v42 }
  0x29   :  { %1261 = vmatpush3.bf16.msra.mxu1 %v1315_v42  ;;  %1236 = vmatprep.subr.bf16.mxu0 %v1328_v46 }
  0x2a   :  { %1258 = vmatprep.subr.bf16.mxu1 %v1328_v46 }
  0x2b   :  { %624 = vmatmul.mubr.bf16.gmra.mrb[4].mxu0 %v1307_v39 }
  0x2c   :  { %721 = vmatmul.mubr.bf16.gmra.mrb[4].mxu1 %v1308_v40  ;;  %631 = vmatprep.mubr.bf16.mxu0 %v1309_v41 }
  0x2d   :  { %728 = vmatprep.mubr.bf16.mxu1 %v1311_v43  ;;  %1237 = vmatpush3.bf16.msra.mxu0 %v1328_v46 }
  0x2e   :  { %1262 = vmatpush3.bf16.msra.mxu1 %v1328_v46  ;;  %1238 = vmatprep.subr.bf16.mxu0 %v1341_v49 }
  0x2f   :  { %1259 = vmatprep.subr.bf16.mxu1 %v1341_v49 }
  0x31   :  { %1239 = vmatpush3.bf16.msra.mxu0 %v1341_v49 }
  0x32   :  { %1263 = vmatpush3.bf16.msra.mxu1 %v1341_v49 }
  0x33   :  { %632 = vmatmul.mubr.bf16.gmra.mrb[8].mxu0 %v1313_v44 }
  0x34   :  { %729 = vmatmul.mubr.bf16.gmra.mrb[8].mxu1 %v1314_v45  ;;  %639 = vmatprep.mubr.bf16.mxu0 %v1316_v47 }
  0x35   :  { %736 = vmatprep.mubr.bf16.mxu1 %v1318_v48 }
  0x3b   :  { %640 = vmatmul.mubr.bf16.gmra.mrb[12].mxu0 %v1320_v50 }
  0x3c   :  { %737 = vmatmul.mubr.bf16.gmra.mrb[12].mxu1 %v1321_v51  ;;  %647 = vmatprep.mubr.bf16.mxu0 %v1322_v52 }
  0x3d   :  { %744 = vmatprep.mubr.bf16.mxu1 %v1324_v53 }
  0x43   :  { %648 = vmatmul.mubr.bf16.gmra.mrb[16].mxu0 %v1326_v54 }
  0x44   :  { %745 = vmatmul.mubr.bf16.gmra.mrb[16].mxu1 %v1327_v55  ;;  %655 = vmatprep.mubr.bf16.mxu0 %v1329_v56 }
  0x45   :  { %752 = vmatprep.mubr.bf16.mxu1 %v1331_v57 }
  0x4b   :  { %656 = vmatmul.mubr.bf16.gmra.mrb[20].mxu0 %v1333_v58 }
  0x4c   :  { %753 = vmatmul.mubr.bf16.gmra.mrb[20].mxu1 %v1334_v59  ;;  %663 = vmatprep.mubr.bf16.mxu0 %v1335_v60 }
  0x4d   :  { %760 = vmatprep.mubr.bf16.mxu1 %v1337_v61 }
  0x53   :  { %664 = vmatmul.mubr.bf16.gmra.mrb[24].mxu0 %v1339_v62 }
  0x54   :  { %761 = vmatmul.mubr.bf16.gmra.mrb[24].mxu1 %v1340_v63  ;;  %671 = vmatprep.mubr.bf16.mxu0 %v1342_v0 }
  0x55   :  { %768 = vmatprep.mubr.bf16.mxu1 %v1344_v1 }
  0x5b   :  { %672 = vmatmul.mubr.bf16.gmra.mrb[28].mxu0 %v1346_v2 }
  0x5c   :  { %769 = vmatmul.mubr.bf16.gmra.mrb[28].mxu1 %v1347_v3  ;;  %1240 = vmatprep.mubr.msk.bf16.mxu0 %vm558_vm0, %v1348_v4 }
  0x5d   :  { %1248 = vmatprep.mubr.msk.bf16.mxu1 %vm558_vm0, %v1349_v5 }
  0x63   :  { %1241 = vmatmul.mubr.msk.bf16.vlgmr.msra.gmra.mrb[32].mxu0 %vm558_vm0, %v1350_v6 }
  0x64   :  { %1249 = vmatmul.mubr.msk.bf16.vlgmr.msra.gmra.mrb[32].mxu1 %vm558_vm0, %v1351_v7  ;;  %1244 = vmatprep.mubr.msk.bf16.mxu0 %vm558_vm0, %v1352_v8 }
  0x65   :  { %1252 = vmatprep.mubr.msk.bf16.mxu1 %vm558_vm0, %v1353_v9 }
  0x6b   :  { %1245 = vmatmul.mubr.msk.bf16.gmra.mrb[36].mxu0 %vm558_vm0, %v1354_v10 }
  0x6c   :  { %1253 = vmatmul.mubr.msk.bf16.gmra.mrb[36].mxu1 %vm558_vm0, %v1355_v11 }
  0xf6   :  { %v1108_v12 = vpop.f32.mrb[0].mxu0 }
  0xf7   :  { %v1172_v13 = vpop.f32.mrb[0].mxu1  ;;  %v1109_v15 = vpop.f32.mrb[1].mxu0 }
  0xf8   :  { %v1110_v16 = vadd.f32 %v1109_v15, %v1108_v12  ;;  %v1173_v17 = vpop.f32.mrb[1].mxu1  ;;  %v1111_v18 = vpop.f32.mrb[2].mxu0 }
  0xf9   :  { %v1174_v19 = vadd.f32 %v1173_v17, %v1172_v13  ;;  %v1175_v20 = vpop.f32.mrb[2].mxu1  ;;  %v1112_v21 = vpop.f32.mrb[3].mxu0 }
  0xfa   :  { %v618_v22 = vadd.f32 %v1110_v16, %v1615_v14  ;;  %v1113_v23 = vadd.f32 %v1112_v21, %v1111_v18  ;;  %v1176_v24 = vpop.f32.mrb[3].mxu1 }
  0xfb   :  { %v1177_v25 = vadd.f32 %v1176_v24, %v1175_v20 }
  0xfc   :  { %v621_v26 = vadd.f32 %v1113_v23, %v1615_v14  ;;  %v1619_v27 = vadd.f32 %v1174_v19, %v618_v22 }
  0xfe   :  { %v1114_v28 = vpop.f32.mrb[4].mxu0  ;;  %v1621_v29 = vadd.f32 %v1177_v25, %v621_v26 }
  0xff   :  { %v1178_v30 = vpop.f32.mrb[4].mxu1  ;;  %v1115_v31 = vpop.f32.mrb[5].mxu0 }
 0x100   :  { %v1116_v32 = vadd.f32 %v1115_v31, %v1114_v28  ;;  %v1179_v33 = vpop.f32.mrb[5].mxu1  ;;  %v1117_v34 = vpop.f32.mrb[6].mxu0 }
 0x101   :  { %v1180_v35 = vadd.f32 %v1179_v33, %v1178_v30  ;;  %v1181_v36 = vpop.f32.mrb[6].mxu1  ;;  %v1118_v37 = vpop.f32.mrb[7].mxu0 }
 0x102   :  { %v626_v38 = vadd.f32 %v1116_v32, %v1615_v14  ;;  %v1119_v39 = vadd.f32 %v1118_v37, %v1117_v34  ;;  %v1182_v40 = vpop.f32.mrb[7].mxu1 }
 0x103   :  { %v1183_v41 = vadd.f32 %v1182_v40, %v1181_v36 }
 0x104   :  { %v629_v42 = vadd.f32 %v1119_v39, %v1615_v14  ;;  %v1625_v43 = vadd.f32 %v1180_v35, %v626_v38 }
 0x106   :  { %v1120_v44 = vpop.f32.mrb[8].mxu0  ;;  %v1627_v45 = vadd.f32 %v1183_v41, %v629_v42 }
 0x107   :  { %v1184_v46 = vpop.f32.mrb[8].mxu1  ;;  %v1121_v47 = vpop.f32.mrb[9].mxu0 }
 0x108   :  { %v1122_v48 = vadd.f32 %v1121_v47, %v1120_v44  ;;  %v1185_v49 = vpop.f32.mrb[9].mxu1  ;;  %v1123_v50 = vpop.f32.mrb[10].mxu0 }
 0x109   :  { %v1186_v51 = vadd.f32 %v1185_v49, %v1184_v46  ;;  %v1187_v52 = vpop.f32.mrb[10].mxu1  ;;  %v1124_v53 = vpop.f32.mrb[11].mxu0 }
 0x10a   :  { %v634_v54 = vadd.f32 %v1122_v48, %v1615_v14  ;;  %v1125_v55 = vadd.f32 %v1124_v53, %v1123_v50  ;;  %v1188_v56 = vpop.f32.mrb[11].mxu1 }
 0x10b   :  { %v1189_v57 = vadd.f32 %v1188_v56, %v1187_v52 }
 0x10c   :  { %v637_v58 = vadd.f32 %v1125_v55, %v1615_v14  ;;  %v1631_v59 = vadd.f32 %v1186_v51, %v634_v54 }
 0x10e   :  { %v1126_v60 = vpop.f32.mrb[12].mxu0  ;;  %v1633_v61 = vadd.f32 %v1189_v57, %v637_v58 }
 0x10f   :  { %v1190_v62 = vpop.f32.mrb[12].mxu1  ;;  %v1127_v63 = vpop.f32.mrb[13].mxu0 }
 0x110   :  { %v1128_v0 = vadd.f32 %v1127_v63, %v1126_v60  ;;  %v1191_v1 = vpop.f32.mrb[13].mxu1  ;;  %v1129_v2 = vpop.f32.mrb[14].mxu0 }
 0x111   :  { %v1192_v3 = vadd.f32 %v1191_v1, %v1190_v62  ;;  %v1193_v4 = vpop.f32.mrb[14].mxu1  ;;  %v1130_v5 = vpop.f32.mrb[15].mxu0 }
 0x112   :  { %v642_v6 = vadd.f32 %v1128_v0, %v1615_v14  ;;  %v1131_v7 = vadd.f32 %v1130_v5, %v1129_v2  ;;  %v1194_v8 = vpop.f32.mrb[15].mxu1 }
 0x113   :  { %v1195_v9 = vadd.f32 %v1194_v8, %v1193_v4 }
 0x114   :  { %v645_v10 = vadd.f32 %v1131_v7, %v1615_v14  ;;  %v1637_v11 = vadd.f32 %v1192_v3, %v642_v6 }
 0x116   :  { %v1132_v12 = vpop.f32.mrb[16].mxu0  ;;  %v1639_v13 = vadd.f32 %v1195_v9, %v645_v10 }
 0x117   :  { %v1196_v15 = vpop.f32.mrb[16].mxu1  ;;  %v1133_v16 = vpop.f32.mrb[17].mxu0 }
 0x118   :  { %v1134_v17 = vadd.f32 %v1133_v16, %v1132_v12  ;;  %v1197_v18 = vpop.f32.mrb[17].mxu1  ;;  %v1135_v19 = vpop.f32.mrb[18].mxu0 }
 0x119   :  { %v1198_v20 = vadd.f32 %v1197_v18, %v1196_v15  ;;  %v1199_v21 = vpop.f32.mrb[18].mxu1  ;;  %v1136_v22 = vpop.f32.mrb[19].mxu0 }
 0x11a   :  { %v650_v23 = vadd.f32 %v1134_v17, %v1615_v14  ;;  %v1137_v24 = vadd.f32 %v1136_v22, %v1135_v19  ;;  %v1200_v25 = vpop.f32.mrb[19].mxu1 }
 0x11b   :  { %v1201_v26 = vadd.f32 %v1200_v25, %v1199_v21 }
 0x11c   :  { %v653_v28 = vadd.f32 %v1137_v24, %v1615_v14  ;;  %v747_v30 = vadd.f32 %v1198_v20, %v650_v23 }
 0x11e   :  { %v1138_v31 = vpop.f32.mrb[20].mxu0  ;;  %v1643_v32 = vadd.f32 %v1201_v26, %v653_v28 }
 0x11f   :  { %v1202_v33 = vpop.f32.mrb[20].mxu1  ;;  %v1139_v34 = vpop.f32.mrb[21].mxu0 }
 0x120   :  { %v1140_v35 = vadd.f32 %v1139_v34, %v1138_v31  ;;  %v1203_v36 = vpop.f32.mrb[21].mxu1  ;;  %v1141_v37 = vpop.f32.mrb[22].mxu0 }
 0x121   :  { %v1204_v38 = vadd.f32 %v1203_v36, %v1202_v33  ;;  %v1205_v39 = vpop.f32.mrb[22].mxu1  ;;  %v1142_v40 = vpop.f32.mrb[23].mxu0 }
 0x122   :  { %v658_v41 = vadd.f32 %v1140_v35, %v1615_v14  ;;  %v1143_v42 = vadd.f32 %v1142_v40, %v1141_v37  ;;  %v1206_v44 = vpop.f32.mrb[23].mxu1 }
 0x123   :  { %v1207_v46 = vadd.f32 %v1206_v44, %v1205_v39 }
 0x124   :  { %v661_v47 = vadd.f32 %v1143_v42, %v1615_v14  ;;  %v755_v48 = vadd.f32 %v1204_v38, %v658_v41 }
 0x126   :  { %v1144_v49 = vpop.f32.mrb[24].mxu0  ;;  %v758_v50 = vadd.f32 %v1207_v46, %v661_v47 }
 0x127   :  { %v1208_v51 = vpop.f32.mrb[24].mxu1  ;;  %v1145_v52 = vpop.f32.mrb[25].mxu0 }
 0x128   :  { %v1146_v53 = vadd.f32 %v1145_v52, %v1144_v49  ;;  %v1209_v54 = vpop.f32.mrb[25].mxu1  ;;  %v1147_v55 = vpop.f32.mrb[26].mxu0 }
 0x129   :  { %v1210_v56 = vadd.f32 %v1209_v54, %v1208_v51  ;;  %v1211_v57 = vpop.f32.mrb[26].mxu1  ;;  %v1148_v58 = vpop.f32.mrb[27].mxu0 }
 0x12a   :  { %v666_v60 = vadd.f32 %v1146_v53, %v1615_v14  ;;  %v1149_v62 = vadd.f32 %v1148_v58, %v1147_v55  ;;  %v1212_v63 = vpop.f32.mrb[27].mxu1 }
 0x12b   :  { %v1213_v0 = vadd.f32 %v1212_v63, %v1211_v57 }
 0x12c   :  { %v669_v1 = vadd.f32 %v1149_v62, %v1615_v14  ;;  %v1649_v2 = vadd.f32 %v1210_v56, %v666_v60 }
 0x12e   :  { %v1150_v3 = vpop.f32.mrb[28].mxu0  ;;  %v1651_v4 = vadd.f32 %v1213_v0, %v669_v1 }
 0x12f   :  { %v1214_v5 = vpop.f32.mrb[28].mxu1  ;;  %v1151_v6 = vpop.f32.mrb[29].mxu0 }
 0x130   :  { %v1152_v7 = vadd.f32 %v1151_v6, %v1150_v3  ;;  %v1215_v8 = vpop.f32.mrb[29].mxu1  ;;  %v1153_v9 = vpop.f32.mrb[30].mxu0 }
 0x131   :  { %v1216_v10 = vadd.f32 %v1215_v8, %v1214_v5  ;;  %v1217_v12 = vpop.f32.mrb[30].mxu1  ;;  %v1154_v15 = vpop.f32.mrb[31].mxu0 }
 0x132   :  { %v674_v16 = vadd.f32 %v1152_v7, %v1615_v14  ;;  %v1155_v17 = vadd.f32 %v1154_v15, %v1153_v9  ;;  %v1218_v18 = vpop.f32.mrb[31].mxu1 }
 0x133   :  { %v1219_v19 = vadd.f32 %v1218_v18, %v1217_v12 }
 0x134   :  { %v677_v20 = vadd.f32 %v1155_v17, %v1615_v14  ;;  %v771_v21 = vadd.f32 %v1216_v10, %v674_v16 }
 0x136   :  { %v1242_v22 = vpop.f32.mrb[32].mxu0  ;;  %v774_v23 = vadd.f32 %v1219_v19, %v677_v20 }
 0x137   :  { %v820_v24 = vadd.f32 %v1242_v22, %v1625_v43  ;;  %v1250_v25 = vpop.f32.mrb[32].mxu1  ;;  %v811_v26 = vpop.f32.mrb[33].mxu0 }
 0x138   :  { %v852_v28 = vadd.f32 %v1250_v25, %v755_v48  ;;  %v812_v31 = vadd.f32 %v811_v26, %v1619_v27  ;;  %v843_v33 = vpop.f32.mrb[33].mxu1  ;;  %v1243_v34 = vpop.f32.mrb[34].mxu0 }
 0x139   :  { %v876_v35 = vmax.f32 %v820_v24, 0.0  ;;  %v844_v36 = vadd.f32 %v843_v33, %v747_v30  ;;  %v823_v37 = vadd.f32 %v1243_v34, %v1627_v45  ;;  %v1251_v38 = vpop.f32.mrb[34].mxu1  ;;  %v814_v39 = vpop.f32.mrb[35].mxu0 }
 0x13a   :  { %v884_v14 = vmax.f32 %v852_v28, 0.0  ;;  %v874_v40 = vmax.f32 %v812_v31, 0.0  ;;  %v855_v41 = vadd.f32 %v1251_v38, %v758_v50  ;;  %v815_v42 = vadd.f32 %v814_v39, %v1621_v29  ;;  %v846_v43 = vpop.f32.mrb[35].mxu1 }
 0x13b   :  { %v1078_v44 = vpack.c.bf16 %v876_v35, %v876_v35  ;;  %v882_v46 = vmax.f32 %v844_v36, 0.0  ;;  %v877_v47 = vmax.f32 %v823_v37, 0.0  ;;  %v847_v27 = vadd.f32 %v846_v43, %v1643_v32 }
 0x13c   :  { %v1086_v48 = vpack.c.bf16 %v884_v14, %v884_v14  ;;  %v1076_v49 = vpack.c.bf16 %v874_v40, %v874_v40  ;;  %v885_v51 = vmax.f32 %v855_v41, 0.0  ;;  %v875_v52 = vmax.f32 %v815_v42, 0.0 }
 0x13d   :  { %957 = vst.msk [vmem:[%s1733_s3 + $0x8] sm:$0xf] %vm954_vm1, %v1078_v44  ;;  %v1084_v45 = vpack.c.bf16 %v882_v46, %v882_v46  ;;  %v1079_v30 = vpack.c.bf16 %v877_v47, %v877_v47  ;;  %v883_v50 = vmax.f32 %v847_v27, 0.0 }
 0x13e   :  { %965 = vst.msk [vmem:[%s1733_s3 + $0x28] sm:$0xf] %vm954_vm1, %v1086_v48  ;;  %955 = vst.msk [vmem:[%s1733_s3] sm:$0xf] %vm954_vm1, %v1076_v49  ;;  %v1087_v29 = vpack.c.bf16 %v885_v51, %v885_v51  ;;  %v1077_v32 = vpack.c.bf16 %v875_v52, %v875_v52  ;;  %v1246_v53 = vpop.f32.mrb[36].mxu0 }
 0x13f   :  { %963 = vst.msk [vmem:[%s1733_s3 + $0x20] sm:$0xf] %vm954_vm1, %v1084_v45  ;;  %958 = vst.msk [vmem:[%s1733_s3 + $0xc] sm:$0xf] %vm954_vm1, %v1079_v30  ;;  %v1085_v54 = vpack.c.bf16 %v883_v50, %v883_v50  ;;  %v836_v55 = vadd.f32 %v1246_v53, %v1637_v11  ;;  %v1254_v56 = vpop.f32.mrb[36].mxu1  ;;  %v827_v57 = vpop.f32.mrb[37].mxu0 }
 0x140   :  { %966 = vst.msk [vmem:[%s1733_s3 + $0x2c] sm:$0xf] %vm954_vm1, %v1087_v29  ;;  %956 = vst.msk [vmem:[%s1733_s3 + $0x4] sm:$0xf] %vm954_vm1, %v1077_v32  ;;  %v868_v58 = vadd.f32 %v1254_v56, %v771_v21  ;;  %v828_v60 = vadd.f32 %v827_v57, %v1631_v59  ;;  %v859_v62 = vpop.f32.mrb[37].mxu1  ;;  %v1247_v63 = vpop.f32.mrb[38].mxu0 }
 0x141   :  { %964 = vst.msk [vmem:[%s1733_s3 + $0x24] sm:$0xf] %vm954_vm1, %v1085_v54  ;;  %v880_v11 = vmax.f32 %v836_v55, 0.0  ;;  %v860_v0 = vadd.f32 %v859_v62, %v1649_v2  ;;  %v839_v1 = vadd.f32 %v1247_v63, %v1639_v13  ;;  %v1255_v3 = vpop.f32.mrb[38].mxu1  ;;  %v830_v5 = vpop.f32.mrb[39].mxu0 }
 0x142   :  { %v888_v6 = vmax.f32 %v868_v58, 0.0  ;;  %v878_v7 = vmax.f32 %v828_v60, 0.0  ;;  %v871_v8 = vadd.f32 %v1255_v3, %v774_v23  ;;  %v831_v9 = vadd.f32 %v830_v5, %v1633_v61  ;;  %v862_v59 = vpop.f32.mrb[39].mxu1 }
 0x143   :  { %v1082_v10 = vpack.c.bf16 %v880_v11, %v880_v11  ;;  %v886_v12 = vmax.f32 %v860_v0, 0.0  ;;  %v881_v15 = vmax.f32 %v839_v1, 0.0  ;;  %v863_v16 = vadd.f32 %v862_v59, %v1651_v4 }
 0x144   :  { %v1090_v17 = vpack.c.bf16 %v888_v6, %v888_v6  ;;  %v1080_v18 = vpack.c.bf16 %v878_v7, %v878_v7  ;;  %v889_v19 = vmax.f32 %v871_v8, 0.0  ;;  %v879_v20 = vmax.f32 %v831_v9, 0.0 }
 0x145   :  { %961 = vst.msk [vmem:[%s1733_s3 + $0x18] sm:$0xf] %vm954_vm1, %v1082_v10  ;;  %v1088_v13 = vpack.c.bf16 %v886_v12, %v886_v12  ;;  %v1083_v2 = vpack.c.bf16 %v881_v15, %v881_v15  ;;  %v887_v21 = vmax.f32 %v863_v16, 0.0 }
 0x146   :  { %969 = vst.msk [vmem:[%s1733_s3 + $0x38] sm:$0xf] %vm954_vm1, %v1090_v17  ;;  %959 = vst.msk [vmem:[%s1733_s3 + $0x10] sm:$0xf] %vm954_vm1, %v1080_v18  ;;  %v1091_v61 = vpack.c.bf16 %v889_v19, %v889_v19  ;;  %v1081_v4 = vpack.c.bf16 %v879_v20, %v879_v20 }
 0x147   :  { %967 = vst.msk [vmem:[%s1733_s3 + $0x30] sm:$0xf] %vm954_vm1, %v1088_v13  ;;  %962 = vst.msk [vmem:[%s1733_s3 + $0x1c] sm:$0xf] %vm954_vm1, %v1083_v2  ;;  %v1089_v22 = vpack.c.bf16 %v887_v21, %v887_v21 }
 0x148   :  { %970 = vst.msk [vmem:[%s1733_s3 + $0x3c] sm:$0xf] %vm954_vm1, %v1091_v61  ;;  %960 = vst.msk [vmem:[%s1733_s3 + $0x14] sm:$0xf] %vm954_vm1, %v1081_v4 }
 0x149   :  { %968 = vst.msk [vmem:[%s1733_s3 + $0x34] sm:$0xf] %vm954_vm1, %v1089_v22 }

// kernel: cnn_forward.7
= control target key start
LH: loop header
LB: loop body
LE: loop exit
PB: predicated region body
PF: predicated region fallthrough
CT: control target
= control target key end

     0   :  { %v3824_v22 = vmov 1966171168   ;;  %v548_v24 = vlaneseq  ;;  %vm2948_vm0 = vcmask 1024   ;;  %s4677_s1 = inlined_call_operand.vmem [shape: bf16[4096,1], index: 1, kind: input, shape index: {}]   ;;  %s4678_s0 = inlined_call_operand.vmem [shape: bf16[2,4096], index: 0, kind: input, shape index: {}]   ;;  %s4679_s2 = inlined_call_operand.<no memory space> [shape: f32[1,1], index: 2, kind: input, shape index: {}]   ;;  %s4680_s3 = inlined_call_operand.vmem [shape: f32[2,1], index: 3, kind: output, shape index: {}]  }
   0x1   :  { %v3564_v0 = vld [vmem:[%s4677_s1 + $0x40] sm:$0xff]   ;;  %v3568_v4 = vld [vmem:[%s4677_s1 + $0x48] sm:$0xff]   ;;  %v3572_v8 = vld [vmem:[%s4677_s1 + $0x50] sm:$0xff]   ;;  %v546_v23 = vunpack.c.l.s4 %v3824_v22 }
   0x2   :  { %v3565_v1 = vld [vmem:[%s4677_s1 + $0xc0] sm:$0xff]   ;;  %3211 = vmatprep.subr.bf16.mxu0 %v3564_v0  ;;  %v3569_v5 = vld [vmem:[%s4677_s1 + $0xc8] sm:$0xff]   ;;  %v3573_v9 = vld [vmem:[%s4677_s1 + $0xd0] sm:$0xff]   ;;  %v549_v30 = vshrl.u32 %v548_v24, 7 }
   0x3   :  { %v3566_v2 = vld [vmem:[%s4677_s1] sm:$0xff]   ;;  %3233 = vmatprep.subr.bf16.mxu1 %v3565_v1  ;;  %v3570_v6 = vld [vmem:[%s4677_s1 + $0x8] sm:$0xff]   ;;  %v3574_v10 = vld [vmem:[%s4677_s1 + $0x10] sm:$0xff]   ;;  %v547_v29 = vunpack.c.0.s8 %v546_v23 }
   0x4   :  { %v3567_v3 = vld [vmem:[%s4677_s1 + $0x80] sm:$0xff]   ;;  %3212 = vmatpush3.bf16.msra.mxu0 %v3566_v2  ;;  %v3571_v7 = vld [vmem:[%s4677_s1 + $0x88] sm:$0xff]   ;;  %v3575_v11 = vld [vmem:[%s4677_s1 + $0x90] sm:$0xff]  }
   0x5   :  { %3234 = vmatpush3.bf16.msra.mxu1 %v3567_v3  ;;  %3213 = vmatprep.subr.bf16.mxu0 %v3568_v4  ;;  %v3576_v12 = vld [vmem:[%s4677_s1 + $0x58] sm:$0xff]   ;;  %v3580_v16 = vld [vmem:[%s4677_s1 + $0x60] sm:$0xff]   ;;  %v3584_v20 = vld [vmem:[%s4677_s1 + $0x68] sm:$0xff]   ;;  %v3935_v35 = vsub.s32 %v547_v29, %v549_v30 }
   0x6   :  { %3235 = vmatprep.subr.bf16.mxu1 %v3569_v5  ;;  %v3577_v13 = vld [vmem:[%s4677_s1 + $0xd8] sm:$0xff]   ;;  %v3581_v17 = vld [vmem:[%s4677_s1 + $0xe0] sm:$0xff]   ;;  %v3585_v21 = vld [vmem:[%s4677_s1 + $0xe8] sm:$0xff]  }
   0x7   :  { %v3578_v14 = vld [vmem:[%s4677_s1 + $0x18] sm:$0xff]   ;;  %v3582_v18 = vld [vmem:[%s4677_s1 + $0x20] sm:$0xff]   ;;  %v3586_v25 = vld [vmem:[%s4677_s1 + $0x28] sm:$0xff]  }
   0x8   :  { %3214 = vmatpush3.bf16.msra.mxu0 %v3570_v6  ;;  %v3579_v15 = vld [vmem:[%s4677_s1 + $0x98] sm:$0xff]   ;;  %v3583_v19 = vld [vmem:[%s4677_s1 + $0xa0] sm:$0xff]   ;;  %v3587_v26 = vld [vmem:[%s4677_s1 + $0xa8] sm:$0xff]  }
   0x9   :  { %3236 = vmatpush3.bf16.msra.mxu1 %v3571_v7  ;;  %3215 = vmatprep.subr.bf16.mxu0 %v3572_v8  ;;  %v3588_v27 = vld [vmem:[%s4677_s1 + $0x70] sm:$0xff]   ;;  %v3592_v33 = vld [vmem:[%s4677_s1 + $0x78] sm:$0xff]   ;;  %v17_v38 = vld [vmem:[%s4678_s0] sm:$0xff] }
   0xa   :  { %3237 = vmatprep.subr.bf16.mxu1 %v3573_v9  ;;  %v3589_v28 = vld [vmem:[%s4677_s1 + $0xf0] sm:$0xff]   ;;  %v3593_v34 = vld [vmem:[%s4677_s1 + $0xf8] sm:$0xff]   ;;  %v544_v39 = vcombine.high %v17_v38, %v17_v38  ;;  %v551_v40 = vrot.slane %v17_v38, %v3935_v35  ;;  %v3597_v41 = vld [vmem:[%s4677_s1 + $0x140] sm:$0xff]  }
   0xb   :  { %v3590_v31 = vld [vmem:[%s4677_s1 + $0x30] sm:$0xff]   ;;  %v3594_v36 = vld [vmem:[%s4677_s1 + $0x38] sm:$0xff]   ;;  %v3598_v42 = vld [vmem:[%s4677_s1 + $0x1c0] sm:$0xff]  }
   0xc   :  { %3216 = vmatpush3.bf16.msra.mxu0 %v3574_v10  ;;  %v3591_v32 = vld [vmem:[%s4677_s1 + $0xb0] sm:$0xff]   ;;  %v3595_v37 = vld [vmem:[%s4677_s1 + $0xb8] sm:$0xff]   ;;  %v559_v43 = vcombine.high %v551_v40, %v551_v40  ;;  %v567_v44 = vrot.slane %v551_v40, %v3935_v35  ;;  %v3955_v45 = vrot.slane %v544_v39, %v3935_v35  ;;  %v3599_v46 = vld [vmem:[%s4677_s1 + $0x100] sm:$0xff]  }
   0xd   :  { %3238 = vmatpush3.bf16.msra.mxu1 %v3575_v11  ;;  %3217 = vmatprep.subr.bf16.mxu0 %v3576_v12  ;;  %v3600_v48 = vld [vmem:[%s4677_s1 + $0x180] sm:$0xff]   ;;  %v3601_v51 = vld [vmem:[%s4677_s1 + $0x148] sm:$0xff]   ;;  %v3605_v58 = vld [vmem:[%s4677_s1 + $0x150] sm:$0xff]  }
   0xe   :  { %3239 = vmatprep.subr.bf16.mxu1 %v3577_v13  ;;  %v581_v47 = vrot.slane %v559_v43, %v3935_v35  ;;  %v560_v49 = vcombine.high %v3955_v45, %v3955_v45  ;;  %v589_v50 = vcombine.high %v567_v44, %v567_v44  ;;  %v3602_v53 = vld [vmem:[%s4677_s1 + $0x1c8] sm:$0xff]   ;;  %v3606_v59 = vld [vmem:[%s4677_s1 + $0x1d0] sm:$0xff]   ;;  %v3609_v62 = vld [vmem:[%s4677_s1 + $0x158] sm:$0xff]  }
   0xf   :  { %v3603_v55 = vld [vmem:[%s4677_s1 + $0x108] sm:$0xff]   ;;  %v3607_v60 = vld [vmem:[%s4677_s1 + $0x110] sm:$0xff]   ;;  %v3610_v63 = vld [vmem:[%s4677_s1 + $0x1d8] sm:$0xff]  }
  0x10   :  { %3218 = vmatpush3.bf16.msra.mxu0 %v3578_v14  ;;  %2340 = vmatprep.mubr.bf16.mxu0 %v581_v47  ;;  %v591_v52 = vcombine.high %v581_v47, %v581_v47  ;;  %v588_v54 = vrot.slane %v560_v49, %v3935_v35  ;;  %v3604_v56 = vld [vmem:[%s4677_s1 + $0x188] sm:$0xff]   ;;  %v3608_v61 = vld [vmem:[%s4677_s1 + $0x190] sm:$0xff]   ;;  %v3611_v0 = vld [vmem:[%s4677_s1 + $0x118] sm:$0xff]  }
  0x11   :  { %3240 = vmatpush3.bf16.msra.mxu1 %v3579_v15  ;;  %3219 = vmatprep.subr.bf16.mxu0 %v3580_v16  ;;  %v3612_v1 = vld [vmem:[%s4677_s1 + $0x198] sm:$0xff]   ;;  %v3613_v2 = vld [vmem:[%s4677_s1 + $0x160] sm:$0xff]   ;;  %v3617_v6 = vld [vmem:[%s4677_s1 + $0x168] sm:$0xff]  }
  0x12   :  { %3241 = vmatprep.subr.bf16.mxu1 %v3581_v17  ;;  %2380 = vmatprep.mubr.bf16.mxu1 %v591_v52  ;;  %v592_v57 = vcombine.high %v588_v54, %v588_v54  ;;  %v3614_v3 = vld [vmem:[%s4677_s1 + $0x1e0] sm:$0xff]   ;;  %v3618_v7 = vld [vmem:[%s4677_s1 + $0x1e8] sm:$0xff]   ;;  %v3621_v10 = vld [vmem:[%s4677_s1 + $0x170] sm:$0xff]  }
  0x13   :  { %v3615_v4 = vld [vmem:[%s4677_s1 + $0x120] sm:$0xff]   ;;  %v3619_v8 = vld [vmem:[%s4677_s1 + $0x128] sm:$0xff]   ;;  %v3622_v11 = vld [vmem:[%s4677_s1 + $0x1f0] sm:$0xff]  }
  0x14   :  { %3220 = vmatpush3.bf16.msra.mxu0 %v3582_v18  ;;  %v3616_v5 = vld [vmem:[%s4677_s1 + $0x1a0] sm:$0xff]   ;;  %v3620_v9 = vld [vmem:[%s4677_s1 + $0x1a8] sm:$0xff]   ;;  %v3623_v12 = vld [vmem:[%s4677_s1 + $0x130] sm:$0xff]   ;;  %v574_v18 = vrot.slane %v3955_v45, %v3935_v35 }
  0x15   :  { %3242 = vmatpush3.bf16.msra.mxu1 %v3583_v19  ;;  %3221 = vmatprep.subr.bf16.mxu0 %v3584_v20  ;;  %v3624_v13 = vld [vmem:[%s4677_s1 + $0x1b0] sm:$0xff]   ;;  %v3625_v14 = vld [vmem:[%s4677_s1 + $0x178] sm:$0xff]   ;;  %v3629_v19 = vld [vmem:[%s4677_s1 + $0x240] sm:$0xff]  }
  0x16   :  { %3243 = vmatprep.subr.bf16.mxu1 %v3585_v21  ;;  %v3626_v15 = vld [vmem:[%s4677_s1 + $0x1f8] sm:$0xff]   ;;  %v3630_v20 = vld [vmem:[%s4677_s1 + $0x2c0] sm:$0xff]   ;;  %v590_v23 = vcombine.high %v574_v18, %v574_v18  ;;  %v3633_v24 = vld [vmem:[%s4677_s1 + $0x248] sm:$0xff]  }
  0x17   :  { %v3627_v16 = vld [vmem:[%s4677_s1 + $0x138] sm:$0xff]   ;;  %v3631_v21 = vld [vmem:[%s4677_s1 + $0x200] sm:$0xff]   ;;  %v3638_v29 = vld [vmem:[%s4677_s1 + $0x2d0] sm:$0xff]  }
  0x18   :  { %3222 = vmatpush3.bf16.msra.mxu0 %v3586_v25  ;;  %v3628_v17 = vld [vmem:[%s4677_s1 + $0x1b8] sm:$0xff]   ;;  %v3632_v22 = vld [vmem:[%s4677_s1 + $0x280] sm:$0xff]   ;;  %v3634_v25 = vld [vmem:[%s4677_s1 + $0x2c8] sm:$0xff]  }
  0x19   :  { %3244 = vmatpush3.bf16.msra.mxu1 %v3587_v26  ;;  %3223 = vmatprep.subr.bf16.mxu0 %v3588_v27  ;;  %v3635_v26 = vld [vmem:[%s4677_s1 + $0x208] sm:$0xff]   ;;  %v3639_v30 = vld [vmem:[%s4677_s1 + $0x210] sm:$0xff]   ;;  %v3646_v38 = vld [vmem:[%s4677_s1 + $0x2e0] sm:$0xff]  }
  0x1a   :  { %3245 = vmatprep.subr.bf16.mxu1 %v3589_v28  ;;  %v3636_v27 = vld [vmem:[%s4677_s1 + $0x288] sm:$0xff]   ;;  %v3637_v28 = vld [vmem:[%s4677_s1 + $0x250] sm:$0xff]   ;;  %v3647_v39 = vld [vmem:[%s4677_s1 + $0x220] sm:$0xff]  }
  0x1b   :  { %v3648_v40 = vld [vmem:[%s4677_s1 + $0x2a0] sm:$0xff]   ;;  %v3651_v43 = vld [vmem:[%s4677_s1 + $0x228] sm:$0xff]   ;;  %v3653_v45 = vld [vmem:[%s4677_s1 + $0x270] sm:$0xff]  }
  0x1c   :  { %3224 = vmatpush3.bf16.msra.mxu0 %v3590_v31  ;;  %v3640_v31 = vld [vmem:[%s4677_s1 + $0x290] sm:$0xff]   ;;  %v3657_v49 = vld [vmem:[%s4677_s1 + $0x278] sm:$0xff]   ;;  %v18_v52 = vld [vmem:[%s4678_s0 + $0x8] sm:$0xff] }
  0x1d   :  { %3246 = vmatpush3.bf16.msra.mxu1 %v3591_v32  ;;  %3225 = vmatprep.subr.bf16.mxu0 %v3592_v33  ;;  %v3641_v32 = vld [vmem:[%s4677_s1 + $0x258] sm:$0xff]   ;;  %v3655_v47 = vld [vmem:[%s4677_s1 + $0x230] sm:$0xff]  }
  0x1e   :  { %3247 = vmatprep.subr.bf16.mxu1 %v3593_v34  ;;  %v3642_v33 = vld [vmem:[%s4677_s1 + $0x2d8] sm:$0xff]  }
  0x1f   :  { %v3643_v34 = vld [vmem:[%s4677_s1 + $0x218] sm:$0xff]  }
  0x20   :  { %3226 = vmatpush3.bf16.msra.mxu0 %v3594_v36  ;;  %v3644_v36 = vld [vmem:[%s4677_s1 + $0x298] sm:$0xff]  }
  0x21   :  { %3248 = vmatpush3.bf16.msra.mxu1 %v3595_v37  ;;  %3255 = vmatprep.subr.bf16.mxu0 %v3597_v41  ;;  %v3645_v37 = vld [vmem:[%s4677_s1 + $0x260] sm:$0xff]   ;;  %v3649_v41 = vld [vmem:[%s4677_s1 + $0x268] sm:$0xff]  }
  0x22   :  { %3277 = vmatprep.subr.bf16.mxu1 %v3598_v42  ;;  %v3650_v42 = vld [vmem:[%s4677_s1 + $0x2e8] sm:$0xff]  }
  0x23   :  { %2341 = vmatmul.mubr.bf16.vlgmr.msra.gmra.mrb[0].mxu0 %v567_v44  ;;  %v3652_v44 = vld [vmem:[%s4677_s1 + $0x2a8] sm:$0xff]  }
  0x24   :  { %3256 = vmatpush3.bf16.msra.mxu0 %v3599_v46  ;;  %2381 = vmatmul.mubr.bf16.vlgmr.msra.gmra.mrb[0].mxu1 %v589_v50  ;;  %v3654_v46 = vld [vmem:[%s4677_s1 + $0x2f0] sm:$0xff]   ;;  %v3658_v50 = vld [vmem:[%s4677_s1 + $0x2f8] sm:$0xff]  }
  0x25   :  { %3257 = vmatprep.subr.bf16.mxu0 %v3601_v51  ;;  %3278 = vmatpush3.bf16.msra.mxu1 %v3600_v48  ;;  %v3656_v48 = vld [vmem:[%s4677_s1 + $0x2b0] sm:$0xff]   ;;  %v3659_v51 = vld [vmem:[%s4677_s1 + $0x238] sm:$0xff]  }
  0x26   :  { %2420 = vmatprep.mubr.bf16.mxu0 %v588_v54  ;;  %3279 = vmatprep.subr.bf16.mxu1 %v3602_v53  ;;  %v3660_v53 = vld [vmem:[%s4677_s1 + $0x2b8] sm:$0xff]   ;;  %v600_v54 = vrot.slane %v18_v52, %v3935_v35 }
  0x27   :  { %2460 = vmatprep.mubr.bf16.mxu1 %v592_v57 }
  0x28   :  { %3258 = vmatpush3.bf16.msra.mxu0 %v3603_v55  ;;  %v593_v55 = vcombine.high %v18_v52, %v18_v52  ;;  %v608_v57 = vcombine.high %v600_v54, %v600_v54  ;;  %v3709_v52 = vld [vmem:[%s4677_s1 + $0x498] sm:$0xff]  }
  0x29   :  { %3259 = vmatprep.subr.bf16.mxu0 %v3605_v58  ;;  %3280 = vmatpush3.bf16.msra.mxu1 %v3604_v56  ;;  %v3661_v56 = vld [vmem:[%s4677_s1 + $0x340] sm:$0xff]   ;;  %v616_v58 = vrot.slane %v600_v54, %v3935_v35 }
  0x2a   :  { %3281 = vmatprep.subr.bf16.mxu1 %v3606_v59  ;;  %v3662_v59 = vld [vmem:[%s4677_s1 + $0x3c0] sm:$0xff]  }
  0x2b   :  { %v3711_v54 = vld [vmem:[%s4677_s1 + $0x4e0] sm:$0xff]  }
  0x2c   :  { %3260 = vmatpush3.bf16.msra.mxu0 %v3607_v60  ;;  %v4161_v60 = vrot.slane %v593_v55, %v3935_v35  ;;  %v3712_v55 = vld [vmem:[%s4677_s1 + $0x420] sm:$0xff]  }
  0x2d   :  { %3261 = vmatprep.subr.bf16.mxu0 %v3609_v62  ;;  %3282 = vmatpush3.bf16.msra.mxu1 %v3608_v61  ;;  %v3663_v61 = vld [vmem:[%s4677_s1 + $0x300] sm:$0xff]   ;;  %v630_v62 = vrot.slane %v608_v57, %v3935_v35  ;;  %v3714_v57 = vld [vmem:[%s4677_s1 + $0x468] sm:$0xff]  }
  0x2e   :  { %3283 = vmatprep.subr.bf16.mxu1 %v3610_v63  ;;  %v3664_v63 = vld [vmem:[%s4677_s1 + $0x380] sm:$0xff]  }
  0x30   :  { %3262 = vmatpush3.bf16.msra.mxu0 %v3611_v0  ;;  %v609_v0 = vcombine.high %v4161_v60, %v4161_v60 }
  0x31   :  { %3263 = vmatprep.subr.bf16.mxu0 %v3613_v2  ;;  %3284 = vmatpush3.bf16.msra.mxu1 %v3612_v1  ;;  %v638_v1 = vcombine.high %v616_v58, %v616_v58  ;;  %v3665_v2 = vld [vmem:[%s4677_s1 + $0x348] sm:$0xff]  }
  0x32   :  { %3285 = vmatprep.subr.bf16.mxu1 %v3614_v3  ;;  %v640_v3 = vcombine.high %v630_v62, %v630_v62 }
  0x34   :  { %3264 = vmatpush3.bf16.msra.mxu0 %v3615_v4  ;;  %v3666_v4 = vld [vmem:[%s4677_s1 + $0x3c8] sm:$0xff]  }
  0x35   :  { %3265 = vmatprep.subr.bf16.mxu0 %v3617_v6  ;;  %3286 = vmatpush3.bf16.msra.mxu1 %v3616_v5  ;;  %v637_v5 = vrot.slane %v609_v0, %v3935_v35  ;;  %v3667_v6 = vld [vmem:[%s4677_s1 + $0x308] sm:$0xff]   ;;  %v3721_v0 = vld [vmem:[%s4677_s1 + $0x4b0] sm:$0xff]  }
  0x36   :  { %3287 = vmatprep.subr.bf16.mxu1 %v3618_v7  ;;  %v3668_v7 = vld [vmem:[%s4677_s1 + $0x388] sm:$0xff]  }
  0x38   :  { %3266 = vmatpush3.bf16.msra.mxu0 %v3619_v8  ;;  %v641_v8 = vcombine.high %v637_v5, %v637_v5 }
  0x39   :  { %3267 = vmatprep.subr.bf16.mxu0 %v3621_v10  ;;  %3288 = vmatpush3.bf16.msra.mxu1 %v3620_v9  ;;  %v3669_v9 = vld [vmem:[%s4677_s1 + $0x350] sm:$0xff]  }
  0x3a   :  { %3289 = vmatprep.subr.bf16.mxu1 %v3622_v11  ;;  %v3670_v10 = vld [vmem:[%s4677_s1 + $0x3d0] sm:$0xff]  }
  0x3b   :  { %v3671_v11 = vld [vmem:[%s4677_s1 + $0x310] sm:$0xff]  }
  0x3c   :  { %3268 = vmatpush3.bf16.msra.mxu0 %v3623_v12  ;;  %v3672_v12 = vld [vmem:[%s4677_s1 + $0x390] sm:$0xff]  }
  0x3d   :  { %3269 = vmatprep.subr.bf16.mxu0 %v3625_v14  ;;  %3290 = vmatpush3.bf16.msra.mxu1 %v3624_v13  ;;  %v3673_v13 = vld [vmem:[%s4677_s1 + $0x358] sm:$0xff]  }
  0x3e   :  { %3291 = vmatprep.subr.bf16.mxu1 %v3626_v15  ;;  %v3674_v14 = vld [vmem:[%s4677_s1 + $0x3d8] sm:$0xff]  }
  0x3f   :  { %v3675_v15 = vld [vmem:[%s4677_s1 + $0x318] sm:$0xff]  }
  0x40   :  { %3270 = vmatpush3.bf16.msra.mxu0 %v3627_v16  ;;  %v3676_v16 = vld [vmem:[%s4677_s1 + $0x398] sm:$0xff]  }
  0x41   :  { %3299 = vmatprep.subr.bf16.mxu0 %v3629_v19  ;;  %3292 = vmatpush3.bf16.msra.mxu1 %v3628_v17  ;;  %v3677_v17 = vld [vmem:[%s4677_s1 + $0x360] sm:$0xff]  }
  0x42   :  { %3321 = vmatprep.subr.bf16.mxu1 %v3630_v20  ;;  %v3679_v19 = vld [vmem:[%s4677_s1 + $0x320] sm:$0xff]  }
  0x43   :  { %2421 = vmatmul.mubr.bf16.vlgmr.msra.gmra.mrb[4].mxu0 %v574_v18  ;;  %v3678_v18 = vld [vmem:[%s4677_s1 + $0x3e0] sm:$0xff]  }
  0x44   :  { %3300 = vmatpush3.bf16.msra.mxu0 %v3631_v21  ;;  %2461 = vmatmul.mubr.bf16.vlgmr.msra.gmra.mrb[4].mxu1 %v590_v23  ;;  %v3680_v20 = vld [vmem:[%s4677_s1 + $0x3a0] sm:$0xff]   ;;  %v3681_v21 = vld [vmem:[%s4677_s1 + $0x368] sm:$0xff]  }
  0x45   :  { %3301 = vmatprep.subr.bf16.mxu0 %v3633_v24  ;;  %3322 = vmatpush3.bf16.msra.mxu1 %v3632_v22  ;;  %v3682_v22 = vld [vmem:[%s4677_s1 + $0x3e8] sm:$0xff]  }
  0x46   :  { %3323 = vmatprep.subr.bf16.mxu1 %v3634_v25  ;;  %2500 = vmatprep.mubr.bf16.mxu0 %v630_v62  ;;  %v3683_v23 = vld [vmem:[%s4677_s1 + $0x328] sm:$0xff]   ;;  %v8_v25 = vstv %s4679_s2  ;;  %v3719_v62 = vld [vmem:[%s4677_s1 + $0x4f0] sm:$0xff]  }
  0x47   :  { %2540 = vmatprep.mubr.bf16.mxu1 %v640_v3  ;;  %v3684_v24 = vld [vmem:[%s4677_s1 + $0x3a8] sm:$0xff]   ;;  %9 = vst [vmem:[#allocation2] sm:$0x1] %v8_v25  ;;  %v3724_v3 = vld [vmem:[%s4677_s1 + $0x438] sm:$0xff]   ;;  %v3734_v25 = vld [vmem:[%s4677_s1 + $0x550] sm:$0xff]  }
  0x48   :  { %3302 = vmatpush3.bf16.msra.mxu0 %v3635_v26  ;;  %v3685_v26 = vld [vmem:[%s4677_s1 + $0x370] sm:$0xff]  }
  0x49   :  { %3303 = vmatprep.subr.bf16.mxu0 %v3637_v28  ;;  %3324 = vmatpush3.bf16.msra.mxu1 %v3636_v27  ;;  %v3686_v27 = vld [vmem:[%s4677_s1 + $0x3f0] sm:$0xff]  }
  0x4a   :  { %3325 = vmatprep.subr.bf16.mxu1 %v3638_v29  ;;  %v3687_v28 = vld [vmem:[%s4677_s1 + $0x330] sm:$0xff]  }
  0x4b   :  { %v3688_v29 = vld [vmem:[%s4677_s1 + $0x3b0] sm:$0xff]  }
  0x4c   :  { %3304 = vmatpush3.bf16.msra.mxu0 %v3639_v30  ;;  %v3689_v30 = vld [vmem:[%s4677_s1 + $0x378] sm:$0xff]  }
  0x4d   :  { %3305 = vmatprep.subr.bf16.mxu0 %v3641_v32  ;;  %3326 = vmatpush3.bf16.msra.mxu1 %v3640_v31  ;;  %v3690_v31 = vld [vmem:[%s4677_s1 + $0x3f8] sm:$0xff]  }
  0x4e   :  { %3327 = vmatprep.subr.bf16.mxu1 %v3642_v33  ;;  %v3691_v32 = vld [vmem:[%s4677_s1 + $0x338] sm:$0xff]  }
  0x4f   :  { %v3692_v33 = vld [vmem:[%s4677_s1 + $0x3b8] sm:$0xff]  }
  0x50   :  { %3306 = vmatpush3.bf16.msra.mxu0 %v3643_v34  ;;  %v623_v34 = vrot.slane %v4161_v60, %v3935_v35  ;;  %v3717_v60 = vld [vmem:[%s4677_s1 + $0x4a8] sm:$0xff]  }
  0x51   :  { %3307 = vmatprep.subr.bf16.mxu0 %v3645_v37  ;;  %3328 = vmatpush3.bf16.msra.mxu1 %v3644_v36  ;;  %v3694_v36 = vld [vmem:[%s4677_s1 + $0x440] sm:$0xff]  }
  0x52   :  { %3329 = vmatprep.subr.bf16.mxu1 %v3646_v38  ;;  %v3695_v37 = vld [vmem:[%s4677_s1 + $0x4c0] sm:$0xff]  }
  0x53   :  { %v3696_v38 = vld [vmem:[%s4677_s1 + $0x400] sm:$0xff]  }
  0x54   :  { %3308 = vmatpush3.bf16.msra.mxu0 %v3647_v39  ;;  %v3697_v39 = vld [vmem:[%s4677_s1 + $0x480] sm:$0xff]  }
  0x55   :  { %3309 = vmatprep.subr.bf16.mxu0 %v3649_v41  ;;  %3330 = vmatpush3.bf16.msra.mxu1 %v3648_v40  ;;  %v639_v40 = vcombine.high %v623_v34, %v623_v34  ;;  %v3698_v41 = vld [vmem:[%s4677_s1 + $0x448] sm:$0xff]  }
  0x56   :  { %3331 = vmatprep.subr.bf16.mxu1 %v3650_v42  ;;  %v3699_v42 = vld [vmem:[%s4677_s1 + $0x4c8] sm:$0xff]  }
  0x58   :  { %3310 = vmatpush3.bf16.msra.mxu0 %v3651_v43  ;;  %v3700_v43 = vld [vmem:[%s4677_s1 + $0x408] sm:$0xff]  }
  0x59   :  { %3311 = vmatprep.subr.bf16.mxu0 %v3653_v45  ;;  %3332 = vmatpush3.bf16.msra.mxu1 %v3652_v44  ;;  %v3701_v44 = vld [vmem:[%s4677_s1 + $0x488] sm:$0xff]   ;;  %v3702_v45 = vld [vmem:[%s4677_s1 + $0x450] sm:$0xff]  }
  0x5a   :  { %3333 = vmatprep.subr.bf16.mxu1 %v3654_v46  ;;  %v3703_v46 = vld [vmem:[%s4677_s1 + $0x4d0] sm:$0xff]  }
  0x5c   :  { %3312 = vmatpush3.bf16.msra.mxu0 %v3655_v47  ;;  %v3704_v47 = vld [vmem:[%s4677_s1 + $0x410] sm:$0xff]  }
  0x5d   :  { %3313 = vmatprep.subr.bf16.mxu0 %v3657_v49  ;;  %3334 = vmatpush3.bf16.msra.mxu1 %v3656_v48  ;;  %v3705_v48 = vld [vmem:[%s4677_s1 + $0x490] sm:$0xff]   ;;  %v3706_v49 = vld [vmem:[%s4677_s1 + $0x458] sm:$0xff]  }
  0x5e   :  { %3335 = vmatprep.subr.bf16.mxu1 %v3658_v50  ;;  %v3707_v50 = vld [vmem:[%s4677_s1 + $0x4d8] sm:$0xff]  }
  0x60   :  { %3314 = vmatpush3.bf16.msra.mxu0 %v3659_v51  ;;  %v3708_v51 = vld [vmem:[%s4677_s1 + $0x418] sm:$0xff]  }
  0x61   :  { %3343 = vmatprep.subr.bf16.mxu0 %v3661_v56  ;;  %3336 = vmatpush3.bf16.msra.mxu1 %v3660_v53  ;;  %v3710_v53 = vld [vmem:[%s4677_s1 + $0x460] sm:$0xff]  }
  0x62   :  { %3365 = vmatprep.subr.bf16.mxu1 %v3662_v59  ;;  %v3713_v56 = vld [vmem:[%s4677_s1 + $0x4a0] sm:$0xff]   ;;  %v3716_v59 = vld [vmem:[%s4677_s1 + $0x428] sm:$0xff]  }
  0x63   :  { %2501 = vmatmul.mubr.bf16.vlgmr.msra.gmra.mrb[8].mxu0 %v616_v58  ;;  %v3715_v58 = vld [vmem:[%s4677_s1 + $0x4e8] sm:$0xff]  }
  0x64   :  { %3344 = vmatpush3.bf16.msra.mxu0 %v3663_v61  ;;  %2541 = vmatmul.mubr.bf16.vlgmr.msra.gmra.mrb[8].mxu1 %v638_v1  ;;  %v3718_v61 = vld [vmem:[%s4677_s1 + $0x470] sm:$0xff]   ;;  %v3722_v1 = vld [vmem:[%s4677_s1 + $0x478] sm:$0xff]  }
  0x65   :  { %3345 = vmatprep.subr.bf16.mxu0 %v3665_v2  ;;  %3366 = vmatpush3.bf16.msra.mxu1 %v3664_v63  ;;  %v3720_v63 = vld [vmem:[%s4677_s1 + $0x430] sm:$0xff]   ;;  %v3723_v2 = vld [vmem:[%s4677_s1 + $0x4f8] sm:$0xff]  }
  0x66   :  { %2580 = vmatprep.mubr.bf16.mxu0 %v637_v5  ;;  %3367 = vmatprep.subr.bf16.mxu1 %v3666_v4  ;;  %v19_v4 = vld [vmem:[%s4678_s0 + $0x10] sm:$0xff]  ;;  %v3725_v5 = vld [vmem:[%s4677_s1 + $0x4b8] sm:$0xff]  }
  0x67   :  { %2620 = vmatprep.mubr.bf16.mxu1 %v641_v8  ;;  %v3726_v8 = vld [vmem:[%s4677_s1 + $0x540] sm:$0xff]  }
  0x68   :  { %3346 = vmatpush3.bf16.msra.mxu0 %v3667_v6  ;;  %v649_v6 = vrot.slane %v19_v4, %v3935_v35 }
  0x69   :  { %3347 = vmatprep.subr.bf16.mxu0 %v3669_v9  ;;  %3368 = vmatpush3.bf16.msra.mxu1 %v3668_v7  ;;  %v642_v7 = vcombine.high %v19_v4, %v19_v4  ;;  %v3775_v4 = vld [vmem:[%s4677_s1 + $0x660] sm:$0xff]  }
  0x6a   :  { %3369 = vmatprep.subr.bf16.mxu1 %v3670_v10  ;;  %v657_v9 = vcombine.high %v649_v6, %v649_v6  ;;  %v665_v10 = vrot.slane %v649_v6, %v3935_v35  ;;  %v3777_v6 = vld [vmem:[%s4677_s1 + $0x620] sm:$0xff]  }
  0x6c   :  { %3348 = vmatpush3.bf16.msra.mxu0 %v3671_v11  ;;  %v3727_v11 = vld [vmem:[%s4677_s1 + $0x5c0] sm:$0xff]  }
  0x6d   :  { %3349 = vmatprep.subr.bf16.mxu0 %v3673_v13  ;;  %3370 = vmatpush3.bf16.msra.mxu1 %v3672_v12  ;;  %v4370_v12 = vrot.slane %v642_v7, %v3935_v35  ;;  %v3728_v13 = vld [vmem:[%s4677_s1 + $0x500] sm:$0xff]  }
  0x6e   :  { %3371 = vmatprep.subr.bf16.mxu1 %v3674_v14  ;;  %v679_v14 = vrot.slane %v657_v9, %v3935_v35  ;;  %v3778_v7 = vld [vmem:[%s4677_s1 + $0x6a0] sm:$0xff]   ;;  %v3780_v9 = vld [vmem:[%s4677_s1 + $0x6e8] sm:$0xff]  }
  0x70   :  { %3350 = vmatpush3.bf16.msra.mxu0 %v3675_v15  ;;  %v3729_v15 = vld [vmem:[%s4677_s1 + $0x580] sm:$0xff]  }
  0x71   :  { %3351 = vmatprep.subr.bf16.mxu0 %v3677_v17  ;;  %3372 = vmatpush3.bf16.msra.mxu1 %v3676_v16  ;;  %v658_v16 = vcombine.high %v4370_v12, %v4370_v12  ;;  %v687_v17 = vcombine.high %v665_v10, %v665_v10 }
  0x72   :  { %3373 = vmatprep.subr.bf16.mxu1 %v3678_v18  ;;  %v3730_v18 = vld [vmem:[%s4677_s1 + $0x548] sm:$0xff]  }
  0x74   :  { %3352 = vmatpush3.bf16.msra.mxu0 %v3679_v19  ;;  %v689_v19 = vcombine.high %v679_v14, %v679_v14 }
  0x75   :  { %3353 = vmatprep.subr.bf16.mxu0 %v3681_v21  ;;  %3374 = vmatpush3.bf16.msra.mxu1 %v3680_v20  ;;  %v3731_v20 = vld [vmem:[%s4677_s1 + $0x5c8] sm:$0xff]   ;;  %v686_v21 = vrot.slane %v658_v16, %v3935_v35  ;;  %v3787_v16 = vld [vmem:[%s4677_s1 + $0x678] sm:$0xff]  }
  0x76   :  { %3375 = vmatprep.subr.bf16.mxu1 %v3682_v22  ;;  %v3732_v22 = vld [vmem:[%s4677_s1 + $0x508] sm:$0xff]  }
  0x78   :  { %3354 = vmatpush3.bf16.msra.mxu0 %v3683_v23  ;;  %v3733_v23 = vld [vmem:[%s4677_s1 + $0x588] sm:$0xff]  }
  0x79   :  { %3355 = vmatprep.subr.bf16.mxu0 %v3685_v26  ;;  %3376 = vmatpush3.bf16.msra.mxu1 %v3684_v24  ;;  %v690_v24 = vcombine.high %v686_v21, %v686_v21  ;;  %v3735_v26 = vld [vmem:[%s4677_s1 + $0x5d0] sm:$0xff]  }
  0x7a   :  { %3377 = vmatprep.subr.bf16.mxu1 %v3686_v27  ;;  %v3736_v27 = vld [vmem:[%s4677_s1 + $0x510] sm:$0xff]  }
  0x7c   :  { %3356 = vmatpush3.bf16.msra.mxu0 %v3687_v28  ;;  %v3737_v28 = vld [vmem:[%s4677_s1 + $0x590] sm:$0xff]  }
  0x7d   :  { %3357 = vmatprep.subr.bf16.mxu0 %v3689_v30  ;;  %3378 = vmatpush3.bf16.msra.mxu1 %v3688_v29  ;;  %v3738_v29 = vld [vmem:[%s4677_s1 + $0x558] sm:$0xff]  }
  0x7e   :  { %3379 = vmatprep.subr.bf16.mxu1 %v3690_v31  ;;  %v3739_v30 = vld [vmem:[%s4677_s1 + $0x5d8] sm:$0xff]  }
  0x7f   :  { %v3740_v31 = vld [vmem:[%s4677_s1 + $0x518] sm:$0xff]  }
  0x80   :  { %3358 = vmatpush3.bf16.msra.mxu0 %v3691_v32  ;;  %v3741_v32 = vld [vmem:[%s4677_s1 + $0x598] sm:$0xff]  }
  0x81   :  { %3387 = vmatprep.subr.bf16.mxu0 %v3694_v36  ;;  %3380 = vmatpush3.bf16.msra.mxu1 %v3692_v33  ;;  %v3742_v33 = vld [vmem:[%s4677_s1 + $0x560] sm:$0xff]  }
  0x82   :  { %3409 = vmatprep.subr.bf16.mxu1 %v3695_v37  ;;  %v3744_v36 = vld [vmem:[%s4677_s1 + $0x520] sm:$0xff]  }
  0x83   :  { %2581 = vmatmul.mubr.bf16.vlgmr.msra.gmra.mrb[12].mxu0 %v623_v34  ;;  %v3743_v34 = vld [vmem:[%s4677_s1 + $0x5e0] sm:$0xff]  }
  0x84   :  { %3388 = vmatpush3.bf16.msra.mxu0 %v3696_v38  ;;  %2621 = vmatmul.mubr.bf16.vlgmr.msra.gmra.mrb[12].mxu1 %v639_v40  ;;  %v3745_v37 = vld [vmem:[%s4677_s1 + $0x5a0] sm:$0xff]   ;;  %v3746_v38 = vld [vmem:[%s4677_s1 + $0x568] sm:$0xff]  }
  0x85   :  { %3389 = vmatprep.subr.bf16.mxu0 %v3698_v41  ;;  %3410 = vmatpush3.bf16.msra.mxu1 %v3697_v39  ;;  %v3747_v39 = vld [vmem:[%s4677_s1 + $0x5e8] sm:$0xff]  }
  0x86   :  { %3411 = vmatprep.subr.bf16.mxu1 %v3699_v42  ;;  %2660 = vmatprep.mubr.bf16.mxu0 %v679_v14  ;;  %v3748_v40 = vld [vmem:[%s4677_s1 + $0x528] sm:$0xff]   ;;  %v3750_v42 = vld [vmem:[%s4677_s1 + $0x570] sm:$0xff]  }
  0x87   :  { %2700 = vmatprep.mubr.bf16.mxu1 %v689_v19  ;;  %v3749_v41 = vld [vmem:[%s4677_s1 + $0x5a8] sm:$0xff]   ;;  %v3785_v14 = vld [vmem:[%s4677_s1 + $0x630] sm:$0xff]   ;;  %v20_v19 = vld [vmem:[%s4678_s0 + $0x18] sm:$0xff] }
  0x88   :  { %3390 = vmatpush3.bf16.msra.mxu0 %v3700_v43  ;;  %v3751_v43 = vld [vmem:[%s4677_s1 + $0x5f0] sm:$0xff]  }
  0x89   :  { %3391 = vmatprep.subr.bf16.mxu0 %v3702_v45  ;;  %3412 = vmatpush3.bf16.msra.mxu1 %v3701_v44  ;;  %v3752_v44 = vld [vmem:[%s4677_s1 + $0x530] sm:$0xff]  }
  0x8a   :  { %3413 = vmatprep.subr.bf16.mxu1 %v3703_v46  ;;  %v3753_v45 = vld [vmem:[%s4677_s1 + $0x5b0] sm:$0xff]   ;;  %v3754_v46 = vld [vmem:[%s4677_s1 + $0x578] sm:$0xff]  }
  0x8c   :  { %3392 = vmatpush3.bf16.msra.mxu0 %v3704_v47  ;;  %v3755_v47 = vld [vmem:[%s4677_s1 + $0x5f8] sm:$0xff]  }
  0x8d   :  { %3393 = vmatprep.subr.bf16.mxu0 %v3706_v49  ;;  %3414 = vmatpush3.bf16.msra.mxu1 %v3705_v48  ;;  %v3756_v48 = vld [vmem:[%s4677_s1 + $0x538] sm:$0xff]  }
  0x8e   :  { %3415 = vmatprep.subr.bf16.mxu1 %v3707_v50  ;;  %v3757_v49 = vld [vmem:[%s4677_s1 + $0x5b8] sm:$0xff]   ;;  %v672_v50 = vrot.slane %v4370_v12, %v3935_v35  ;;  %v3783_v12 = vld [vmem:[%s4677_s1 + $0x670] sm:$0xff]  }
  0x90   :  { %3394 = vmatpush3.bf16.msra.mxu0 %v3708_v51  ;;  %v3759_v51 = vld [vmem:[%s4677_s1 + $0x640] sm:$0xff]  }
  0x91   :  { %3395 = vmatprep.subr.bf16.mxu0 %v3710_v53  ;;  %3416 = vmatpush3.bf16.msra.mxu1 %v3709_v52  ;;  %v3760_v52 = vld [vmem:[%s4677_s1 + $0x6c0] sm:$0xff]  }
  0x92   :  { %3417 = vmatprep.subr.bf16.mxu1 %v3711_v54  ;;  %v3761_v53 = vld [vmem:[%s4677_s1 + $0x600] sm:$0xff]  }
  0x93   :  { %v3762_v54 = vld [vmem:[%s4677_s1 + $0x680] sm:$0xff]  }
  0x94   :  { %3396 = vmatpush3.bf16.msra.mxu0 %v3712_v55  ;;  %v688_v55 = vcombine.high %v672_v50, %v672_v50 }
  0x95   :  { %3397 = vmatprep.subr.bf16.mxu0 %v3714_v57  ;;  %3418 = vmatpush3.bf16.msra.mxu1 %v3713_v56  ;;  %v3763_v56 = vld [vmem:[%s4677_s1 + $0x648] sm:$0xff]  }
  0x96   :  { %3419 = vmatprep.subr.bf16.mxu1 %v3715_v58  ;;  %v3764_v57 = vld [vmem:[%s4677_s1 + $0x6c8] sm:$0xff]  }
  0x97   :  { %v3765_v58 = vld [vmem:[%s4677_s1 + $0x608] sm:$0xff]  }
  0x98   :  { %3398 = vmatpush3.bf16.msra.mxu0 %v3716_v59  ;;  %v3766_v59 = vld [vmem:[%s4677_s1 + $0x688] sm:$0xff]  }
  0x99   :  { %3399 = vmatprep.subr.bf16.mxu0 %v3718_v61  ;;  %3420 = vmatpush3.bf16.msra.mxu1 %v3717_v60  ;;  %v3767_v60 = vld [vmem:[%s4677_s1 + $0x650] sm:$0xff]  }
  0x9a   :  { %3421 = vmatprep.subr.bf16.mxu1 %v3719_v62  ;;  %v3768_v61 = vld [vmem:[%s4677_s1 + $0x6d0] sm:$0xff]  }
  0x9b   :  { %v3769_v62 = vld [vmem:[%s4677_s1 + $0x610] sm:$0xff]  }
  0x9c   :  { %3400 = vmatpush3.bf16.msra.mxu0 %v3720_v63  ;;  %v3770_v63 = vld [vmem:[%s4677_s1 + $0x690] sm:$0xff]  }
  0x9d   :  { %3401 = vmatprep.subr.bf16.mxu0 %v3722_v1  ;;  %3422 = vmatpush3.bf16.msra.mxu1 %v3721_v0  ;;  %v3771_v0 = vld [vmem:[%s4677_s1 + $0x658] sm:$0xff]  }
  0x9e   :  { %3423 = vmatprep.subr.bf16.mxu1 %v3723_v2  ;;  %v3772_v1 = vld [vmem:[%s4677_s1 + $0x6d8] sm:$0xff]  }
  0x9f   :  { %v3773_v2 = vld [vmem:[%s4677_s1 + $0x618] sm:$0xff]  }
  0xa0   :  { %3402 = vmatpush3.bf16.msra.mxu0 %v3724_v3  ;;  %v3774_v3 = vld [vmem:[%s4677_s1 + $0x698] sm:$0xff]  }
  0xa1   :  { %3431 = vmatprep.subr.bf16.mxu0 %v3726_v8  ;;  %3424 = vmatpush3.bf16.msra.mxu1 %v3725_v5  ;;  %v3776_v5 = vld [vmem:[%s4677_s1 + $0x6e0] sm:$0xff]   ;;  %v3779_v8 = vld [vmem:[%s4677_s1 + $0x668] sm:$0xff]  }
  0xa2   :  { %3453 = vmatprep.subr.bf16.mxu1 %v3727_v11  ;;  %v3782_v11 = vld [vmem:[%s4677_s1 + $0x6a8] sm:$0xff]  }
  0xa3   :  { %2661 = vmatmul.mubr.bf16.vlgmr.msra.gmra.mrb[16].mxu0 %v665_v10  ;;  %v3781_v10 = vld [vmem:[%s4677_s1 + $0x628] sm:$0xff]  }
  0xa4   :  { %3432 = vmatpush3.bf16.msra.mxu0 %v3728_v13  ;;  %2701 = vmatmul.mubr.bf16.vlgmr.msra.gmra.mrb[16].mxu1 %v687_v17  ;;  %v3784_v13 = vld [vmem:[%s4677_s1 + $0x6f0] sm:$0xff]   ;;  %v3788_v17 = vld [vmem:[%s4677_s1 + $0x6f8] sm:$0xff]  }
  0xa5   :  { %3433 = vmatprep.subr.bf16.mxu0 %v3730_v18  ;;  %3454 = vmatpush3.bf16.msra.mxu1 %v3729_v15  ;;  %v3786_v15 = vld [vmem:[%s4677_s1 + $0x6b0] sm:$0xff]   ;;  %v3789_v18 = vld [vmem:[%s4677_s1 + $0x638] sm:$0xff]  }
  0xa6   :  { %2740 = vmatprep.mubr.bf16.mxu0 %v686_v21  ;;  %3455 = vmatprep.subr.bf16.mxu1 %v3731_v20  ;;  %v698_v20 = vrot.slane %v20_v19, %v3935_v35  ;;  %v3791_v21 = vld [vmem:[%s4677_s1 + $0x740] sm:$0xff]  }
  0xa7   :  { %2780 = vmatprep.mubr.bf16.mxu1 %v690_v24 }
  0xa8   :  { %3434 = vmatpush3.bf16.msra.mxu0 %v3732_v22  ;;  %v691_v22 = vcombine.high %v20_v19, %v20_v19  ;;  %v706_v24 = vcombine.high %v698_v20, %v698_v20 }
  0xa9   :  { %3435 = vmatprep.subr.bf16.mxu0 %v3734_v25  ;;  %3456 = vmatpush3.bf16.msra.mxu1 %v3733_v23  ;;  %v3790_v23 = vld [vmem:[%s4677_s1 + $0x6b8] sm:$0xff]   ;;  %v714_v25 = vrot.slane %v698_v20, %v3935_v35 }
  0xaa   :  { %3457 = vmatprep.subr.bf16.mxu1 %v3735_v26  ;;  %v3792_v26 = vld [vmem:[%s4677_s1 + $0x7c0] sm:$0xff]  }
  0xac   :  { %3436 = vmatpush3.bf16.msra.mxu0 %v3736_v27  ;;  %v4576_v27 = vrot.slane %v691_v22, %v3935_v35 }
  0xad   :  { %3437 = vmatprep.subr.bf16.mxu0 %v3738_v29  ;;  %3458 = vmatpush3.bf16.msra.mxu1 %v3737_v28  ;;  %v728_v28 = vrot.slane %v706_v24, %v3935_v35  ;;  %v3793_v29 = vld [vmem:[%s4677_s1 + $0x700] sm:$0xff]  }
  0xae   :  { %3459 = vmatprep.subr.bf16.mxu1 %v3739_v30  ;;  %v707_v30 = vcombine.high %v4576_v27, %v4576_v27 }
  0xb0   :  { %3438 = vmatpush3.bf16.msra.mxu0 %v3740_v31  ;;  %v736_v31 = vcombine.high %v714_v25, %v714_v25 }
  0xb1   :  { %3439 = vmatprep.subr.bf16.mxu0 %v3742_v33  ;;  %3460 = vmatpush3.bf16.msra.mxu1 %v3741_v32  ;;  %v3795_v32 = vld [vmem:[%s4677_s1 + $0x748] sm:$0xff]   ;;  %v738_v33 = vcombine.high %v728_v28, %v728_v28 }
  0xb2   :  { %3461 = vmatprep.subr.bf16.mxu1 %v3743_v34  ;;  %v3794_v34 = vld [vmem:[%s4677_s1 + $0x780] sm:$0xff]  }
  0xb4   :  { %3440 = vmatpush3.bf16.msra.mxu0 %v3744_v36  ;;  %v735_v36 = vrot.slane %v707_v30, %v3935_v35 }
  0xb5   :  { %3441 = vmatprep.subr.bf16.mxu0 %v3746_v38  ;;  %3462 = vmatpush3.bf16.msra.mxu1 %v3745_v37  ;;  %v3796_v37 = vld [vmem:[%s4677_s1 + $0x7c8] sm:$0xff]  }
  0xb6   :  { %3463 = vmatprep.subr.bf16.mxu1 %v3747_v39  ;;  %v3797_v38 = vld [vmem:[%s4677_s1 + $0x708] sm:$0xff]   ;;  %v739_v39 = vcombine.high %v735_v36, %v735_v36 }
  0xb8   :  { %3442 = vmatpush3.bf16.msra.mxu0 %v3748_v40  ;;  %v3799_v40 = vld [vmem:[%s4677_s1 + $0x750] sm:$0xff]  }
  0xb9   :  { %3443 = vmatprep.subr.bf16.mxu0 %v3750_v42  ;;  %3464 = vmatpush3.bf16.msra.mxu1 %v3749_v41  ;;  %v3798_v41 = vld [vmem:[%s4677_s1 + $0x788] sm:$0xff]   ;;  %v3800_v42 = vld [vmem:[%s4677_s1 + $0x7d0] sm:$0xff]  }
  0xba   :  { %3465 = vmatprep.subr.bf16.mxu1 %v3751_v43  ;;  %v3801_v43 = vld [vmem:[%s4677_s1 + $0x710] sm:$0xff]  }
  0xbc   :  { %3444 = vmatpush3.bf16.msra.mxu0 %v3752_v44  ;;  %v3803_v44 = vld [vmem:[%s4677_s1 + $0x758] sm:$0xff]  }
  0xbd   :  { %3445 = vmatprep.subr.bf16.mxu0 %v3754_v46  ;;  %3466 = vmatpush3.bf16.msra.mxu1 %v3753_v45  ;;  %v3802_v45 = vld [vmem:[%s4677_s1 + $0x790] sm:$0xff]   ;;  %v3804_v46 = vld [vmem:[%s4677_s1 + $0x7d8] sm:$0xff]  }
  0xbe   :  { %3467 = vmatprep.subr.bf16.mxu1 %v3755_v47  ;;  %v3805_v47 = vld [vmem:[%s4677_s1 + $0x718] sm:$0xff]  }
  0xc0   :  { %3446 = vmatpush3.bf16.msra.mxu0 %v3756_v48  ;;  %v3807_v48 = vld [vmem:[%s4677_s1 + $0x760] sm:$0xff]  }
  0xc1   :  { %3475 = vmatprep.subr.bf16.mxu0 %v3759_v51  ;;  %3468 = vmatpush3.bf16.msra.mxu1 %v3757_v49  ;;  %v3806_v49 = vld [vmem:[%s4677_s1 + $0x798] sm:$0xff]   ;;  %v3809_v51 = vld [vmem:[%s4677_s1 + $0x720] sm:$0xff]  }
  0xc2   :  { %3497 = vmatprep.subr.bf16.mxu1 %v3760_v52  ;;  %v3811_v52 = vld [vmem:[%s4677_s1 + $0x768] sm:$0xff]  }
  0xc3   :  { %2741 = vmatmul.mubr.bf16.vlgmr.msra.gmra.mrb[20].mxu0 %v672_v50  ;;  %v3808_v50 = vld [vmem:[%s4677_s1 + $0x7e0] sm:$0xff]  }
  0xc4   :  { %3476 = vmatpush3.bf16.msra.mxu0 %v3761_v53  ;;  %2781 = vmatmul.mubr.bf16.vlgmr.msra.gmra.mrb[20].mxu1 %v688_v55  ;;  %v3810_v53 = vld [vmem:[%s4677_s1 + $0x7a0] sm:$0xff]  }
  0xc5   :  { %3477 = vmatprep.subr.bf16.mxu0 %v3763_v56  ;;  %3498 = vmatpush3.bf16.msra.mxu1 %v3762_v54  ;;  %v3812_v54 = vld [vmem:[%s4677_s1 + $0x7e8] sm:$0xff]   ;;  %v2954_v55 = vld [vmem:[#allocation2] ss:$0 sm:$0xff] }
  0xc6   :  { %3499 = vmatprep.subr.bf16.mxu1 %v3764_v57  ;;  %2820 = vmatprep.mubr.bf16.mxu0 %v728_v28  ;;  %v3813_v56 = vld [vmem:[%s4677_s1 + $0x728] sm:$0xff]  }
  0xc7   :  { %2860 = vmatprep.mubr.bf16.mxu1 %v738_v33 }
  0xc8   :  { %3478 = vmatpush3.bf16.msra.mxu0 %v3765_v58  ;;  %v3815_v58 = vld [vmem:[%s4677_s1 + $0x770] sm:$0xff]  }
  0xc9   :  { %3479 = vmatprep.subr.bf16.mxu0 %v3767_v60  ;;  %3500 = vmatpush3.bf16.msra.mxu1 %v3766_v59  ;;  %v3814_v60 = vld [vmem:[%s4677_s1 + $0x7a8] sm:$0xff]  }
  0xca   :  { %3501 = vmatprep.subr.bf16.mxu1 %v3768_v61 }
  0xcc   :  { %3480 = vmatpush3.bf16.msra.mxu0 %v3769_v62 }
  0xcd   :  { %3481 = vmatprep.subr.bf16.mxu0 %v3771_v0  ;;  %3502 = vmatpush3.bf16.msra.mxu1 %v3770_v63  ;;  %v3816_v0 = vld [vmem:[%s4677_s1 + $0x7f0] sm:$0xff]  }
  0xce   :  { %3503 = vmatprep.subr.bf16.mxu1 %v3772_v1  ;;  %v3817_v1 = vld [vmem:[%s4677_s1 + $0x730] sm:$0xff]  }
  0xd0   :  { %3482 = vmatpush3.bf16.msra.mxu0 %v3773_v2 }
  0xd1   :  { %3483 = vmatprep.subr.bf16.mxu0 %v3775_v4  ;;  %3504 = vmatpush3.bf16.msra.mxu1 %v3774_v3 }
  0xd2   :  { %3505 = vmatprep.subr.bf16.mxu1 %v3776_v5 }
  0xd4   :  { %3484 = vmatpush3.bf16.msra.mxu0 %v3777_v6 }
  0xd5   :  { %3485 = vmatprep.subr.bf16.mxu0 %v3779_v8  ;;  %3506 = vmatpush3.bf16.msra.mxu1 %v3778_v7  ;;  %v3819_v7 = vld [vmem:[%s4677_s1 + $0x778] sm:$0xff]  }
  0xd6   :  { %3507 = vmatprep.subr.bf16.mxu1 %v3780_v9  ;;  %v3818_v9 = vld [vmem:[%s4677_s1 + $0x7b0] sm:$0xff]  }
  0xd8   :  { %3486 = vmatpush3.bf16.msra.mxu0 %v3781_v10 }
  0xd9   :  { %3487 = vmatprep.subr.bf16.mxu0 %v3783_v12  ;;  %3508 = vmatpush3.bf16.msra.mxu1 %v3782_v11  ;;  %v3820_v11 = vld [vmem:[%s4677_s1 + $0x7f8] sm:$0xff]  }
  0xda   :  { %3509 = vmatprep.subr.bf16.mxu1 %v3784_v13  ;;  %v3821_v12 = vld [vmem:[%s4677_s1 + $0x738] sm:$0xff]   ;;  %v721_v13 = vrot.slane %v4576_v27, %v3935_v35 }
  0xdc   :  { %3488 = vmatpush3.bf16.msra.mxu0 %v3785_v14  ;;  %v3822_v14 = vld [vmem:[%s4677_s1 + $0x7b8] sm:$0xff]  }
  0xdd   :  { %3489 = vmatprep.subr.bf16.mxu0 %v3787_v16  ;;  %3510 = vmatpush3.bf16.msra.mxu1 %v3786_v15  ;;  %v737_v15 = vcombine.high %v721_v13, %v721_v13 }
  0xde   :  { %3511 = vmatprep.subr.bf16.mxu1 %v3788_v17 }
  0xe0   :  { %3490 = vmatpush3.bf16.msra.mxu0 %v3789_v18 }
  0xe1   :  { %3519 = vmatprep.subr.bf16.mxu0 %v3791_v21  ;;  %3512 = vmatpush3.bf16.msra.mxu1 %v3790_v23 }
  0xe2   :  { %3541 = vmatprep.subr.bf16.mxu1 %v3792_v26 }
  0xe3   :  { %2821 = vmatmul.mubr.bf16.vlgmr.msra.gmra.mrb[24].mxu0 %v714_v25 }
  0xe4   :  { %3520 = vmatpush3.bf16.msra.mxu0 %v3793_v29  ;;  %2861 = vmatmul.mubr.bf16.vlgmr.msra.gmra.mrb[24].mxu1 %v736_v31 }
  0xe5   :  { %3521 = vmatprep.subr.bf16.mxu0 %v3795_v32  ;;  %3542 = vmatpush3.bf16.msra.mxu1 %v3794_v34 }
  0xe6   :  { %2900 = vmatprep.mubr.bf16.mxu0 %v735_v36  ;;  %3543 = vmatprep.subr.bf16.mxu1 %v3796_v37 }
  0xe7   :  { %2940 = vmatprep.mubr.bf16.mxu1 %v739_v39 }
  0xe8   :  { %3522 = vmatpush3.bf16.msra.mxu0 %v3797_v38 }
  0xe9   :  { %3523 = vmatprep.subr.bf16.mxu0 %v3799_v40  ;;  %3544 = vmatpush3.bf16.msra.mxu1 %v3798_v41 }
  0xea   :  { %3545 = vmatprep.subr.bf16.mxu1 %v3800_v42 }
  0xec   :  { %3524 = vmatpush3.bf16.msra.mxu0 %v3801_v43 }
  0xed   :  { %3525 = vmatprep.subr.bf16.mxu0 %v3803_v44  ;;  %3546 = vmatpush3.bf16.msra.mxu1 %v3802_v45 }
  0xee   :  { %3547 = vmatprep.subr.bf16.mxu1 %v3804_v46 }
  0xf0   :  { %3526 = vmatpush3.bf16.msra.mxu0 %v3805_v47 }
  0xf1   :  { %3527 = vmatprep.subr.bf16.mxu0 %v3807_v48  ;;  %3548 = vmatpush3.bf16.msra.mxu1 %v3806_v49 }
  0xf2   :  { %3549 = vmatprep.subr.bf16.mxu1 %v3808_v50 }
  0xf4   :  { %3528 = vmatpush3.bf16.msra.mxu0 %v3809_v51 }
  0xf5   :  { %3529 = vmatprep.subr.bf16.mxu0 %v3811_v52  ;;  %3550 = vmatpush3.bf16.msra.mxu1 %v3810_v53 }
  0xf6   :  { %v3227_v57 = vpop.f32.mrb[0].mxu0  ;;  %3551 = vmatprep.subr.bf16.mxu1 %v3812_v54 }
  0xf7   :  { %v3228_v59 = vpop.f32.mrb[1].mxu0  ;;  %v3249_v61 = vpop.f32.mrb[0].mxu1 }
  0xf8   :  { %v3229_v62 = vadd.f32 %v3228_v59, %v3227_v57  ;;  %v3230_v63 = vpop.f32.mrb[2].mxu0  ;;  %v3250_v2 = vpop.f32.mrb[1].mxu1  ;;  %3530 = vmatpush3.bf16.msra.mxu0 %v3813_v56 }
  0xf9   :  { %v3231_v3 = vpop.f32.mrb[3].mxu0  ;;  %v3251_v5 = vadd.f32 %v3250_v2, %v3249_v61  ;;  %v3252_v6 = vpop.f32.mrb[2].mxu1  ;;  %3531 = vmatprep.subr.bf16.mxu0 %v3815_v58  ;;  %3552 = vmatpush3.bf16.msra.mxu1 %v3814_v60 }
  0xfa   :  { %v2343_v4 = vadd.f32 %v3229_v62, %v2954_v55  ;;  %v3253_v8 = vpop.f32.mrb[3].mxu1  ;;  %3553 = vmatprep.subr.bf16.mxu1 %v3816_v0 }
  0xfc   :  { %v2383_v10 = vadd.f32 %v3251_v5, %v2343_v4  ;;  %3532 = vmatpush3.bf16.msra.mxu0 %v3817_v1 }
  0xfd   :  { %3533 = vmatprep.subr.bf16.mxu0 %v3819_v7  ;;  %3554 = vmatpush3.bf16.msra.mxu1 %v3818_v9 }
  0xfe   :  { %3555 = vmatprep.subr.bf16.mxu1 %v3820_v11 }
 0x100   :  { %3534 = vmatpush3.bf16.msra.mxu0 %v3821_v12 }
 0x101   :  { %3556 = vmatpush3.bf16.msra.mxu1 %v3822_v14 }
 0x103   :  { %2901 = vmatmul.mubr.bf16.vlgmr.msra.gmra.mrb[28].mxu0 %v721_v13 }
 0x104   :  { %2941 = vmatmul.mubr.bf16.vlgmr.msra.gmra.mrb[28].mxu1 %v737_v15 }
 0x116   :  { %v3271_v16 = vpop.f32.mrb[4].mxu0 }
 0x117   :  { %v3272_v17 = vpop.f32.mrb[5].mxu0  ;;  %v3293_v18 = vpop.f32.mrb[4].mxu1 }
 0x118   :  { %v3273_v19 = vadd.f32 %v3272_v17, %v3271_v16  ;;  %v3274_v20 = vpop.f32.mrb[6].mxu0  ;;  %v3294_v21 = vpop.f32.mrb[5].mxu1 }
 0x119   :  { %v3275_v22 = vpop.f32.mrb[7].mxu0  ;;  %v3295_v35 = vadd.f32 %v3294_v21, %v3293_v18  ;;  %v3296_v24 = vpop.f32.mrb[6].mxu1 }
 0x11a   :  { %v2423_v23 = vadd.f32 %v3273_v19, %v2383_v10  ;;  %v3297_v25 = vpop.f32.mrb[7].mxu1 }
 0x11c   :  { %v2463_v26 = vadd.f32 %v3295_v35, %v2423_v23 }
 0x136   :  { %v3315_v27 = vpop.f32.mrb[8].mxu0 }
 0x137   :  { %v3316_v28 = vpop.f32.mrb[9].mxu0  ;;  %v3337_v29 = vpop.f32.mrb[8].mxu1 }
 0x138   :  { %v3317_v30 = vadd.f32 %v3316_v28, %v3315_v27  ;;  %v3318_v31 = vpop.f32.mrb[10].mxu0  ;;  %v3338_v32 = vpop.f32.mrb[9].mxu1 }
 0x139   :  { %v3319_v33 = vpop.f32.mrb[11].mxu0  ;;  %v3339_v36 = vadd.f32 %v3338_v32, %v3337_v29  ;;  %v3340_v37 = vpop.f32.mrb[10].mxu1 }
 0x13a   :  { %v2503_v34 = vadd.f32 %v3317_v30, %v2463_v26  ;;  %v3341_v38 = vpop.f32.mrb[11].mxu1 }
 0x13c   :  { %v2543_v39 = vadd.f32 %v3339_v36, %v2503_v34 }
 0x156   :  { %v3359_v40 = vpop.f32.mrb[12].mxu0 }
 0x157   :  { %v3360_v41 = vpop.f32.mrb[13].mxu0  ;;  %v3381_v42 = vpop.f32.mrb[12].mxu1 }
 0x158   :  { %v3361_v43 = vadd.f32 %v3360_v41, %v3359_v40  ;;  %v3362_v44 = vpop.f32.mrb[14].mxu0  ;;  %v3382_v45 = vpop.f32.mrb[13].mxu1 }
 0x159   :  { %v3363_v46 = vpop.f32.mrb[15].mxu0  ;;  %v3383_v48 = vadd.f32 %v3382_v45, %v3381_v42  ;;  %v3384_v49 = vpop.f32.mrb[14].mxu1 }
 0x15a   :  { %v2583_v47 = vadd.f32 %v3361_v43, %v2543_v39  ;;  %v3385_v50 = vpop.f32.mrb[15].mxu1 }
 0x15c   :  { %v2623_v51 = vadd.f32 %v3383_v48, %v2583_v47 }
 0x176   :  { %v3403_v52 = vpop.f32.mrb[16].mxu0 }
 0x177   :  { %v3404_v53 = vpop.f32.mrb[17].mxu0  ;;  %v3425_v54 = vpop.f32.mrb[16].mxu1 }
 0x178   :  { %v3405_v55 = vadd.f32 %v3404_v53, %v3403_v52  ;;  %v3406_v56 = vpop.f32.mrb[18].mxu0  ;;  %v3426_v57 = vpop.f32.mrb[17].mxu1 }
 0x179   :  { %v3407_v58 = vpop.f32.mrb[19].mxu0  ;;  %v3427_v60 = vadd.f32 %v3426_v57, %v3425_v54  ;;  %v3428_v61 = vpop.f32.mrb[18].mxu1 }
 0x17a   :  { %v2663_v59 = vadd.f32 %v3405_v55, %v2623_v51  ;;  %v3429_v62 = vpop.f32.mrb[19].mxu1 }
 0x17c   :  { %v2703_v63 = vadd.f32 %v3427_v60, %v2663_v59 }
 0x196   :  { %v3447_v0 = vpop.f32.mrb[20].mxu0 }
 0x197   :  { %v3448_v1 = vpop.f32.mrb[21].mxu0  ;;  %v3469_v2 = vpop.f32.mrb[20].mxu1 }
 0x198   :  { %v3449_v3 = vadd.f32 %v3448_v1, %v3447_v0  ;;  %v3450_v4 = vpop.f32.mrb[22].mxu0  ;;  %v3470_v5 = vpop.f32.mrb[21].mxu1 }
 0x199   :  { %v3451_v6 = vpop.f32.mrb[23].mxu0  ;;  %v3471_v8 = vadd.f32 %v3470_v5, %v3469_v2  ;;  %v3472_v9 = vpop.f32.mrb[22].mxu1 }
 0x19a   :  { %v2743_v7 = vadd.f32 %v3449_v3, %v2703_v63  ;;  %v3473_v10 = vpop.f32.mrb[23].mxu1 }
 0x19c   :  { %v2783_v11 = vadd.f32 %v3471_v8, %v2743_v7 }
 0x1b6   :  { %v3491_v12 = vpop.f32.mrb[24].mxu0 }
 0x1b7   :  { %v3492_v13 = vpop.f32.mrb[25].mxu0  ;;  %v3513_v14 = vpop.f32.mrb[24].mxu1 }
 0x1b8   :  { %v3493_v15 = vadd.f32 %v3492_v13, %v3491_v12  ;;  %v3494_v16 = vpop.f32.mrb[26].mxu0  ;;  %v3514_v17 = vpop.f32.mrb[25].mxu1 }
 0x1b9   :  { %v3495_v18 = vpop.f32.mrb[27].mxu0  ;;  %v3515_v20 = vadd.f32 %v3514_v17, %v3513_v14  ;;  %v3516_v21 = vpop.f32.mrb[26].mxu1 }
 0x1ba   :  { %v2823_v19 = vadd.f32 %v3493_v15, %v2783_v11  ;;  %v3517_v22 = vpop.f32.mrb[27].mxu1 }
 0x1bc   :  { %v2863_v23 = vadd.f32 %v3515_v20, %v2823_v19 }
 0x1d6   :  { %v3535_v35 = vpop.f32.mrb[28].mxu0 }
 0x1d7   :  { %v3536_v24 = vpop.f32.mrb[29].mxu0  ;;  %v3557_v25 = vpop.f32.mrb[28].mxu1 }
 0x1d8   :  { %v3537_v26 = vadd.f32 %v3536_v24, %v3535_v35  ;;  %v3538_v27 = vpop.f32.mrb[30].mxu0  ;;  %v3558_v28 = vpop.f32.mrb[29].mxu1 }
 0x1d9   :  { %v3539_v29 = vpop.f32.mrb[31].mxu0  ;;  %v3559_v31 = vadd.f32 %v3558_v28, %v3557_v25  ;;  %v3560_v32 = vpop.f32.mrb[30].mxu1 }
 0x1da   :  { %v2903_v30 = vadd.f32 %v3537_v26, %v2863_v23  ;;  %v3561_v33 = vpop.f32.mrb[31].mxu1 }
 0x1dc   :  { %v2943_v34 = vadd.f32 %v3559_v31, %v2903_v30 }
 0x1de   :  { %2949 = vst.msk [vmem:[%s4680_s3] sm:$0x3] %vm2948_vm0, %v2943_v34 }

</bundles_post_ra>
